<compile_context>
chip_gen: v7x
topology: tpu7x:2x2x1
jax: 0.10.0
libtpu: 0.0.40
codegen_flags: <defaults>
</compile_context>

<pallas_src>
import functools

import jax
import jax.numpy as jnp
from jax import lax
from jax.experimental import pallas as pl
from jax.experimental.pallas import tpu as pltpu


# ---------------- Fused CBAM kernel (channel gate -> spatial gate) ----------------
def _cbam_kernel(x_ref, w1t_ref, b1_ref, w2t_ref, b2_ref, mask_ref,
                 cw_ref, bn_ref, o_ref, *, H, W, K):
    P = (K - 1) // 2
    HW = H * W
    margin = P * W + P                              # flat row-padding requirement
    lead = ((margin + 127) // 128) * 128 if margin else 0   # lane-aligned left margin
    tail = lead                                     # keep total a lane multiple too
    Nb, C, _ = x_ref.shape

    x = x_ref[...].astype(jnp.float32)              # (Nb, C, HW)   lane-dense

    # ---- Channel gate: avg/max pool -> shared MLP -> sigmoid -> per-channel scale ----
    avg = jnp.mean(x, axis=-1)                      # (Nb, C)
    mxp = jnp.max(x, axis=-1)                       # (Nb, C)
    pools = jnp.concatenate([avg, mxp], axis=0)     # (2*Nb, C): one matmul pair for both branches
    h = jnp.dot(pools, w1t_ref[...], preferred_element_type=jnp.float32) + b1_ref[...]
    h = jnp.clip(h, 0.0, 6.0)                       # nn.ReLU6
    att = jnp.dot(h, w2t_ref[...], preferred_element_type=jnp.float32) + b2_ref[...]
    att = att[:Nb] + att[Nb:]                       # avg branch + max branch, (Nb, C)
    ch_scale = jax.nn.sigmoid(att)                  # (Nb, C)
    xc = x * ch_scale[:, :, None]                   # stays resident in VMEM/vregs

    # ---- Spatial gate: ChannelPool(max, mean) -> 7x7 conv -> BN -> sigmoid -> scale ----
    cmax = jnp.max(xc, axis=1)                      # (Nb, HW)
    cmean = jnp.mean(xc, axis=1)                    # (Nb, HW)
    pooled = jnp.stack([cmax, cmean], axis=0)       # (2, Nb, HW) — stacked max/mean slab

    if lead:
        zlead = jnp.zeros((2, Nb, lead), jnp.float32)
        ztail = jnp.zeros((2, Nb, tail), jnp.float32)
        pooled = jnp.concatenate([zlead, pooled, ztail], axis=-1)  # lane-aligned placement

    acc = jnp.zeros((Nb, HW), jnp.float32)
    for dx in range(K):
        # Read only the 2*K weights needed for this dx (bounded scalar live range).
        wmax = [cw_ref[dy * K + dx] for dy in range(K)]
        wmean = [cw_ref[K * K + dy * K + dx] for dy in range(K)]
        part = jnp.zeros((Nb, HW), jnp.float32)
        for dy in range(K):
            o = lead + (dy - P) * W + (dx - P)      # static lane offset
            sl = pooled[:, :, o:o + HW]             # ONE lane-shifted slice per tap
            part = part + wmax[dy] * sl[0] + wmean[dy] * sl[1]
        acc = acc + mask_ref[dx:dx + 1, :] * part   # column-validity mask (depends on dx only)

    y = acc * bn_ref[0] + bn_ref[1]                 # folded eval-mode BatchNorm2d
    sp_scale = jax.nn.sigmoid(y)                    # (Nb, HW)
    o_ref[...] = (xc * sp_scale[:, None, :]).astype(o_ref.dtype)


# ---------------- Wrapper ----------------------------------------------------------
def _vmem_limit_bytes():
    # Generation-aware scoped-VMEM limit: 3/4 of physical, capped at 96 MiB.
    # v5e/v6e (128 MiB physical) -> 96 MiB; v7x (64 MiB physical) -> 48 MiB.
    cap = 64 * 1024 * 1024                          # conservative fallback (v7x per-TC)
    try:
        cap = int(pltpu.get_tpu_info().vmem_capacity_bytes)
    except Exception:
        pass
    return min((cap * 3) // 4, 96 * 1024 * 1024)


def _pick_block_batch(N, C, HW, itemsize, vmem_limit):
    # Per-step working set ~ 2x(in) + 2x(out) caller-dtype blocks (double-buffered)
    # + ~3.5 block-sized f32 temporaries (x upcast, xc, stacked conv slabs), so
    # target an input block of ~vmem_limit/24 (4 MiB on 128-MiB parts, 2 MiB on v7x).
    per_img = C * HW * itemsize
    target = max(1 * 1024 * 1024, vmem_limit // 24)
    nb = max(1, min(N, target // max(per_img, 1)))
    # Keep >=4 grid steps when possible: with the batch axis "parallel" each of
    # v7x's two TensorCores then runs >=2 steps and the pipeline overlaps DMA.
    while nb > 1 and N // nb < 4:
        nb -= 1
    while N % nb:
        nb -= 1
    return max(nb, 1)


def cbam_forward(x, params, *, kernel_size=7, block_batch=None):
    N, C, H, W = x.shape
    HW = H * W
    K = kernel_size
    P = (K - 1) // 2
    hid = params["w1"].shape[0]

    vmem_limit = _vmem_limit_bytes()
    Nb = block_batch if block_batch is not None else _pick_block_batch(
        N, C, HW, jnp.dtype(x.dtype).itemsize, vmem_limit)
    assert N % Nb == 0, "block batch must divide N"

    # Column-validity masks for the K horizontal tap offsets (precomputed, lane-dense).
    col = jnp.tile(jnp.arange(W, dtype=jnp.int32), H)                 # flat x-position per lane
    masks = jnp.stack(
        [((col + (dx - P) >= 0) & (col + (dx - P) < W)).astype(jnp.float32)
         for dx in range(K)])                                         # (K, HW)

    x3 = x.reshape(N, C, HW)                                          # lane-dense view
    w1t = params["w1"].T                                              # (C, hid)
    w2t = params["w2"].T                                              # (hid, C)
    b1 = params["b1"].reshape(1, hid)
    b2 = params["b2"].reshape(1, C)

    kern = functools.partial(_cbam_kernel, H=H, W=W, K=K)
    out3 = pl.pallas_call(
        kern,
        out_shape=jax.ShapeDtypeStruct((N, C, HW), x.dtype),
        grid=(N // Nb,),
        in_specs=[
            pl.BlockSpec((Nb, C, HW), lambda n: (n, 0, 0)),
            pl.BlockSpec((C, hid), lambda n: (0, 0)),
            pl.BlockSpec((1, hid), lambda n: (0, 0)),
            pl.BlockSpec((hid, C), lambda n: (0, 0)),
            pl.BlockSpec((1, C), lambda n: (0, 0)),
            pl.BlockSpec((K, HW), lambda n: (0, 0)),
            pl.BlockSpec(memory_space=pltpu.MemorySpace.SMEM),        # conv weights (2*K*K,)
            pl.BlockSpec(memory_space=pltpu.MemorySpace.SMEM),        # BN [scale, shift]
        ],
        out_specs=pl.BlockSpec((Nb, C, HW), lambda n: (n, 0, 0)),
        compiler_params=pltpu.CompilerParams(
            dimension_semantics=("parallel",),     # batch axis independent -> megacore sharding
            vmem_limit_bytes=vmem_limit,           # explicit, generation-aware scoped VMEM
        ),
    )(x3, w1t, b1, w2t, b2, masks, params["conv_w_flat"], params["bn_scale_shift"])
    return out3.reshape(N, C, H, W)


# ---------------- Pure-JAX reference (for correctness check) -----------------------
def reference_cbam(x, w1, b1, w2, b2, conv_w, bn_scale, bn_shift):
    avg = x.mean(axis=(2, 3))                        # (N, C)
    mx = x.max(axis=(2, 3))                          # (N, C)

    def mlp(p):
        h = jnp.clip(p @ w1.T + b1, 0.0, 6.0)
        return h @ w2.T + b2

    att = jax.nn.sigmoid(mlp(avg) + mlp(mx))         # (N, C)
    xc = x * att[:, :, None, None]
    cp = jnp.stack([xc.max(axis=1), xc.mean(axis=1)], axis=1)  # (N, 2, H, W)
    conv = lax.conv_general_dilated(
        cp, conv_w, window_strides=(1, 1), padding="SAME",
        dimension_numbers=("NCHW", "OIHW", "NCHW"))
    y = conv * bn_scale + bn_shift
    return xc * jax.nn.sigmoid(y)


if __name__ == "__main__":
    N, C, H, W = 2, 32, 16, 16
    reduction_ratio = 16
    hid = C // reduction_ratio

    key = jax.random.PRNGKey(0)
    kx, k1, k2, k3, k4, k5 = jax.random.split(key, 6)
    x = jax.random.normal(kx, (N, C, H, W), jnp.float32)

    # Deterministic synthetic parameters (torch layouts).
    w1 = jax.random.normal(k1, (hid, C), jnp.float32) * 0.1   # Linear(C -> C//r).weight
    b1 = jax.random.normal(k2, (hid,), jnp.float32) * 0.1
    w2 = jax.random.normal(k3, (C, hid), jnp.float32) * 0.1   # Linear(C//r -> C).weight
    b2 = jax.random.normal(k4, (C,), jnp.float32) * 0.1
    conv_w = jax.random.normal(k5, (1, 2, 7, 7), jnp.float32) * 0.1  # Conv2d(2,1,7), no bias

    # BatchNorm2d(1) eval-mode defaults folded into scale/shift.
    gamma, beta, rmean, rvar, eps = 1.0, 0.0, 0.0, 1.0, 1e-5
    bn_scale = gamma / (rvar + eps) ** 0.5
    bn_shift = beta - rmean * bn_scale

    params = {
        "w1": w1, "b1": b1, "w2": w2, "b2": b2,
        "conv_w_flat": conv_w.reshape(-1),                     # [in_c, ky, kx] flattened
        "bn_scale_shift": jnp.array([bn_scale, bn_shift], jnp.float32),
    }

    out = cbam_forward(x, params)
    out = jax.block_until_ready(out)

    ref = reference_cbam(x, w1, b1, w2, b2, conv_w, bn_scale, bn_shift)
    assert out.shape == (N, C, H, W)
    assert jnp.allclose(out, ref, rtol=1e-4, atol=1e-4), "mismatch vs reference"

    print("KERNEL_OK")
</pallas_src>

<mosaic_0001>
module attributes {stable_mosaic.version = 11 : i64} {
  func.func @_cbam_kernel(%arg0: i32, %arg1: memref<1x32x256xf32, #tpu.memory_space<vmem>>, %arg2: memref<32x2xf32, #tpu.memory_space<vmem>>, %arg3: memref<1x2xf32, #tpu.memory_space<vmem>>, %arg4: memref<2x32xf32, #tpu.memory_space<vmem>>, %arg5: memref<1x32xf32, #tpu.memory_space<vmem>>, %arg6: memref<7x256xf32, #tpu.memory_space<vmem>>, %arg7: memref<98xf32, #tpu.memory_space<smem>>, %arg8: memref<2xf32, #tpu.memory_space<smem>>, %arg9: memref<1x32x256xf32, #tpu.memory_space<vmem>>) attributes {dimension_semantics = [#tpu.dimension_semantics<parallel>], iteration_bounds = array<i64: 2>, scalar_prefetch = 0 : i64, scratch_operands = 0 : i64, tpu.core_type = #tpu.core_type<tc>, window_params = [{transform_indices = @transform_0, window_bounds = array<i64: 1, 32, 256>}, {pipeline_mode = #tpu.pipeline_mode<synchronous>, transform_indices = @transform_1, window_bounds = array<i64: 32, 2>}, {pipeline_mode = #tpu.pipeline_mode<synchronous>, transform_indices = @transform_2, window_bounds = array<i64: 1, 2>}, {pipeline_mode = #tpu.pipeline_mode<synchronous>, transform_indices = @transform_3, window_bounds = array<i64: 2, 32>}, {pipeline_mode = #tpu.pipeline_mode<synchronous>, transform_indices = @transform_4, window_bounds = array<i64: 1, 32>}, {pipeline_mode = #tpu.pipeline_mode<synchronous>, transform_indices = @transform_5, window_bounds = array<i64: 7, 256>}, {transform_indices = @transform_6, window_bounds = array<i64: 98>}, {transform_indices = @transform_7, window_bounds = array<i64: 2>}, {transform_indices = @transform_8, window_bounds = array<i64: 1, 32, 256>}]} {
    %c0 = arith.constant 0 : index
    %c0_0 = arith.constant 0 : index
    %c0_1 = arith.constant 0 : index
    %0 = vector.load %arg1[%c0, %c0_0, %c0_1] : memref<1x32x256xf32, #tpu.memory_space<vmem>>, vector<1x32x256xf32>
    %cst = arith.constant dense<0.000000e+00> : vector<1x32xf32>
    %1 = vector.multi_reduction <add>, %0, %cst [2] : vector<1x32x256xf32> to vector<1x32xf32>
    %cst_2 = arith.constant 2.560000e+02 : f32
    %2 = vector.broadcast %cst_2 : f32 to vector<1x32xf32>
    %3 = arith.divf %1, %2 : vector<1x32xf32>
    %cst_3 = arith.constant dense<0xFF800000> : vector<1x32xf32>
    %4 = vector.multi_reduction <maximumf>, %0, %cst_3 [2] : vector<1x32x256xf32> to vector<1x32xf32>
    %5 = tpu.concatenate %3, %4 in 0 : vector<1x32xf32>, vector<1x32xf32> -> vector<2x32xf32>
    %c0_4 = arith.constant 0 : index
    %c0_5 = arith.constant 0 : index
    %6 = vector.load %arg2[%c0_4, %c0_5] : memref<32x2xf32, #tpu.memory_space<vmem>>, vector<32x2xf32>
    %cst_6 = arith.constant dense<0.000000e+00> : vector<2x2xf32>
    %7 = tpu.matmul %5, %6, %cst_6 {dimension_numbers = #tpu.dot_dimension_numbers<[1], [0], [0], [1], [0, 0, 1, 1], [], []>} : vector<2x32xf32>, vector<32x2xf32>, vector<2x2xf32> -> vector<2x2xf32>
    %c0_7 = arith.constant 0 : index
    %c0_8 = arith.constant 0 : index
    %8 = vector.load %arg3[%c0_7, %c0_8] : memref<1x2xf32, #tpu.memory_space<vmem>>, vector<1x2xf32>
    %9 = vector.broadcast %8 : vector<1x2xf32> to vector<2x2xf32>
    %10 = arith.addf %7, %9 : vector<2x2xf32>
    %cst_9 = arith.constant 0.000000e+00 : f32
    %cst_10 = arith.constant 6.000000e+00 : f32
    %11 = vector.broadcast %cst_9 : f32 to vector<2x2xf32>
    %12 = arith.maximumf %11, %10 : vector<2x2xf32>
    %13 = vector.broadcast %cst_10 : f32 to vector<2x2xf32>
    %14 = arith.minimumf %13, %12 : vector<2x2xf32>
    %c0_11 = arith.constant 0 : index
    %c0_12 = arith.constant 0 : index
    %15 = vector.load %arg4[%c0_11, %c0_12] : memref<2x32xf32, #tpu.memory_space<vmem>>, vector<2x32xf32>
    %cst_13 = arith.constant dense<0.000000e+00> : vector<2x32xf32>
    %16 = tpu.matmul %14, %15, %cst_13 {dimension_numbers = #tpu.dot_dimension_numbers<[1], [0], [0], [1], [0, 0, 1, 1], [], []>} : vector<2x2xf32>, vector<2x32xf32>, vector<2x32xf32> -> vector<2x32xf32>
    %c0_14 = arith.constant 0 : index
    %c0_15 = arith.constant 0 : index
    %17 = vector.load %arg5[%c0_14, %c0_15] : memref<1x32xf32, #tpu.memory_space<vmem>>, vector<1x32xf32>
    %18 = vector.broadcast %17 : vector<1x32xf32> to vector<2x32xf32>
    %19 = arith.addf %16, %18 : vector<2x32xf32>
    %20 = vector.extract_strided_slice %19 {offsets = [0, 0], sizes = [1, 32], strides = [1, 1]} : vector<2x32xf32> to vector<1x32xf32>
    %21 = vector.extract_strided_slice %19 {offsets = [1, 0], sizes = [1, 32], strides = [1, 1]} : vector<2x32xf32> to vector<1x32xf32>
    %22 = arith.addf %20, %21 : vector<1x32xf32>
    %23 = arith.negf %22 : vector<1x32xf32>
    %24 = math.exp %23 : vector<1x32xf32>
    %cst_16 = arith.constant 1.000000e+00 : f32
    %25 = vector.broadcast %cst_16 : f32 to vector<1x32xf32>
    %26 = arith.addf %25, %24 : vector<1x32xf32>
    %27 = arith.divf %25, %26 : vector<1x32xf32>
    %28 = vector.shape_cast %27 : vector<1x32xf32> to vector<1x32x1xf32>
    %29 = vector.broadcast %28 : vector<1x32x1xf32> to vector<1x32x256xf32>
    %30 = arith.mulf %0, %29 : vector<1x32x256xf32>
    %cst_17 = arith.constant dense<0xFF800000> : vector<1x256xf32>
    %31 = vector.multi_reduction <maximumf>, %30, %cst_17 [1] : vector<1x32x256xf32> to vector<1x256xf32>
    %cst_18 = arith.constant dense<0.000000e+00> : vector<1x256xf32>
    %32 = vector.multi_reduction <add>, %30, %cst_18 [1] : vector<1x32x256xf32> to vector<1x256xf32>
    %cst_19 = arith.constant 3.200000e+01 : f32
    %33 = vector.broadcast %cst_19 : f32 to vector<1x256xf32>
    %34 = arith.divf %32, %33 : vector<1x256xf32>
    %35 = vector.shape_cast %31 : vector<1x256xf32> to vector<1x1x256xf32>
    %36 = vector.shape_cast %34 : vector<1x256xf32> to vector<1x1x256xf32>
    %37 = tpu.concatenate %35, %36 in 0 : vector<1x1x256xf32>, vector<1x1x256xf32> -> vector<2x1x256xf32>
    %cst_20 = arith.constant 0.000000e+00 : f32
    %38 = vector.broadcast %cst_20 : f32 to vector<2x1x128xf32>
    %cst_21 = arith.constant 0.000000e+00 : f32
    %39 = vector.broadcast %cst_21 : f32 to vector<2x1x128xf32>
    %40 = tpu.concatenate %38, %37, %39 in 2 : vector<2x1x128xf32>, vector<2x1x256xf32>, vector<2x1x128xf32> -> vector<2x1x512xf32>
    %cst_22 = arith.constant 0.000000e+00 : f32
    %41 = vector.broadcast %cst_22 : f32 to vector<1x256xf32>
    %c0_23 = arith.constant 0 : index
    %42 = memref.load %arg7[%c0_23] : memref<98xf32, #tpu.memory_space<smem>>
    %c7 = arith.constant 7 : index
    %43 = memref.load %arg7[%c7] : memref<98xf32, #tpu.memory_space<smem>>
    %c14 = arith.constant 14 : index
    %44 = memref.load %arg7[%c14] : memref<98xf32, #tpu.memory_space<smem>>
    %c21 = arith.constant 21 : index
    %45 = memref.load %arg7[%c21] : memref<98xf32, #tpu.memory_space<smem>>
    %c28 = arith.constant 28 : index
    %46 = memref.load %arg7[%c28] : memref<98xf32, #tpu.memory_space<smem>>
    %c35 = arith.constant 35 : index
    %47 = memref.load %arg7[%c35] : memref<98xf32, #tpu.memory_space<smem>>
    %c42 = arith.constant 42 : index
    %48 = memref.load %arg7[%c42] : memref<98xf32, #tpu.memory_space<smem>>
    %c49 = arith.constant 49 : index
    %49 = memref.load %arg7[%c49] : memref<98xf32, #tpu.memory_space<smem>>
    %c56 = arith.constant 56 : index
    %50 = memref.load %arg7[%c56] : memref<98xf32, #tpu.memory_space<smem>>
    %c63 = arith.constant 63 : index
    %51 = memref.load %arg7[%c63] : memref<98xf32, #tpu.memory_space<smem>>
    %c70 = arith.constant 70 : index
    %52 = memref.load %arg7[%c70] : memref<98xf32, #tpu.memory_space<smem>>
    %c77 = arith.constant 77 : index
    %53 = memref.load %arg7[%c77] : memref<98xf32, #tpu.memory_space<smem>>
    %c84 = arith.constant 84 : index
    %54 = memref.load %arg7[%c84] : memref<98xf32, #tpu.memory_space<smem>>
    %c91 = arith.constant 91 : index
    %55 = memref.load %arg7[%c91] : memref<98xf32, #tpu.memory_space<smem>>
    %cst_24 = arith.constant 0.000000e+00 : f32
    %56 = vector.broadcast %cst_24 : f32 to vector<1x256xf32>
    %57 = vector.extract_strided_slice %40 {offsets = [0, 0, 77], sizes = [2, 1, 256], strides = [1, 1, 1]} : vector<2x1x512xf32> to vector<2x1x256xf32>
    %58 = vector.extract_strided_slice %57 {offsets = [0, 0, 0], sizes = [1, 1, 256], strides = [1, 1, 1]} : vector<2x1x256xf32> to vector<1x1x256xf32>
    %59 = vector.shape_cast %58 : vector<1x1x256xf32> to vector<1x256xf32>
    %60 = vector.broadcast %42 : f32 to vector<1x256xf32>
    %61 = arith.mulf %60, %59 : vector<1x256xf32>
    %62 = arith.addf %56, %61 : vector<1x256xf32>
    %63 = vector.extract_strided_slice %57 {offsets = [1, 0, 0], sizes = [1, 1, 256], strides = [1, 1, 1]} : vector<2x1x256xf32> to vector<1x1x256xf32>
    %64 = vector.shape_cast %63 : vector<1x1x256xf32> to vector<1x256xf32>
    %65 = vector.broadcast %49 : f32 to vector<1x256xf32>
    %66 = arith.mulf %65, %64 : vector<1x256xf32>
    %67 = arith.addf %62, %66 : vector<1x256xf32>
    %68 = vector.extract_strided_slice %40 {offsets = [0, 0, 93], sizes = [2, 1, 256], strides = [1, 1, 1]} : vector<2x1x512xf32> to vector<2x1x256xf32>
    %69 = vector.extract_strided_slice %68 {offsets = [0, 0, 0], sizes = [1, 1, 256], strides = [1, 1, 1]} : vector<2x1x256xf32> to vector<1x1x256xf32>
    %70 = vector.shape_cast %69 : vector<1x1x256xf32> to vector<1x256xf32>
    %71 = vector.broadcast %43 : f32 to vector<1x256xf32>
    %72 = arith.mulf %71, %70 : vector<1x256xf32>
    %73 = arith.addf %67, %72 : vector<1x256xf32>
    %74 = vector.extract_strided_slice %68 {offsets = [1, 0, 0], sizes = [1, 1, 256], strides = [1, 1, 1]} : vector<2x1x256xf32> to vector<1x1x256xf32>
    %75 = vector.shape_cast %74 : vector<1x1x256xf32> to vector<1x256xf32>
    %76 = vector.broadcast %50 : f32 to vector<1x256xf32>
    %77 = arith.mulf %76, %75 : vector<1x256xf32>
    %78 = arith.addf %73, %77 : vector<1x256xf32>
    %79 = vector.extract_strided_slice %40 {offsets = [0, 0, 109], sizes = [2, 1, 256], strides = [1, 1, 1]} : vector<2x1x512xf32> to vector<2x1x256xf32>
    %80 = vector.extract_strided_slice %79 {offsets = [0, 0, 0], sizes = [1, 1, 256], strides = [1, 1, 1]} : vector<2x1x256xf32> to vector<1x1x256xf32>
    %81 = vector.shape_cast %80 : vector<1x1x256xf32> to vector<1x256xf32>
    %82 = vector.broadcast %44 : f32 to vector<1x256xf32>
    %83 = arith.mulf %82, %81 : vector<1x256xf32>
    %84 = arith.addf %78, %83 : vector<1x256xf32>
    %85 = vector.extract_strided_slice %79 {offsets = [1, 0, 0], sizes = [1, 1, 256], strides = [1, 1, 1]} : vector<2x1x256xf32> to vector<1x1x256xf32>
    %86 = vector.shape_cast %85 : vector<1x1x256xf32> to vector<1x256xf32>
    %87 = vector.broadcast %51 : f32 to vector<1x256xf32>
    %88 = arith.mulf %87, %86 : vector<1x256xf32>
    %89 = arith.addf %84, %88 : vector<1x256xf32>
    %90 = vector.extract_strided_slice %40 {offsets = [0, 0, 125], sizes = [2, 1, 256], strides = [1, 1, 1]} : vector<2x1x512xf32> to vector<2x1x256xf32>
    %91 = vector.extract_strided_slice %90 {offsets = [0, 0, 0], sizes = [1, 1, 256], strides = [1, 1, 1]} : vector<2x1x256xf32> to vector<1x1x256xf32>
    %92 = vector.shape_cast %91 : vector<1x1x256xf32> to vector<1x256xf32>
    %93 = vector.broadcast %45 : f32 to vector<1x256xf32>
    %94 = arith.mulf %93, %92 : vector<1x256xf32>
    %95 = arith.addf %89, %94 : vector<1x256xf32>
    %96 = vector.extract_strided_slice %90 {offsets = [1, 0, 0], sizes = [1, 1, 256], strides = [1, 1, 1]} : vector<2x1x256xf32> to vector<1x1x256xf32>
    %97 = vector.shape_cast %96 : vector<1x1x256xf32> to vector<1x256xf32>
    %98 = vector.broadcast %52 : f32 to vector<1x256xf32>
    %99 = arith.mulf %98, %97 : vector<1x256xf32>
    %100 = arith.addf %95, %99 : vector<1x256xf32>
    %101 = vector.extract_strided_slice %40 {offsets = [0, 0, 141], sizes = [2, 1, 256], strides = [1, 1, 1]} : vector<2x1x512xf32> to vector<2x1x256xf32>
    %102 = vector.extract_strided_slice %101 {offsets = [0, 0, 0], sizes = [1, 1, 256], strides = [1, 1, 1]} : vector<2x1x256xf32> to vector<1x1x256xf32>
    %103 = vector.shape_cast %102 : vector<1x1x256xf32> to vector<1x256xf32>
    %104 = vector.broadcast %46 : f32 to vector<1x256xf32>
    %105 = arith.mulf %104, %103 : vector<1x256xf32>
    %106 = arith.addf %100, %105 : vector<1x256xf32>
    %107 = vector.extract_strided_slice %101 {offsets = [1, 0, 0], sizes = [1, 1, 256], strides = [1, 1, 1]} : vector<2x1x256xf32> to vector<1x1x256xf32>
    %108 = vector.shape_cast %107 : vector<1x1x256xf32> to vector<1x256xf32>
    %109 = vector.broadcast %53 : f32 to vector<1x256xf32>
    %110 = arith.mulf %109, %108 : vector<1x256xf32>
    %111 = arith.addf %106, %110 : vector<1x256xf32>
    %112 = vector.extract_strided_slice %40 {offsets = [0, 0, 157], sizes = [2, 1, 256], strides = [1, 1, 1]} : vector<2x1x512xf32> to vector<2x1x256xf32>
    %113 = vector.extract_strided_slice %112 {offsets = [0, 0, 0], sizes = [1, 1, 256], strides = [1, 1, 1]} : vector<2x1x256xf32> to vector<1x1x256xf32>
    %114 = vector.shape_cast %113 : vector<1x1x256xf32> to vector<1x256xf32>
    %115 = vector.broadcast %47 : f32 to vector<1x256xf32>
    %116 = arith.mulf %115, %114 : vector<1x256xf32>
    %117 = arith.addf %111, %116 : vector<1x256xf32>
    %118 = vector.extract_strided_slice %112 {offsets = [1, 0, 0], sizes = [1, 1, 256], strides = [1, 1, 1]} : vector<2x1x256xf32> to vector<1x1x256xf32>
    %119 = vector.shape_cast %118 : vector<1x1x256xf32> to vector<1x256xf32>
    %120 = vector.broadcast %54 : f32 to vector<1x256xf32>
    %121 = arith.mulf %120, %119 : vector<1x256xf32>
    %122 = arith.addf %117, %121 : vector<1x256xf32>
    %123 = vector.extract_strided_slice %40 {offsets = [0, 0, 173], sizes = [2, 1, 256], strides = [1, 1, 1]} : vector<2x1x512xf32> to vector<2x1x256xf32>
    %124 = vector.extract_strided_slice %123 {offsets = [0, 0, 0], sizes = [1, 1, 256], strides = [1, 1, 1]} : vector<2x1x256xf32> to vector<1x1x256xf32>
    %125 = vector.shape_cast %124 : vector<1x1x256xf32> to vector<1x256xf32>
    %126 = vector.broadcast %48 : f32 to vector<1x256xf32>
    %127 = arith.mulf %126, %125 : vector<1x256xf32>
    %128 = arith.addf %122, %127 : vector<1x256xf32>
    %129 = vector.extract_strided_slice %123 {offsets = [1, 0, 0], sizes = [1, 1, 256], strides = [1, 1, 1]} : vector<2x1x256xf32> to vector<1x1x256xf32>
    %130 = vector.shape_cast %129 : vector<1x1x256xf32> to vector<1x256xf32>
    %131 = vector.broadcast %55 : f32 to vector<1x256xf32>
    %132 = arith.mulf %131, %130 : vector<1x256xf32>
    %133 = arith.addf %128, %132 : vector<1x256xf32>
    %c0_25 = arith.constant 0 : index
    %c0_26 = arith.constant 0 : index
    %134 = vector.load %arg6[%c0_25, %c0_26] : memref<7x256xf32, #tpu.memory_space<vmem>>, vector<1x256xf32>
    %135 = arith.mulf %134, %133 : vector<1x256xf32>
    %136 = arith.addf %41, %135 : vector<1x256xf32>
    %c1 = arith.constant 1 : index
    %137 = memref.load %arg7[%c1] : memref<98xf32, #tpu.memory_space<smem>>
    %c8 = arith.constant 8 : index
    %138 = memref.load %arg7[%c8] : memref<98xf32, #tpu.memory_space<smem>>
    %c15 = arith.constant 15 : index
    %139 = memref.load %arg7[%c15] : memref<98xf32, #tpu.memory_space<smem>>
    %c22 = arith.constant 22 : index
    %140 = memref.load %arg7[%c22] : memref<98xf32, #tpu.memory_space<smem>>
    %c29 = arith.constant 29 : index
    %141 = memref.load %arg7[%c29] : memref<98xf32, #tpu.memory_space<smem>>
    %c36 = arith.constant 36 : index
    %142 = memref.load %arg7[%c36] : memref<98xf32, #tpu.memory_space<smem>>
    %c43 = arith.constant 43 : index
    %143 = memref.load %arg7[%c43] : memref<98xf32, #tpu.memory_space<smem>>
    %c50 = arith.constant 50 : index
    %144 = memref.load %arg7[%c50] : memref<98xf32, #tpu.memory_space<smem>>
    %c57 = arith.constant 57 : index
    %145 = memref.load %arg7[%c57] : memref<98xf32, #tpu.memory_space<smem>>
    %c64 = arith.constant 64 : index
    %146 = memref.load %arg7[%c64] : memref<98xf32, #tpu.memory_space<smem>>
    %c71 = arith.constant 71 : index
    %147 = memref.load %arg7[%c71] : memref<98xf32, #tpu.memory_space<smem>>
    %c78 = arith.constant 78 : index
    %148 = memref.load %arg7[%c78] : memref<98xf32, #tpu.memory_space<smem>>
    %c85 = arith.constant 85 : index
    %149 = memref.load %arg7[%c85] : memref<98xf32, #tpu.memory_space<smem>>
    %c92 = arith.constant 92 : index
    %150 = memref.load %arg7[%c92] : memref<98xf32, #tpu.memory_space<smem>>
    %cst_27 = arith.constant 0.000000e+00 : f32
    %151 = vector.broadcast %cst_27 : f32 to vector<1x256xf32>
    %152 = vector.extract_strided_slice %40 {offsets = [0, 0, 78], sizes = [2, 1, 256], strides = [1, 1, 1]} : vector<2x1x512xf32> to vector<2x1x256xf32>
    %153 = vector.extract_strided_slice %152 {offsets = [0, 0, 0], sizes = [1, 1, 256], strides = [1, 1, 1]} : vector<2x1x256xf32> to vector<1x1x256xf32>
    %154 = vector.shape_cast %153 : vector<1x1x256xf32> to vector<1x256xf32>
    %155 = vector.broadcast %137 : f32 to vector<1x256xf32>
    %156 = arith.mulf %155, %154 : vector<1x256xf32>
    %157 = arith.addf %151, %156 : vector<1x256xf32>
    %158 = vector.extract_strided_slice %152 {offsets = [1, 0, 0], sizes = [1, 1, 256], strides = [1, 1, 1]} : vector<2x1x256xf32> to vector<1x1x256xf32>
    %159 = vector.shape_cast %158 : vector<1x1x256xf32> to vector<1x256xf32>
    %160 = vector.broadcast %144 : f32 to vector<1x256xf32>
    %161 = arith.mulf %160, %159 : vector<1x256xf32>
    %162 = arith.addf %157, %161 : vector<1x256xf32>
    %163 = vector.extract_strided_slice %40 {offsets = [0, 0, 94], sizes = [2, 1, 256], strides = [1, 1, 1]} : vector<2x1x512xf32> to vector<2x1x256xf32>
    %164 = vector.extract_strided_slice %163 {offsets = [0, 0, 0], sizes = [1, 1, 256], strides = [1, 1, 1]} : vector<2x1x256xf32> to vector<1x1x256xf32>
    %165 = vector.shape_cast %164 : vector<1x1x256xf32> to vector<1x256xf32>
    %166 = vector.broadcast %138 : f32 to vector<1x256xf32>
    %167 = arith.mulf %166, %165 : vector<1x256xf32>
    %168 = arith.addf %162, %167 : vector<1x256xf32>
    %169 = vector.extract_strided_slice %163 {offsets = [1, 0, 0], sizes = [1, 1, 256], strides = [1, 1, 1]} : vector<2x1x256xf32> to vector<1x1x256xf32>
    %170 = vector.shape_cast %169 : vector<1x1x256xf32> to vector<1x256xf32>
    %171 = vector.broadcast %145 : f32 to vector<1x256xf32>
    %172 = arith.mulf %171, %170 : vector<1x256xf32>
    %173 = arith.addf %168, %172 : vector<1x256xf32>
    %174 = vector.extract_strided_slice %40 {offsets = [0, 0, 110], sizes = [2, 1, 256], strides = [1, 1, 1]} : vector<2x1x512xf32> to vector<2x1x256xf32>
    %175 = vector.extract_strided_slice %174 {offsets = [0, 0, 0], sizes = [1, 1, 256], strides = [1, 1, 1]} : vector<2x1x256xf32> to vector<1x1x256xf32>
    %176 = vector.shape_cast %175 : vector<1x1x256xf32> to vector<1x256xf32>
    %177 = vector.broadcast %139 : f32 to vector<1x256xf32>
    %178 = arith.mulf %177, %176 : vector<1x256xf32>
    %179 = arith.addf %173, %178 : vector<1x256xf32>
    %180 = vector.extract_strided_slice %174 {offsets = [1, 0, 0], sizes = [1, 1, 256], strides = [1, 1, 1]} : vector<2x1x256xf32> to vector<1x1x256xf32>
    %181 = vector.shape_cast %180 : vector<1x1x256xf32> to vector<1x256xf32>
    %182 = vector.broadcast %146 : f32 to vector<1x256xf32>
    %183 = arith.mulf %182, %181 : vector<1x256xf32>
    %184 = arith.addf %179, %183 : vector<1x256xf32>
    %185 = vector.extract_strided_slice %40 {offsets = [0, 0, 126], sizes = [2, 1, 256], strides = [1, 1, 1]} : vector<2x1x512xf32> to vector<2x1x256xf32>
    %186 = vector.extract_strided_slice %185 {offsets = [0, 0, 0], sizes = [1, 1, 256], strides = [1, 1, 1]} : vector<2x1x256xf32> to vector<1x1x256xf32>
    %187 = vector.shape_cast %186 : vector<1x1x256xf32> to vector<1x256xf32>
    %188 = vector.broadcast %140 : f32 to vector<1x256xf32>
    %189 = arith.mulf %188, %187 : vector<1x256xf32>
    %190 = arith.addf %184, %189 : vector<1x256xf32>
    %191 = vector.extract_strided_slice %185 {offsets = [1, 0, 0], sizes = [1, 1, 256], strides = [1, 1, 1]} : vector<2x1x256xf32> to vector<1x1x256xf32>
    %192 = vector.shape_cast %191 : vector<1x1x256xf32> to vector<1x256xf32>
    %193 = vector.broadcast %147 : f32 to vector<1x256xf32>
    %194 = arith.mulf %193, %192 : vector<1x256xf32>
    %195 = arith.addf %190, %194 : vector<1x256xf32>
    %196 = vector.extract_strided_slice %40 {offsets = [0, 0, 142], sizes = [2, 1, 256], strides = [1, 1, 1]} : vector<2x1x512xf32> to vector<2x1x256xf32>
    %197 = vector.extract_strided_slice %196 {offsets = [0, 0, 0], sizes = [1, 1, 256], strides = [1, 1, 1]} : vector<2x1x256xf32> to vector<1x1x256xf32>
    %198 = vector.shape_cast %197 : vector<1x1x256xf32> to vector<1x256xf32>
    %199 = vector.broadcast %141 : f32 to vector<1x256xf32>
    %200 = arith.mulf %199, %198 : vector<1x256xf32>
    %201 = arith.addf %195, %200 : vector<1x256xf32>
    %202 = vector.extract_strided_slice %196 {offsets = [1, 0, 0], sizes = [1, 1, 256], strides = [1, 1, 1]} : vector<2x1x256xf32> to vector<1x1x256xf32>
    %203 = vector.shape_cast %202 : vector<1x1x256xf32> to vector<1x256xf32>
    %204 = vector.broadcast %148 : f32 to vector<1x256xf32>
    %205 = arith.mulf %204, %203 : vector<1x256xf32>
    %206 = arith.addf %201, %205 : vector<1x256xf32>
    %207 = vector.extract_strided_slice %40 {offsets = [0, 0, 158], sizes = [2, 1, 256], strides = [1, 1, 1]} : vector<2x1x512xf32> to vector<2x1x256xf32>
    %208 = vector.extract_strided_slice %207 {offsets = [0, 0, 0], sizes = [1, 1, 256], strides = [1, 1, 1]} : vector<2x1x256xf32> to vector<1x1x256xf32>
    %209 = vector.shape_cast %208 : vector<1x1x256xf32> to vector<1x256xf32>
    %210 = vector.broadcast %142 : f32 to vector<1x256xf32>
    %211 = arith.mulf %210, %209 : vector<1x256xf32>
    %212 = arith.addf %206, %211 : vector<1x256xf32>
    %213 = vector.extract_strided_slice %207 {offsets = [1, 0, 0], sizes = [1, 1, 256], strides = [1, 1, 1]} : vector<2x1x256xf32> to vector<1x1x256xf32>
    %214 = vector.shape_cast %213 : vector<1x1x256xf32> to vector<1x256xf32>
    %215 = vector.broadcast %149 : f32 to vector<1x256xf32>
    %216 = arith.mulf %215, %214 : vector<1x256xf32>
    %217 = arith.addf %212, %216 : vector<1x256xf32>
    %218 = vector.extract_strided_slice %40 {offsets = [0, 0, 174], sizes = [2, 1, 256], strides = [1, 1, 1]} : vector<2x1x512xf32> to vector<2x1x256xf32>
    %219 = vector.extract_strided_slice %218 {offsets = [0, 0, 0], sizes = [1, 1, 256], strides = [1, 1, 1]} : vector<2x1x256xf32> to vector<1x1x256xf32>
    %220 = vector.shape_cast %219 : vector<1x1x256xf32> to vector<1x256xf32>
    %221 = vector.broadcast %143 : f32 to vector<1x256xf32>
    %222 = arith.mulf %221, %220 : vector<1x256xf32>
    %223 = arith.addf %217, %222 : vector<1x256xf32>
    %224 = vector.extract_strided_slice %218 {offsets = [1, 0, 0], sizes = [1, 1, 256], strides = [1, 1, 1]} : vector<2x1x256xf32> to vector<1x1x256xf32>
    %225 = vector.shape_cast %224 : vector<1x1x256xf32> to vector<1x256xf32>
    %226 = vector.broadcast %150 : f32 to vector<1x256xf32>
    %227 = arith.mulf %226, %225 : vector<1x256xf32>
    %228 = arith.addf %223, %227 : vector<1x256xf32>
    %c1_28 = arith.constant 1 : index
    %c0_29 = arith.constant 0 : index
    %229 = vector.load %arg6[%c1_28, %c0_29] : memref<7x256xf32, #tpu.memory_space<vmem>>, vector<1x256xf32>
    %230 = arith.mulf %229, %228 : vector<1x256xf32>
    %231 = arith.addf %136, %230 : vector<1x256xf32>
    %c2 = arith.constant 2 : index
    %232 = memref.load %arg7[%c2] : memref<98xf32, #tpu.memory_space<smem>>
    %c9 = arith.constant 9 : index
    %233 = memref.load %arg7[%c9] : memref<98xf32, #tpu.memory_space<smem>>
    %c16 = arith.constant 16 : index
    %234 = memref.load %arg7[%c16] : memref<98xf32, #tpu.memory_space<smem>>
    %c23 = arith.constant 23 : index
    %235 = memref.load %arg7[%c23] : memref<98xf32, #tpu.memory_space<smem>>
    %c30 = arith.constant 30 : index
    %236 = memref.load %arg7[%c30] : memref<98xf32, #tpu.memory_space<smem>>
    %c37 = arith.constant 37 : index
    %237 = memref.load %arg7[%c37] : memref<98xf32, #tpu.memory_space<smem>>
    %c44 = arith.constant 44 : index
    %238 = memref.load %arg7[%c44] : memref<98xf32, #tpu.memory_space<smem>>
    %c51 = arith.constant 51 : index
    %239 = memref.load %arg7[%c51] : memref<98xf32, #tpu.memory_space<smem>>
    %c58 = arith.constant 58 : index
    %240 = memref.load %arg7[%c58] : memref<98xf32, #tpu.memory_space<smem>>
    %c65 = arith.constant 65 : index
    %241 = memref.load %arg7[%c65] : memref<98xf32, #tpu.memory_space<smem>>
    %c72 = arith.constant 72 : index
    %242 = memref.load %arg7[%c72] : memref<98xf32, #tpu.memory_space<smem>>
    %c79 = arith.constant 79 : index
    %243 = memref.load %arg7[%c79] : memref<98xf32, #tpu.memory_space<smem>>
    %c86 = arith.constant 86 : index
    %244 = memref.load %arg7[%c86] : memref<98xf32, #tpu.memory_space<smem>>
    %c93 = arith.constant 93 : index
    %245 = memref.load %arg7[%c93] : memref<98xf32, #tpu.memory_space<smem>>
    %cst_30 = arith.constant 0.000000e+00 : f32
    %246 = vector.broadcast %cst_30 : f32 to vector<1x256xf32>
    %247 = vector.extract_strided_slice %40 {offsets = [0, 0, 79], sizes = [2, 1, 256], strides = [1, 1, 1]} : vector<2x1x512xf32> to vector<2x1x256xf32>
    %248 = vector.extract_strided_slice %247 {offsets = [0, 0, 0], sizes = [1, 1, 256], strides = [1, 1, 1]} : vector<2x1x256xf32> to vector<1x1x256xf32>
    %249 = vector.shape_cast %248 : vector<1x1x256xf32> to vector<1x256xf32>
    %250 = vector.broadcast %232 : f32 to vector<1x256xf32>
    %251 = arith.mulf %250, %249 : vector<1x256xf32>
    %252 = arith.addf %246, %251 : vector<1x256xf32>
    %253 = vector.extract_strided_slice %247 {offsets = [1, 0, 0], sizes = [1, 1, 256], strides = [1, 1, 1]} : vector<2x1x256xf32> to vector<1x1x256xf32>
    %254 = vector.shape_cast %253 : vector<1x1x256xf32> to vector<1x256xf32>
    %255 = vector.broadcast %239 : f32 to vector<1x256xf32>
    %256 = arith.mulf %255, %254 : vector<1x256xf32>
    %257 = arith.addf %252, %256 : vector<1x256xf32>
    %258 = vector.extract_strided_slice %40 {offsets = [0, 0, 95], sizes = [2, 1, 256], strides = [1, 1, 1]} : vector<2x1x512xf32> to vector<2x1x256xf32>
    %259 = vector.extract_strided_slice %258 {offsets = [0, 0, 0], sizes = [1, 1, 256], strides = [1, 1, 1]} : vector<2x1x256xf32> to vector<1x1x256xf32>
    %260 = vector.shape_cast %259 : vector<1x1x256xf32> to vector<1x256xf32>
    %261 = vector.broadcast %233 : f32 to vector<1x256xf32>
    %262 = arith.mulf %261, %260 : vector<1x256xf32>
    %263 = arith.addf %257, %262 : vector<1x256xf32>
    %264 = vector.extract_strided_slice %258 {offsets = [1, 0, 0], sizes = [1, 1, 256], strides = [1, 1, 1]} : vector<2x1x256xf32> to vector<1x1x256xf32>
    %265 = vector.shape_cast %264 : vector<1x1x256xf32> to vector<1x256xf32>
    %266 = vector.broadcast %240 : f32 to vector<1x256xf32>
    %267 = arith.mulf %266, %265 : vector<1x256xf32>
    %268 = arith.addf %263, %267 : vector<1x256xf32>
    %269 = vector.extract_strided_slice %40 {offsets = [0, 0, 111], sizes = [2, 1, 256], strides = [1, 1, 1]} : vector<2x1x512xf32> to vector<2x1x256xf32>
    %270 = vector.extract_strided_slice %269 {offsets = [0, 0, 0], sizes = [1, 1, 256], strides = [1, 1, 1]} : vector<2x1x256xf32> to vector<1x1x256xf32>
    %271 = vector.shape_cast %270 : vector<1x1x256xf32> to vector<1x256xf32>
    %272 = vector.broadcast %234 : f32 to vector<1x256xf32>
    %273 = arith.mulf %272, %271 : vector<1x256xf32>
    %274 = arith.addf %268, %273 : vector<1x256xf32>
    %275 = vector.extract_strided_slice %269 {offsets = [1, 0, 0], sizes = [1, 1, 256], strides = [1, 1, 1]} : vector<2x1x256xf32> to vector<1x1x256xf32>
    %276 = vector.shape_cast %275 : vector<1x1x256xf32> to vector<1x256xf32>
    %277 = vector.broadcast %241 : f32 to vector<1x256xf32>
    %278 = arith.mulf %277, %276 : vector<1x256xf32>
    %279 = arith.addf %274, %278 : vector<1x256xf32>
    %280 = vector.extract_strided_slice %40 {offsets = [0, 0, 127], sizes = [2, 1, 256], strides = [1, 1, 1]} : vector<2x1x512xf32> to vector<2x1x256xf32>
    %281 = vector.extract_strided_slice %280 {offsets = [0, 0, 0], sizes = [1, 1, 256], strides = [1, 1, 1]} : vector<2x1x256xf32> to vector<1x1x256xf32>
    %282 = vector.shape_cast %281 : vector<1x1x256xf32> to vector<1x256xf32>
    %283 = vector.broadcast %235 : f32 to vector<1x256xf32>
    %284 = arith.mulf %283, %282 : vector<1x256xf32>
    %285 = arith.addf %279, %284 : vector<1x256xf32>
    %286 = vector.extract_strided_slice %280 {offsets = [1, 0, 0], sizes = [1, 1, 256], strides = [1, 1, 1]} : vector<2x1x256xf32> to vector<1x1x256xf32>
    %287 = vector.shape_cast %286 : vector<1x1x256xf32> to vector<1x256xf32>
    %288 = vector.broadcast %242 : f32 to vector<1x256xf32>
    %289 = arith.mulf %288, %287 : vector<1x256xf32>
    %290 = arith.addf %285, %289 : vector<1x256xf32>
    %291 = vector.extract_strided_slice %40 {offsets = [0, 0, 143], sizes = [2, 1, 256], strides = [1, 1, 1]} : vector<2x1x512xf32> to vector<2x1x256xf32>
    %292 = vector.extract_strided_slice %291 {offsets = [0, 0, 0], sizes = [1, 1, 256], strides = [1, 1, 1]} : vector<2x1x256xf32> to vector<1x1x256xf32>
    %293 = vector.shape_cast %292 : vector<1x1x256xf32> to vector<1x256xf32>
    %294 = vector.broadcast %236 : f32 to vector<1x256xf32>
    %295 = arith.mulf %294, %293 : vector<1x256xf32>
    %296 = arith.addf %290, %295 : vector<1x256xf32>
    %297 = vector.extract_strided_slice %291 {offsets = [1, 0, 0], sizes = [1, 1, 256], strides = [1, 1, 1]} : vector<2x1x256xf32> to vector<1x1x256xf32>
    %298 = vector.shape_cast %297 : vector<1x1x256xf32> to vector<1x256xf32>
    %299 = vector.broadcast %243 : f32 to vector<1x256xf32>
    %300 = arith.mulf %299, %298 : vector<1x256xf32>
    %301 = arith.addf %296, %300 : vector<1x256xf32>
    %302 = vector.extract_strided_slice %40 {offsets = [0, 0, 159], sizes = [2, 1, 256], strides = [1, 1, 1]} : vector<2x1x512xf32> to vector<2x1x256xf32>
    %303 = vector.extract_strided_slice %302 {offsets = [0, 0, 0], sizes = [1, 1, 256], strides = [1, 1, 1]} : vector<2x1x256xf32> to vector<1x1x256xf32>
    %304 = vector.shape_cast %303 : vector<1x1x256xf32> to vector<1x256xf32>
    %305 = vector.broadcast %237 : f32 to vector<1x256xf32>
    %306 = arith.mulf %305, %304 : vector<1x256xf32>
    %307 = arith.addf %301, %306 : vector<1x256xf32>
    %308 = vector.extract_strided_slice %302 {offsets = [1, 0, 0], sizes = [1, 1, 256], strides = [1, 1, 1]} : vector<2x1x256xf32> to vector<1x1x256xf32>
    %309 = vector.shape_cast %308 : vector<1x1x256xf32> to vector<1x256xf32>
    %310 = vector.broadcast %244 : f32 to vector<1x256xf32>
    %311 = arith.mulf %310, %309 : vector<1x256xf32>
    %312 = arith.addf %307, %311 : vector<1x256xf32>
    %313 = vector.extract_strided_slice %40 {offsets = [0, 0, 175], sizes = [2, 1, 256], strides = [1, 1, 1]} : vector<2x1x512xf32> to vector<2x1x256xf32>
    %314 = vector.extract_strided_slice %313 {offsets = [0, 0, 0], sizes = [1, 1, 256], strides = [1, 1, 1]} : vector<2x1x256xf32> to vector<1x1x256xf32>
    %315 = vector.shape_cast %314 : vector<1x1x256xf32> to vector<1x256xf32>
    %316 = vector.broadcast %238 : f32 to vector<1x256xf32>
    %317 = arith.mulf %316, %315 : vector<1x256xf32>
    %318 = arith.addf %312, %317 : vector<1x256xf32>
    %319 = vector.extract_strided_slice %313 {offsets = [1, 0, 0], sizes = [1, 1, 256], strides = [1, 1, 1]} : vector<2x1x256xf32> to vector<1x1x256xf32>
    %320 = vector.shape_cast %319 : vector<1x1x256xf32> to vector<1x256xf32>
    %321 = vector.broadcast %245 : f32 to vector<1x256xf32>
    %322 = arith.mulf %321, %320 : vector<1x256xf32>
    %323 = arith.addf %318, %322 : vector<1x256xf32>
    %c2_31 = arith.constant 2 : index
    %c0_32 = arith.constant 0 : index
    %324 = vector.load %arg6[%c2_31, %c0_32] : memref<7x256xf32, #tpu.memory_space<vmem>>, vector<1x256xf32>
    %325 = arith.mulf %324, %323 : vector<1x256xf32>
    %326 = arith.addf %231, %325 : vector<1x256xf32>
    %c3 = arith.constant 3 : index
    %327 = memref.load %arg7[%c3] : memref<98xf32, #tpu.memory_space<smem>>
    %c10 = arith.constant 10 : index
    %328 = memref.load %arg7[%c10] : memref<98xf32, #tpu.memory_space<smem>>
    %c17 = arith.constant 17 : index
    %329 = memref.load %arg7[%c17] : memref<98xf32, #tpu.memory_space<smem>>
    %c24 = arith.constant 24 : index
    %330 = memref.load %arg7[%c24] : memref<98xf32, #tpu.memory_space<smem>>
    %c31 = arith.constant 31 : index
    %331 = memref.load %arg7[%c31] : memref<98xf32, #tpu.memory_space<smem>>
    %c38 = arith.constant 38 : index
    %332 = memref.load %arg7[%c38] : memref<98xf32, #tpu.memory_space<smem>>
    %c45 = arith.constant 45 : index
    %333 = memref.load %arg7[%c45] : memref<98xf32, #tpu.memory_space<smem>>
    %c52 = arith.constant 52 : index
    %334 = memref.load %arg7[%c52] : memref<98xf32, #tpu.memory_space<smem>>
    %c59 = arith.constant 59 : index
    %335 = memref.load %arg7[%c59] : memref<98xf32, #tpu.memory_space<smem>>
    %c66 = arith.constant 66 : index
    %336 = memref.load %arg7[%c66] : memref<98xf32, #tpu.memory_space<smem>>
    %c73 = arith.constant 73 : index
    %337 = memref.load %arg7[%c73] : memref<98xf32, #tpu.memory_space<smem>>
    %c80 = arith.constant 80 : index
    %338 = memref.load %arg7[%c80] : memref<98xf32, #tpu.memory_space<smem>>
    %c87 = arith.constant 87 : index
    %339 = memref.load %arg7[%c87] : memref<98xf32, #tpu.memory_space<smem>>
    %c94 = arith.constant 94 : index
    %340 = memref.load %arg7[%c94] : memref<98xf32, #tpu.memory_space<smem>>
    %cst_33 = arith.constant 0.000000e+00 : f32
    %341 = vector.broadcast %cst_33 : f32 to vector<1x256xf32>
    %342 = vector.extract_strided_slice %40 {offsets = [0, 0, 80], sizes = [2, 1, 256], strides = [1, 1, 1]} : vector<2x1x512xf32> to vector<2x1x256xf32>
    %343 = vector.extract_strided_slice %342 {offsets = [0, 0, 0], sizes = [1, 1, 256], strides = [1, 1, 1]} : vector<2x1x256xf32> to vector<1x1x256xf32>
    %344 = vector.shape_cast %343 : vector<1x1x256xf32> to vector<1x256xf32>
    %345 = vector.broadcast %327 : f32 to vector<1x256xf32>
    %346 = arith.mulf %345, %344 : vector<1x256xf32>
    %347 = arith.addf %341, %346 : vector<1x256xf32>
    %348 = vector.extract_strided_slice %342 {offsets = [1, 0, 0], sizes = [1, 1, 256], strides = [1, 1, 1]} : vector<2x1x256xf32> to vector<1x1x256xf32>
    %349 = vector.shape_cast %348 : vector<1x1x256xf32> to vector<1x256xf32>
    %350 = vector.broadcast %334 : f32 to vector<1x256xf32>
    %351 = arith.mulf %350, %349 : vector<1x256xf32>
    %352 = arith.addf %347, %351 : vector<1x256xf32>
    %353 = vector.extract_strided_slice %40 {offsets = [0, 0, 96], sizes = [2, 1, 256], strides = [1, 1, 1]} : vector<2x1x512xf32> to vector<2x1x256xf32>
    %354 = vector.extract_strided_slice %353 {offsets = [0, 0, 0], sizes = [1, 1, 256], strides = [1, 1, 1]} : vector<2x1x256xf32> to vector<1x1x256xf32>
    %355 = vector.shape_cast %354 : vector<1x1x256xf32> to vector<1x256xf32>
    %356 = vector.broadcast %328 : f32 to vector<1x256xf32>
    %357 = arith.mulf %356, %355 : vector<1x256xf32>
    %358 = arith.addf %352, %357 : vector<1x256xf32>
    %359 = vector.extract_strided_slice %353 {offsets = [1, 0, 0], sizes = [1, 1, 256], strides = [1, 1, 1]} : vector<2x1x256xf32> to vector<1x1x256xf32>
    %360 = vector.shape_cast %359 : vector<1x1x256xf32> to vector<1x256xf32>
    %361 = vector.broadcast %335 : f32 to vector<1x256xf32>
    %362 = arith.mulf %361, %360 : vector<1x256xf32>
    %363 = arith.addf %358, %362 : vector<1x256xf32>
    %364 = vector.extract_strided_slice %40 {offsets = [0, 0, 112], sizes = [2, 1, 256], strides = [1, 1, 1]} : vector<2x1x512xf32> to vector<2x1x256xf32>
    %365 = vector.extract_strided_slice %364 {offsets = [0, 0, 0], sizes = [1, 1, 256], strides = [1, 1, 1]} : vector<2x1x256xf32> to vector<1x1x256xf32>
    %366 = vector.shape_cast %365 : vector<1x1x256xf32> to vector<1x256xf32>
    %367 = vector.broadcast %329 : f32 to vector<1x256xf32>
    %368 = arith.mulf %367, %366 : vector<1x256xf32>
    %369 = arith.addf %363, %368 : vector<1x256xf32>
    %370 = vector.extract_strided_slice %364 {offsets = [1, 0, 0], sizes = [1, 1, 256], strides = [1, 1, 1]} : vector<2x1x256xf32> to vector<1x1x256xf32>
    %371 = vector.shape_cast %370 : vector<1x1x256xf32> to vector<1x256xf32>
    %372 = vector.broadcast %336 : f32 to vector<1x256xf32>
    %373 = arith.mulf %372, %371 : vector<1x256xf32>
    %374 = arith.addf %369, %373 : vector<1x256xf32>
    %375 = vector.extract_strided_slice %40 {offsets = [0, 0, 128], sizes = [2, 1, 256], strides = [1, 1, 1]} : vector<2x1x512xf32> to vector<2x1x256xf32>
    %376 = vector.extract_strided_slice %375 {offsets = [0, 0, 0], sizes = [1, 1, 256], strides = [1, 1, 1]} : vector<2x1x256xf32> to vector<1x1x256xf32>
    %377 = vector.shape_cast %376 : vector<1x1x256xf32> to vector<1x256xf32>
    %378 = vector.broadcast %330 : f32 to vector<1x256xf32>
    %379 = arith.mulf %378, %377 : vector<1x256xf32>
    %380 = arith.addf %374, %379 : vector<1x256xf32>
    %381 = vector.extract_strided_slice %375 {offsets = [1, 0, 0], sizes = [1, 1, 256], strides = [1, 1, 1]} : vector<2x1x256xf32> to vector<1x1x256xf32>
    %382 = vector.shape_cast %381 : vector<1x1x256xf32> to vector<1x256xf32>
    %383 = vector.broadcast %337 : f32 to vector<1x256xf32>
    %384 = arith.mulf %383, %382 : vector<1x256xf32>
    %385 = arith.addf %380, %384 : vector<1x256xf32>
    %386 = vector.extract_strided_slice %40 {offsets = [0, 0, 144], sizes = [2, 1, 256], strides = [1, 1, 1]} : vector<2x1x512xf32> to vector<2x1x256xf32>
    %387 = vector.extract_strided_slice %386 {offsets = [0, 0, 0], sizes = [1, 1, 256], strides = [1, 1, 1]} : vector<2x1x256xf32> to vector<1x1x256xf32>
    %388 = vector.shape_cast %387 : vector<1x1x256xf32> to vector<1x256xf32>
    %389 = vector.broadcast %331 : f32 to vector<1x256xf32>
    %390 = arith.mulf %389, %388 : vector<1x256xf32>
    %391 = arith.addf %385, %390 : vector<1x256xf32>
    %392 = vector.extract_strided_slice %386 {offsets = [1, 0, 0], sizes = [1, 1, 256], strides = [1, 1, 1]} : vector<2x1x256xf32> to vector<1x1x256xf32>
    %393 = vector.shape_cast %392 : vector<1x1x256xf32> to vector<1x256xf32>
    %394 = vector.broadcast %338 : f32 to vector<1x256xf32>
    %395 = arith.mulf %394, %393 : vector<1x256xf32>
    %396 = arith.addf %391, %395 : vector<1x256xf32>
    %397 = vector.extract_strided_slice %40 {offsets = [0, 0, 160], sizes = [2, 1, 256], strides = [1, 1, 1]} : vector<2x1x512xf32> to vector<2x1x256xf32>
    %398 = vector.extract_strided_slice %397 {offsets = [0, 0, 0], sizes = [1, 1, 256], strides = [1, 1, 1]} : vector<2x1x256xf32> to vector<1x1x256xf32>
    %399 = vector.shape_cast %398 : vector<1x1x256xf32> to vector<1x256xf32>
    %400 = vector.broadcast %332 : f32 to vector<1x256xf32>
    %401 = arith.mulf %400, %399 : vector<1x256xf32>
    %402 = arith.addf %396, %401 : vector<1x256xf32>
    %403 = vector.extract_strided_slice %397 {offsets = [1, 0, 0], sizes = [1, 1, 256], strides = [1, 1, 1]} : vector<2x1x256xf32> to vector<1x1x256xf32>
    %404 = vector.shape_cast %403 : vector<1x1x256xf32> to vector<1x256xf32>
    %405 = vector.broadcast %339 : f32 to vector<1x256xf32>
    %406 = arith.mulf %405, %404 : vector<1x256xf32>
    %407 = arith.addf %402, %406 : vector<1x256xf32>
    %408 = vector.extract_strided_slice %40 {offsets = [0, 0, 176], sizes = [2, 1, 256], strides = [1, 1, 1]} : vector<2x1x512xf32> to vector<2x1x256xf32>
    %409 = vector.extract_strided_slice %408 {offsets = [0, 0, 0], sizes = [1, 1, 256], strides = [1, 1, 1]} : vector<2x1x256xf32> to vector<1x1x256xf32>
    %410 = vector.shape_cast %409 : vector<1x1x256xf32> to vector<1x256xf32>
    %411 = vector.broadcast %333 : f32 to vector<1x256xf32>
    %412 = arith.mulf %411, %410 : vector<1x256xf32>
    %413 = arith.addf %407, %412 : vector<1x256xf32>
    %414 = vector.extract_strided_slice %408 {offsets = [1, 0, 0], sizes = [1, 1, 256], strides = [1, 1, 1]} : vector<2x1x256xf32> to vector<1x1x256xf32>
    %415 = vector.shape_cast %414 : vector<1x1x256xf32> to vector<1x256xf32>
    %416 = vector.broadcast %340 : f32 to vector<1x256xf32>
    %417 = arith.mulf %416, %415 : vector<1x256xf32>
    %418 = arith.addf %413, %417 : vector<1x256xf32>
    %c3_34 = arith.constant 3 : index
    %c0_35 = arith.constant 0 : index
    %419 = vector.load %arg6[%c3_34, %c0_35] : memref<7x256xf32, #tpu.memory_space<vmem>>, vector<1x256xf32>
    %420 = arith.mulf %419, %418 : vector<1x256xf32>
    %421 = arith.addf %326, %420 : vector<1x256xf32>
    %c4 = arith.constant 4 : index
    %422 = memref.load %arg7[%c4] : memref<98xf32, #tpu.memory_space<smem>>
    %c11 = arith.constant 11 : index
    %423 = memref.load %arg7[%c11] : memref<98xf32, #tpu.memory_space<smem>>
    %c18 = arith.constant 18 : index
    %424 = memref.load %arg7[%c18] : memref<98xf32, #tpu.memory_space<smem>>
    %c25 = arith.constant 25 : index
    %425 = memref.load %arg7[%c25] : memref<98xf32, #tpu.memory_space<smem>>
    %c32 = arith.constant 32 : index
    %426 = memref.load %arg7[%c32] : memref<98xf32, #tpu.memory_space<smem>>
    %c39 = arith.constant 39 : index
    %427 = memref.load %arg7[%c39] : memref<98xf32, #tpu.memory_space<smem>>
    %c46 = arith.constant 46 : index
    %428 = memref.load %arg7[%c46] : memref<98xf32, #tpu.memory_space<smem>>
    %c53 = arith.constant 53 : index
    %429 = memref.load %arg7[%c53] : memref<98xf32, #tpu.memory_space<smem>>
    %c60 = arith.constant 60 : index
    %430 = memref.load %arg7[%c60] : memref<98xf32, #tpu.memory_space<smem>>
    %c67 = arith.constant 67 : index
    %431 = memref.load %arg7[%c67] : memref<98xf32, #tpu.memory_space<smem>>
    %c74 = arith.constant 74 : index
    %432 = memref.load %arg7[%c74] : memref<98xf32, #tpu.memory_space<smem>>
    %c81 = arith.constant 81 : index
    %433 = memref.load %arg7[%c81] : memref<98xf32, #tpu.memory_space<smem>>
    %c88 = arith.constant 88 : index
    %434 = memref.load %arg7[%c88] : memref<98xf32, #tpu.memory_space<smem>>
    %c95 = arith.constant 95 : index
    %435 = memref.load %arg7[%c95] : memref<98xf32, #tpu.memory_space<smem>>
    %cst_36 = arith.constant 0.000000e+00 : f32
    %436 = vector.broadcast %cst_36 : f32 to vector<1x256xf32>
    %437 = vector.extract_strided_slice %40 {offsets = [0, 0, 81], sizes = [2, 1, 256], strides = [1, 1, 1]} : vector<2x1x512xf32> to vector<2x1x256xf32>
    %438 = vector.extract_strided_slice %437 {offsets = [0, 0, 0], sizes = [1, 1, 256], strides = [1, 1, 1]} : vector<2x1x256xf32> to vector<1x1x256xf32>
    %439 = vector.shape_cast %438 : vector<1x1x256xf32> to vector<1x256xf32>
    %440 = vector.broadcast %422 : f32 to vector<1x256xf32>
    %441 = arith.mulf %440, %439 : vector<1x256xf32>
    %442 = arith.addf %436, %441 : vector<1x256xf32>
    %443 = vector.extract_strided_slice %437 {offsets = [1, 0, 0], sizes = [1, 1, 256], strides = [1, 1, 1]} : vector<2x1x256xf32> to vector<1x1x256xf32>
    %444 = vector.shape_cast %443 : vector<1x1x256xf32> to vector<1x256xf32>
    %445 = vector.broadcast %429 : f32 to vector<1x256xf32>
    %446 = arith.mulf %445, %444 : vector<1x256xf32>
    %447 = arith.addf %442, %446 : vector<1x256xf32>
    %448 = vector.extract_strided_slice %40 {offsets = [0, 0, 97], sizes = [2, 1, 256], strides = [1, 1, 1]} : vector<2x1x512xf32> to vector<2x1x256xf32>
    %449 = vector.extract_strided_slice %448 {offsets = [0, 0, 0], sizes = [1, 1, 256], strides = [1, 1, 1]} : vector<2x1x256xf32> to vector<1x1x256xf32>
    %450 = vector.shape_cast %449 : vector<1x1x256xf32> to vector<1x256xf32>
    %451 = vector.broadcast %423 : f32 to vector<1x256xf32>
    %452 = arith.mulf %451, %450 : vector<1x256xf32>
    %453 = arith.addf %447, %452 : vector<1x256xf32>
    %454 = vector.extract_strided_slice %448 {offsets = [1, 0, 0], sizes = [1, 1, 256], strides = [1, 1, 1]} : vector<2x1x256xf32> to vector<1x1x256xf32>
    %455 = vector.shape_cast %454 : vector<1x1x256xf32> to vector<1x256xf32>
    %456 = vector.broadcast %430 : f32 to vector<1x256xf32>
    %457 = arith.mulf %456, %455 : vector<1x256xf32>
    %458 = arith.addf %453, %457 : vector<1x256xf32>
    %459 = vector.extract_strided_slice %40 {offsets = [0, 0, 113], sizes = [2, 1, 256], strides = [1, 1, 1]} : vector<2x1x512xf32> to vector<2x1x256xf32>
    %460 = vector.extract_strided_slice %459 {offsets = [0, 0, 0], sizes = [1, 1, 256], strides = [1, 1, 1]} : vector<2x1x256xf32> to vector<1x1x256xf32>
    %461 = vector.shape_cast %460 : vector<1x1x256xf32> to vector<1x256xf32>
    %462 = vector.broadcast %424 : f32 to vector<1x256xf32>
    %463 = arith.mulf %462, %461 : vector<1x256xf32>
    %464 = arith.addf %458, %463 : vector<1x256xf32>
    %465 = vector.extract_strided_slice %459 {offsets = [1, 0, 0], sizes = [1, 1, 256], strides = [1, 1, 1]} : vector<2x1x256xf32> to vector<1x1x256xf32>
    %466 = vector.shape_cast %465 : vector<1x1x256xf32> to vector<1x256xf32>
    %467 = vector.broadcast %431 : f32 to vector<1x256xf32>
    %468 = arith.mulf %467, %466 : vector<1x256xf32>
    %469 = arith.addf %464, %468 : vector<1x256xf32>
    %470 = vector.extract_strided_slice %40 {offsets = [0, 0, 129], sizes = [2, 1, 256], strides = [1, 1, 1]} : vector<2x1x512xf32> to vector<2x1x256xf32>
    %471 = vector.extract_strided_slice %470 {offsets = [0, 0, 0], sizes = [1, 1, 256], strides = [1, 1, 1]} : vector<2x1x256xf32> to vector<1x1x256xf32>
    %472 = vector.shape_cast %471 : vector<1x1x256xf32> to vector<1x256xf32>
    %473 = vector.broadcast %425 : f32 to vector<1x256xf32>
    %474 = arith.mulf %473, %472 : vector<1x256xf32>
    %475 = arith.addf %469, %474 : vector<1x256xf32>
    %476 = vector.extract_strided_slice %470 {offsets = [1, 0, 0], sizes = [1, 1, 256], strides = [1, 1, 1]} : vector<2x1x256xf32> to vector<1x1x256xf32>
    %477 = vector.shape_cast %476 : vector<1x1x256xf32> to vector<1x256xf32>
    %478 = vector.broadcast %432 : f32 to vector<1x256xf32>
    %479 = arith.mulf %478, %477 : vector<1x256xf32>
    %480 = arith.addf %475, %479 : vector<1x256xf32>
    %481 = vector.extract_strided_slice %40 {offsets = [0, 0, 145], sizes = [2, 1, 256], strides = [1, 1, 1]} : vector<2x1x512xf32> to vector<2x1x256xf32>
    %482 = vector.extract_strided_slice %481 {offsets = [0, 0, 0], sizes = [1, 1, 256], strides = [1, 1, 1]} : vector<2x1x256xf32> to vector<1x1x256xf32>
    %483 = vector.shape_cast %482 : vector<1x1x256xf32> to vector<1x256xf32>
    %484 = vector.broadcast %426 : f32 to vector<1x256xf32>
    %485 = arith.mulf %484, %483 : vector<1x256xf32>
    %486 = arith.addf %480, %485 : vector<1x256xf32>
    %487 = vector.extract_strided_slice %481 {offsets = [1, 0, 0], sizes = [1, 1, 256], strides = [1, 1, 1]} : vector<2x1x256xf32> to vector<1x1x256xf32>
    %488 = vector.shape_cast %487 : vector<1x1x256xf32> to vector<1x256xf32>
    %489 = vector.broadcast %433 : f32 to vector<1x256xf32>
    %490 = arith.mulf %489, %488 : vector<1x256xf32>
    %491 = arith.addf %486, %490 : vector<1x256xf32>
    %492 = vector.extract_strided_slice %40 {offsets = [0, 0, 161], sizes = [2, 1, 256], strides = [1, 1, 1]} : vector<2x1x512xf32> to vector<2x1x256xf32>
    %493 = vector.extract_strided_slice %492 {offsets = [0, 0, 0], sizes = [1, 1, 256], strides = [1, 1, 1]} : vector<2x1x256xf32> to vector<1x1x256xf32>
    %494 = vector.shape_cast %493 : vector<1x1x256xf32> to vector<1x256xf32>
    %495 = vector.broadcast %427 : f32 to vector<1x256xf32>
    %496 = arith.mulf %495, %494 : vector<1x256xf32>
    %497 = arith.addf %491, %496 : vector<1x256xf32>
    %498 = vector.extract_strided_slice %492 {offsets = [1, 0, 0], sizes = [1, 1, 256], strides = [1, 1, 1]} : vector<2x1x256xf32> to vector<1x1x256xf32>
    %499 = vector.shape_cast %498 : vector<1x1x256xf32> to vector<1x256xf32>
    %500 = vector.broadcast %434 : f32 to vector<1x256xf32>
    %501 = arith.mulf %500, %499 : vector<1x256xf32>
    %502 = arith.addf %497, %501 : vector<1x256xf32>
    %503 = vector.extract_strided_slice %40 {offsets = [0, 0, 177], sizes = [2, 1, 256], strides = [1, 1, 1]} : vector<2x1x512xf32> to vector<2x1x256xf32>
    %504 = vector.extract_strided_slice %503 {offsets = [0, 0, 0], sizes = [1, 1, 256], strides = [1, 1, 1]} : vector<2x1x256xf32> to vector<1x1x256xf32>
    %505 = vector.shape_cast %504 : vector<1x1x256xf32> to vector<1x256xf32>
    %506 = vector.broadcast %428 : f32 to vector<1x256xf32>
    %507 = arith.mulf %506, %505 : vector<1x256xf32>
    %508 = arith.addf %502, %507 : vector<1x256xf32>
    %509 = vector.extract_strided_slice %503 {offsets = [1, 0, 0], sizes = [1, 1, 256], strides = [1, 1, 1]} : vector<2x1x256xf32> to vector<1x1x256xf32>
    %510 = vector.shape_cast %509 : vector<1x1x256xf32> to vector<1x256xf32>
    %511 = vector.broadcast %435 : f32 to vector<1x256xf32>
    %512 = arith.mulf %511, %510 : vector<1x256xf32>
    %513 = arith.addf %508, %512 : vector<1x256xf32>
    %c4_37 = arith.constant 4 : index
    %c0_38 = arith.constant 0 : index
    %514 = vector.load %arg6[%c4_37, %c0_38] : memref<7x256xf32, #tpu.memory_space<vmem>>, vector<1x256xf32>
    %515 = arith.mulf %514, %513 : vector<1x256xf32>
    %516 = arith.addf %421, %515 : vector<1x256xf32>
    %c5 = arith.constant 5 : index
    %517 = memref.load %arg7[%c5] : memref<98xf32, #tpu.memory_space<smem>>
    %c12 = arith.constant 12 : index
    %518 = memref.load %arg7[%c12] : memref<98xf32, #tpu.memory_space<smem>>
    %c19 = arith.constant 19 : index
    %519 = memref.load %arg7[%c19] : memref<98xf32, #tpu.memory_space<smem>>
    %c26 = arith.constant 26 : index
    %520 = memref.load %arg7[%c26] : memref<98xf32, #tpu.memory_space<smem>>
    %c33 = arith.constant 33 : index
    %521 = memref.load %arg7[%c33] : memref<98xf32, #tpu.memory_space<smem>>
    %c40 = arith.constant 40 : index
    %522 = memref.load %arg7[%c40] : memref<98xf32, #tpu.memory_space<smem>>
    %c47 = arith.constant 47 : index
    %523 = memref.load %arg7[%c47] : memref<98xf32, #tpu.memory_space<smem>>
    %c54 = arith.constant 54 : index
    %524 = memref.load %arg7[%c54] : memref<98xf32, #tpu.memory_space<smem>>
    %c61 = arith.constant 61 : index
    %525 = memref.load %arg7[%c61] : memref<98xf32, #tpu.memory_space<smem>>
    %c68 = arith.constant 68 : index
    %526 = memref.load %arg7[%c68] : memref<98xf32, #tpu.memory_space<smem>>
    %c75 = arith.constant 75 : index
    %527 = memref.load %arg7[%c75] : memref<98xf32, #tpu.memory_space<smem>>
    %c82 = arith.constant 82 : index
    %528 = memref.load %arg7[%c82] : memref<98xf32, #tpu.memory_space<smem>>
    %c89 = arith.constant 89 : index
    %529 = memref.load %arg7[%c89] : memref<98xf32, #tpu.memory_space<smem>>
    %c96 = arith.constant 96 : index
    %530 = memref.load %arg7[%c96] : memref<98xf32, #tpu.memory_space<smem>>
    %cst_39 = arith.constant 0.000000e+00 : f32
    %531 = vector.broadcast %cst_39 : f32 to vector<1x256xf32>
    %532 = vector.extract_strided_slice %40 {offsets = [0, 0, 82], sizes = [2, 1, 256], strides = [1, 1, 1]} : vector<2x1x512xf32> to vector<2x1x256xf32>
    %533 = vector.extract_strided_slice %532 {offsets = [0, 0, 0], sizes = [1, 1, 256], strides = [1, 1, 1]} : vector<2x1x256xf32> to vector<1x1x256xf32>
    %534 = vector.shape_cast %533 : vector<1x1x256xf32> to vector<1x256xf32>
    %535 = vector.broadcast %517 : f32 to vector<1x256xf32>
    %536 = arith.mulf %535, %534 : vector<1x256xf32>
    %537 = arith.addf %531, %536 : vector<1x256xf32>
    %538 = vector.extract_strided_slice %532 {offsets = [1, 0, 0], sizes = [1, 1, 256], strides = [1, 1, 1]} : vector<2x1x256xf32> to vector<1x1x256xf32>
    %539 = vector.shape_cast %538 : vector<1x1x256xf32> to vector<1x256xf32>
    %540 = vector.broadcast %524 : f32 to vector<1x256xf32>
    %541 = arith.mulf %540, %539 : vector<1x256xf32>
    %542 = arith.addf %537, %541 : vector<1x256xf32>
    %543 = vector.extract_strided_slice %40 {offsets = [0, 0, 98], sizes = [2, 1, 256], strides = [1, 1, 1]} : vector<2x1x512xf32> to vector<2x1x256xf32>
    %544 = vector.extract_strided_slice %543 {offsets = [0, 0, 0], sizes = [1, 1, 256], strides = [1, 1, 1]} : vector<2x1x256xf32> to vector<1x1x256xf32>
    %545 = vector.shape_cast %544 : vector<1x1x256xf32> to vector<1x256xf32>
    %546 = vector.broadcast %518 : f32 to vector<1x256xf32>
    %547 = arith.mulf %546, %545 : vector<1x256xf32>
    %548 = arith.addf %542, %547 : vector<1x256xf32>
    %549 = vector.extract_strided_slice %543 {offsets = [1, 0, 0], sizes = [1, 1, 256], strides = [1, 1, 1]} : vector<2x1x256xf32> to vector<1x1x256xf32>
    %550 = vector.shape_cast %549 : vector<1x1x256xf32> to vector<1x256xf32>
    %551 = vector.broadcast %525 : f32 to vector<1x256xf32>
    %552 = arith.mulf %551, %550 : vector<1x256xf32>
    %553 = arith.addf %548, %552 : vector<1x256xf32>
    %554 = vector.extract_strided_slice %40 {offsets = [0, 0, 114], sizes = [2, 1, 256], strides = [1, 1, 1]} : vector<2x1x512xf32> to vector<2x1x256xf32>
    %555 = vector.extract_strided_slice %554 {offsets = [0, 0, 0], sizes = [1, 1, 256], strides = [1, 1, 1]} : vector<2x1x256xf32> to vector<1x1x256xf32>
    %556 = vector.shape_cast %555 : vector<1x1x256xf32> to vector<1x256xf32>
    %557 = vector.broadcast %519 : f32 to vector<1x256xf32>
    %558 = arith.mulf %557, %556 : vector<1x256xf32>
    %559 = arith.addf %553, %558 : vector<1x256xf32>
    %560 = vector.extract_strided_slice %554 {offsets = [1, 0, 0], sizes = [1, 1, 256], strides = [1, 1, 1]} : vector<2x1x256xf32> to vector<1x1x256xf32>
    %561 = vector.shape_cast %560 : vector<1x1x256xf32> to vector<1x256xf32>
    %562 = vector.broadcast %526 : f32 to vector<1x256xf32>
    %563 = arith.mulf %562, %561 : vector<1x256xf32>
    %564 = arith.addf %559, %563 : vector<1x256xf32>
    %565 = vector.extract_strided_slice %40 {offsets = [0, 0, 130], sizes = [2, 1, 256], strides = [1, 1, 1]} : vector<2x1x512xf32> to vector<2x1x256xf32>
    %566 = vector.extract_strided_slice %565 {offsets = [0, 0, 0], sizes = [1, 1, 256], strides = [1, 1, 1]} : vector<2x1x256xf32> to vector<1x1x256xf32>
    %567 = vector.shape_cast %566 : vector<1x1x256xf32> to vector<1x256xf32>
    %568 = vector.broadcast %520 : f32 to vector<1x256xf32>
    %569 = arith.mulf %568, %567 : vector<1x256xf32>
    %570 = arith.addf %564, %569 : vector<1x256xf32>
    %571 = vector.extract_strided_slice %565 {offsets = [1, 0, 0], sizes = [1, 1, 256], strides = [1, 1, 1]} : vector<2x1x256xf32> to vector<1x1x256xf32>
    %572 = vector.shape_cast %571 : vector<1x1x256xf32> to vector<1x256xf32>
    %573 = vector.broadcast %527 : f32 to vector<1x256xf32>
    %574 = arith.mulf %573, %572 : vector<1x256xf32>
    %575 = arith.addf %570, %574 : vector<1x256xf32>
    %576 = vector.extract_strided_slice %40 {offsets = [0, 0, 146], sizes = [2, 1, 256], strides = [1, 1, 1]} : vector<2x1x512xf32> to vector<2x1x256xf32>
    %577 = vector.extract_strided_slice %576 {offsets = [0, 0, 0], sizes = [1, 1, 256], strides = [1, 1, 1]} : vector<2x1x256xf32> to vector<1x1x256xf32>
    %578 = vector.shape_cast %577 : vector<1x1x256xf32> to vector<1x256xf32>
    %579 = vector.broadcast %521 : f32 to vector<1x256xf32>
    %580 = arith.mulf %579, %578 : vector<1x256xf32>
    %581 = arith.addf %575, %580 : vector<1x256xf32>
    %582 = vector.extract_strided_slice %576 {offsets = [1, 0, 0], sizes = [1, 1, 256], strides = [1, 1, 1]} : vector<2x1x256xf32> to vector<1x1x256xf32>
    %583 = vector.shape_cast %582 : vector<1x1x256xf32> to vector<1x256xf32>
    %584 = vector.broadcast %528 : f32 to vector<1x256xf32>
    %585 = arith.mulf %584, %583 : vector<1x256xf32>
    %586 = arith.addf %581, %585 : vector<1x256xf32>
    %587 = vector.extract_strided_slice %40 {offsets = [0, 0, 162], sizes = [2, 1, 256], strides = [1, 1, 1]} : vector<2x1x512xf32> to vector<2x1x256xf32>
    %588 = vector.extract_strided_slice %587 {offsets = [0, 0, 0], sizes = [1, 1, 256], strides = [1, 1, 1]} : vector<2x1x256xf32> to vector<1x1x256xf32>
    %589 = vector.shape_cast %588 : vector<1x1x256xf32> to vector<1x256xf32>
    %590 = vector.broadcast %522 : f32 to vector<1x256xf32>
    %591 = arith.mulf %590, %589 : vector<1x256xf32>
    %592 = arith.addf %586, %591 : vector<1x256xf32>
    %593 = vector.extract_strided_slice %587 {offsets = [1, 0, 0], sizes = [1, 1, 256], strides = [1, 1, 1]} : vector<2x1x256xf32> to vector<1x1x256xf32>
    %594 = vector.shape_cast %593 : vector<1x1x256xf32> to vector<1x256xf32>
    %595 = vector.broadcast %529 : f32 to vector<1x256xf32>
    %596 = arith.mulf %595, %594 : vector<1x256xf32>
    %597 = arith.addf %592, %596 : vector<1x256xf32>
    %598 = vector.extract_strided_slice %40 {offsets = [0, 0, 178], sizes = [2, 1, 256], strides = [1, 1, 1]} : vector<2x1x512xf32> to vector<2x1x256xf32>
    %599 = vector.extract_strided_slice %598 {offsets = [0, 0, 0], sizes = [1, 1, 256], strides = [1, 1, 1]} : vector<2x1x256xf32> to vector<1x1x256xf32>
    %600 = vector.shape_cast %599 : vector<1x1x256xf32> to vector<1x256xf32>
    %601 = vector.broadcast %523 : f32 to vector<1x256xf32>
    %602 = arith.mulf %601, %600 : vector<1x256xf32>
    %603 = arith.addf %597, %602 : vector<1x256xf32>
    %604 = vector.extract_strided_slice %598 {offsets = [1, 0, 0], sizes = [1, 1, 256], strides = [1, 1, 1]} : vector<2x1x256xf32> to vector<1x1x256xf32>
    %605 = vector.shape_cast %604 : vector<1x1x256xf32> to vector<1x256xf32>
    %606 = vector.broadcast %530 : f32 to vector<1x256xf32>
    %607 = arith.mulf %606, %605 : vector<1x256xf32>
    %608 = arith.addf %603, %607 : vector<1x256xf32>
    %c5_40 = arith.constant 5 : index
    %c0_41 = arith.constant 0 : index
    %609 = vector.load %arg6[%c5_40, %c0_41] : memref<7x256xf32, #tpu.memory_space<vmem>>, vector<1x256xf32>
    %610 = arith.mulf %609, %608 : vector<1x256xf32>
    %611 = arith.addf %516, %610 : vector<1x256xf32>
    %c6 = arith.constant 6 : index
    %612 = memref.load %arg7[%c6] : memref<98xf32, #tpu.memory_space<smem>>
    %c13 = arith.constant 13 : index
    %613 = memref.load %arg7[%c13] : memref<98xf32, #tpu.memory_space<smem>>
    %c20 = arith.constant 20 : index
    %614 = memref.load %arg7[%c20] : memref<98xf32, #tpu.memory_space<smem>>
    %c27 = arith.constant 27 : index
    %615 = memref.load %arg7[%c27] : memref<98xf32, #tpu.memory_space<smem>>
    %c34 = arith.constant 34 : index
    %616 = memref.load %arg7[%c34] : memref<98xf32, #tpu.memory_space<smem>>
    %c41 = arith.constant 41 : index
    %617 = memref.load %arg7[%c41] : memref<98xf32, #tpu.memory_space<smem>>
    %c48 = arith.constant 48 : index
    %618 = memref.load %arg7[%c48] : memref<98xf32, #tpu.memory_space<smem>>
    %c55 = arith.constant 55 : index
    %619 = memref.load %arg7[%c55] : memref<98xf32, #tpu.memory_space<smem>>
    %c62 = arith.constant 62 : index
    %620 = memref.load %arg7[%c62] : memref<98xf32, #tpu.memory_space<smem>>
    %c69 = arith.constant 69 : index
    %621 = memref.load %arg7[%c69] : memref<98xf32, #tpu.memory_space<smem>>
    %c76 = arith.constant 76 : index
    %622 = memref.load %arg7[%c76] : memref<98xf32, #tpu.memory_space<smem>>
    %c83 = arith.constant 83 : index
    %623 = memref.load %arg7[%c83] : memref<98xf32, #tpu.memory_space<smem>>
    %c90 = arith.constant 90 : index
    %624 = memref.load %arg7[%c90] : memref<98xf32, #tpu.memory_space<smem>>
    %c97 = arith.constant 97 : index
    %625 = memref.load %arg7[%c97] : memref<98xf32, #tpu.memory_space<smem>>
    %cst_42 = arith.constant 0.000000e+00 : f32
    %626 = vector.broadcast %cst_42 : f32 to vector<1x256xf32>
    %627 = vector.extract_strided_slice %40 {offsets = [0, 0, 83], sizes = [2, 1, 256], strides = [1, 1, 1]} : vector<2x1x512xf32> to vector<2x1x256xf32>
    %628 = vector.extract_strided_slice %627 {offsets = [0, 0, 0], sizes = [1, 1, 256], strides = [1, 1, 1]} : vector<2x1x256xf32> to vector<1x1x256xf32>
    %629 = vector.shape_cast %628 : vector<1x1x256xf32> to vector<1x256xf32>
    %630 = vector.broadcast %612 : f32 to vector<1x256xf32>
    %631 = arith.mulf %630, %629 : vector<1x256xf32>
    %632 = arith.addf %626, %631 : vector<1x256xf32>
    %633 = vector.extract_strided_slice %627 {offsets = [1, 0, 0], sizes = [1, 1, 256], strides = [1, 1, 1]} : vector<2x1x256xf32> to vector<1x1x256xf32>
    %634 = vector.shape_cast %633 : vector<1x1x256xf32> to vector<1x256xf32>
    %635 = vector.broadcast %619 : f32 to vector<1x256xf32>
    %636 = arith.mulf %635, %634 : vector<1x256xf32>
    %637 = arith.addf %632, %636 : vector<1x256xf32>
    %638 = vector.extract_strided_slice %40 {offsets = [0, 0, 99], sizes = [2, 1, 256], strides = [1, 1, 1]} : vector<2x1x512xf32> to vector<2x1x256xf32>
    %639 = vector.extract_strided_slice %638 {offsets = [0, 0, 0], sizes = [1, 1, 256], strides = [1, 1, 1]} : vector<2x1x256xf32> to vector<1x1x256xf32>
    %640 = vector.shape_cast %639 : vector<1x1x256xf32> to vector<1x256xf32>
    %641 = vector.broadcast %613 : f32 to vector<1x256xf32>
    %642 = arith.mulf %641, %640 : vector<1x256xf32>
    %643 = arith.addf %637, %642 : vector<1x256xf32>
    %644 = vector.extract_strided_slice %638 {offsets = [1, 0, 0], sizes = [1, 1, 256], strides = [1, 1, 1]} : vector<2x1x256xf32> to vector<1x1x256xf32>
    %645 = vector.shape_cast %644 : vector<1x1x256xf32> to vector<1x256xf32>
    %646 = vector.broadcast %620 : f32 to vector<1x256xf32>
    %647 = arith.mulf %646, %645 : vector<1x256xf32>
    %648 = arith.addf %643, %647 : vector<1x256xf32>
    %649 = vector.extract_strided_slice %40 {offsets = [0, 0, 115], sizes = [2, 1, 256], strides = [1, 1, 1]} : vector<2x1x512xf32> to vector<2x1x256xf32>
    %650 = vector.extract_strided_slice %649 {offsets = [0, 0, 0], sizes = [1, 1, 256], strides = [1, 1, 1]} : vector<2x1x256xf32> to vector<1x1x256xf32>
    %651 = vector.shape_cast %650 : vector<1x1x256xf32> to vector<1x256xf32>
    %652 = vector.broadcast %614 : f32 to vector<1x256xf32>
    %653 = arith.mulf %652, %651 : vector<1x256xf32>
    %654 = arith.addf %648, %653 : vector<1x256xf32>
    %655 = vector.extract_strided_slice %649 {offsets = [1, 0, 0], sizes = [1, 1, 256], strides = [1, 1, 1]} : vector<2x1x256xf32> to vector<1x1x256xf32>
    %656 = vector.shape_cast %655 : vector<1x1x256xf32> to vector<1x256xf32>
    %657 = vector.broadcast %621 : f32 to vector<1x256xf32>
    %658 = arith.mulf %657, %656 : vector<1x256xf32>
    %659 = arith.addf %654, %658 : vector<1x256xf32>
    %660 = vector.extract_strided_slice %40 {offsets = [0, 0, 131], sizes = [2, 1, 256], strides = [1, 1, 1]} : vector<2x1x512xf32> to vector<2x1x256xf32>
    %661 = vector.extract_strided_slice %660 {offsets = [0, 0, 0], sizes = [1, 1, 256], strides = [1, 1, 1]} : vector<2x1x256xf32> to vector<1x1x256xf32>
    %662 = vector.shape_cast %661 : vector<1x1x256xf32> to vector<1x256xf32>
    %663 = vector.broadcast %615 : f32 to vector<1x256xf32>
    %664 = arith.mulf %663, %662 : vector<1x256xf32>
    %665 = arith.addf %659, %664 : vector<1x256xf32>
    %666 = vector.extract_strided_slice %660 {offsets = [1, 0, 0], sizes = [1, 1, 256], strides = [1, 1, 1]} : vector<2x1x256xf32> to vector<1x1x256xf32>
    %667 = vector.shape_cast %666 : vector<1x1x256xf32> to vector<1x256xf32>
    %668 = vector.broadcast %622 : f32 to vector<1x256xf32>
    %669 = arith.mulf %668, %667 : vector<1x256xf32>
    %670 = arith.addf %665, %669 : vector<1x256xf32>
    %671 = vector.extract_strided_slice %40 {offsets = [0, 0, 147], sizes = [2, 1, 256], strides = [1, 1, 1]} : vector<2x1x512xf32> to vector<2x1x256xf32>
    %672 = vector.extract_strided_slice %671 {offsets = [0, 0, 0], sizes = [1, 1, 256], strides = [1, 1, 1]} : vector<2x1x256xf32> to vector<1x1x256xf32>
    %673 = vector.shape_cast %672 : vector<1x1x256xf32> to vector<1x256xf32>
    %674 = vector.broadcast %616 : f32 to vector<1x256xf32>
    %675 = arith.mulf %674, %673 : vector<1x256xf32>
    %676 = arith.addf %670, %675 : vector<1x256xf32>
    %677 = vector.extract_strided_slice %671 {offsets = [1, 0, 0], sizes = [1, 1, 256], strides = [1, 1, 1]} : vector<2x1x256xf32> to vector<1x1x256xf32>
    %678 = vector.shape_cast %677 : vector<1x1x256xf32> to vector<1x256xf32>
    %679 = vector.broadcast %623 : f32 to vector<1x256xf32>
    %680 = arith.mulf %679, %678 : vector<1x256xf32>
    %681 = arith.addf %676, %680 : vector<1x256xf32>
    %682 = vector.extract_strided_slice %40 {offsets = [0, 0, 163], sizes = [2, 1, 256], strides = [1, 1, 1]} : vector<2x1x512xf32> to vector<2x1x256xf32>
    %683 = vector.extract_strided_slice %682 {offsets = [0, 0, 0], sizes = [1, 1, 256], strides = [1, 1, 1]} : vector<2x1x256xf32> to vector<1x1x256xf32>
    %684 = vector.shape_cast %683 : vector<1x1x256xf32> to vector<1x256xf32>
    %685 = vector.broadcast %617 : f32 to vector<1x256xf32>
    %686 = arith.mulf %685, %684 : vector<1x256xf32>
    %687 = arith.addf %681, %686 : vector<1x256xf32>
    %688 = vector.extract_strided_slice %682 {offsets = [1, 0, 0], sizes = [1, 1, 256], strides = [1, 1, 1]} : vector<2x1x256xf32> to vector<1x1x256xf32>
    %689 = vector.shape_cast %688 : vector<1x1x256xf32> to vector<1x256xf32>
    %690 = vector.broadcast %624 : f32 to vector<1x256xf32>
    %691 = arith.mulf %690, %689 : vector<1x256xf32>
    %692 = arith.addf %687, %691 : vector<1x256xf32>
    %693 = vector.extract_strided_slice %40 {offsets = [0, 0, 179], sizes = [2, 1, 256], strides = [1, 1, 1]} : vector<2x1x512xf32> to vector<2x1x256xf32>
    %694 = vector.extract_strided_slice %693 {offsets = [0, 0, 0], sizes = [1, 1, 256], strides = [1, 1, 1]} : vector<2x1x256xf32> to vector<1x1x256xf32>
    %695 = vector.shape_cast %694 : vector<1x1x256xf32> to vector<1x256xf32>
    %696 = vector.broadcast %618 : f32 to vector<1x256xf32>
    %697 = arith.mulf %696, %695 : vector<1x256xf32>
    %698 = arith.addf %692, %697 : vector<1x256xf32>
    %699 = vector.extract_strided_slice %693 {offsets = [1, 0, 0], sizes = [1, 1, 256], strides = [1, 1, 1]} : vector<2x1x256xf32> to vector<1x1x256xf32>
    %700 = vector.shape_cast %699 : vector<1x1x256xf32> to vector<1x256xf32>
    %701 = vector.broadcast %625 : f32 to vector<1x256xf32>
    %702 = arith.mulf %701, %700 : vector<1x256xf32>
    %703 = arith.addf %698, %702 : vector<1x256xf32>
    %c6_43 = arith.constant 6 : index
    %c0_44 = arith.constant 0 : index
    %704 = vector.load %arg6[%c6_43, %c0_44] : memref<7x256xf32, #tpu.memory_space<vmem>>, vector<1x256xf32>
    %705 = arith.mulf %704, %703 : vector<1x256xf32>
    %706 = arith.addf %611, %705 : vector<1x256xf32>
    %c0_45 = arith.constant 0 : index
    %707 = memref.load %arg8[%c0_45] : memref<2xf32, #tpu.memory_space<smem>>
    %708 = vector.broadcast %707 : f32 to vector<1x256xf32>
    %709 = arith.mulf %706, %708 : vector<1x256xf32>
    %c1_46 = arith.constant 1 : index
    %710 = memref.load %arg8[%c1_46] : memref<2xf32, #tpu.memory_space<smem>>
    %711 = vector.broadcast %710 : f32 to vector<1x256xf32>
    %712 = arith.addf %709, %711 : vector<1x256xf32>
    %713 = arith.negf %712 : vector<1x256xf32>
    %714 = math.exp %713 : vector<1x256xf32>
    %cst_47 = arith.constant 1.000000e+00 : f32
    %715 = vector.broadcast %cst_47 : f32 to vector<1x256xf32>
    %716 = arith.addf %715, %714 : vector<1x256xf32>
    %717 = arith.divf %715, %716 : vector<1x256xf32>
    %718 = vector.shape_cast %717 : vector<1x256xf32> to vector<1x1x256xf32>
    %719 = vector.broadcast %718 : vector<1x1x256xf32> to vector<1x32x256xf32>
    %720 = arith.mulf %30, %719 : vector<1x32x256xf32>
    %c0_48 = arith.constant 0 : index
    %c0_49 = arith.constant 0 : index
    %c0_50 = arith.constant 0 : index
    %721 = vector.load %arg9[%c0_48, %c0_49, %c0_50] : memref<1x32x256xf32, #tpu.memory_space<vmem>>, vector<1x32x256xf32>
    tpu.vector_store %arg9[%c0_48, %c0_49, %c0_50], %720 {strides = array<i32>} : memref<1x32x256xf32, #tpu.memory_space<vmem>>, vector<1x32x256xf32>,
    return
  }
  func.func @transform_0(%arg0: i32) -> (i32, i32, i32) {
    %c0_i32 = arith.constant 0 : i32
    %c0_i32_0 = arith.constant 0 : i32
    %c0_i32_1 = arith.constant 0 : i32
    return %arg0, %c0_i32, %c0_i32_0 : i32, i32, i32
  }
  func.func @transform_1(%arg0: i32) -> (i32, i32) {
    %c0_i32 = arith.constant 0 : i32
    %c0_i32_0 = arith.constant 0 : i32
    %c0_i32_1 = arith.constant 0 : i32
    return %c0_i32, %c0_i32_0 : i32, i32
  }
  func.func @transform_2(%arg0: i32) -> (i32, i32) {
    %c0_i32 = arith.constant 0 : i32
    %c0_i32_0 = arith.constant 0 : i32
    %c0_i32_1 = arith.constant 0 : i32
    return %c0_i32, %c0_i32_0 : i32, i32
  }
  func.func @transform_3(%arg0: i32) -> (i32, i32) {
    %c0_i32 = arith.constant 0 : i32
    %c0_i32_0 = arith.constant 0 : i32
    %c0_i32_1 = arith.constant 0 : i32
    return %c0_i32, %c0_i32_0 : i32, i32
  }
  func.func @transform_4(%arg0: i32) -> (i32, i32) {
    %c0_i32 = arith.constant 0 : i32
    %c0_i32_0 = arith.constant 0 : i32
    %c0_i32_1 = arith.constant 0 : i32
    return %c0_i32, %c0_i32_0 : i32, i32
  }
  func.func @transform_5(%arg0: i32) -> (i32, i32) {
    %c0_i32 = arith.constant 0 : i32
    %c0_i32_0 = arith.constant 0 : i32
    %c0_i32_1 = arith.constant 0 : i32
    return %c0_i32, %c0_i32_0 : i32, i32
  }
  func.func @transform_6(%arg0: i32) -> i32 {
    %c0_i32 = arith.constant 0 : i32
    %c0_i32_0 = arith.constant 0 : i32
    return %c0_i32 : i32
  }
  func.func @transform_7(%arg0: i32) -> i32 {
    %c0_i32 = arith.constant 0 : i32
    %c0_i32_0 = arith.constant 0 : i32
    return %c0_i32 : i32
  }
  func.func @transform_8(%arg0: i32) -> (i32, i32, i32) {
    %c0_i32 = arith.constant 0 : i32
    %c0_i32_0 = arith.constant 0 : i32
    %c0_i32_1 = arith.constant 0 : i32
    return %arg0, %c0_i32, %c0_i32_0 : i32, i32, i32
  }
}

</mosaic_0001>

<bundles_post_ra>
// kernel: tpu_custom_call.1
= control target key start
LH: loop header
LB: loop body
LE: loop exit
PB: predicated region body
PF: predicated region fallthrough
CT: control target
= control target key end

     0   :  { %s5625_s0 = inlined_call_operand.hbm [shape: f32[2,32,256], index: 0, kind: input, shape index: {}]   ;;  %s5626_s1 = inlined_call_operand.vmem [shape: f32[32,2], index: 1, kind: input, shape index: {}]   ;;  %s5627_s2 = inlined_call_operand.vmem [shape: f32[1,2], index: 2, kind: input, shape index: {}]   ;;  %s5628_s3 = inlined_call_operand.vmem [shape: f32[2,32], index: 3, kind: input, shape index: {}]   ;;  %s5629_s4 = inlined_call_operand.vmem [shape: f32[1,32], index: 4, kind: input, shape index: {}]   ;;  %s5630_s5 = inlined_call_operand.vmem [shape: f32[7,256], index: 5, kind: input, shape index: {}]   ;;  %s5631_s6 = inlined_call_operand.vmem [shape: f32[98], index: 6, kind: input, shape index: {}]   ;;  %s5632_s7 = inlined_call_operand.vmem [shape: f32[2], index: 7, kind: input, shape index: {}]   ;;  %s5633_s8 = inlined_call_operand.hbm [shape: f32[2,32,256], index: 8, kind: output, shape index: {}]  }
   0x1   :  { %5802 = sst [smem:[#allocation180_spill]] %s5625_s0 }
   0x2   :  { %5803 = sst [smem:[#allocation181_spill]] %s5631_s6 }
   0x3   :  { %5804 = sst [smem:[#allocation182_spill]] %s5632_s7 }
   0x4   :  { %13 = vsyncpa [#allocation3], 0 }
   0x5   :  { %15 = vsyncpa [#allocation3 + $0x1], 0 }
   0x6   :  { %16 = vsyncpa [#allocation5], 0 }
   0x7   :  { %17 = vsyncpa [#allocation8], 0 }
   0x8   :  { %18 = vsyncpa [#allocation4], 0 }
   0x9   :  { %20 = vsyncpa [#allocation4 + $0x1], 0  ;;  %s3516_s27 = smov 0   ;;  %s3518_s28 = smov 0  }
   0xa   :  { %s3520_s29 = smov 0   ;;  %s3522_s30 = smov 0  }
   0xb LB: > { %s3537_s9 = sadd.s32 4294967295, %s3445_s30   ;;  %s3048_s10 = sadd.s32 4294967294, %s3445_s30   ;;  %s3445_s30 = sphi %s3522_s30, %s6228_s30   ;;  %s3441_s29 = sphi %s3520_s29, %s6227_s29   ;;  %s3437_s28 = sphi %s3518_s28, %s6226_s28   ;;  %s3433_s27 = sphi %s3516_s27, %s6225_s27  }
   0xc   : > { %s3541_s11 = sadd.s32 1, %s3445_s30   ;;  %s33_s12 = sadd.s32 1, %s3441_s29 }
   0xd   : > { %s30_s13 = ssub.s32 %s3445_s30, %s3541_s11  ;;  %p40_p0 = scmp.ne.s32.totalorder %s3441_s29, %s3437_s28 }
   0xe   : > { %p31_p1 = scmp.eq.s32.totalorder %s30_s13, 0  ;;  %p41_p2 = scmp.eq.s32.totalorder %s3445_s30, 0 }
   0xf   : > { %p46_p3 = scmp.ne.s32.totalorder %s3437_s28, %s3433_s27  ;;  %p5634_p4 = scmp.eq.s32.totalorder %s3537_s9, 0 }
  0x10   : > { %s3553_s14 = scalar_select %p31_p1, %s3441_s29, %s33_s12  }
  0x11   : > { %p3555_p5 = por %p41_p2, %p40_p0  ;;  %p3561_p6 = por %p5634_p4, %p46_p3 }
  0x12   : > { %p217_p7 = scmp.eq.s32.totalorder %s3537_s9, 1  ;;  %p223_p8 = scmp.eq.s32.totalorder %s3048_s10, 1 }
  0x13   : > { %s5806_s16 = scalar_select %p3561_p6, 1, 0 }
  0x14   : > { %p3049_p9 = scmp.ge.s32.totalorder %s3445_s30, 1  ;;  %p230_p10 = scmp.lt.s32.totalorder %s3445_s30, 3 }
  0x15   : > { %p3568_p11 = por %p217_p7, %p40_p0  ;;  %p3572_p12 = por %p223_p8, %p46_p3 }
  0x16   : > { %p3576_p13 = pnand %p3049_p9, %p230_p10  ;;  %s5810_s6 = sld [smem:[#allocation181_spill]] }
  0x17   : > { %s5807_s17 = scalar_select %p3568_p11, 1, 0 }
  0x18   : > { %s5808_s18 = scalar_select %p3572_p12, 1, 0 }
  0x19   : > { %s5809_s19 = scalar_select %p3576_p13, 1, 0 }
  0x1a   : > { %p3220_p1 = pneg %p3576_p13  ;;  %p3237_p2 = scmp.lt.s32.totalorder %s3445_s30, 2 }
  0x1b   : > { %s5812_s7 = sld [smem:[#allocation182_spill]] }
  0x1c   : > { %s258_s22 = sshll.u32 %s5810_s6, 4  ;;  %p3589_p7 = pnand %p3220_p1, %p5634_p4  ;;  %s259_s22 = int_to_ptr.vmem [resolvable:$true] %s258_s22 }
  0x1d   : > { %p3598_p3 = pnand %p3237_p2, %p3555_p5  ;;  %s3311_s12 = scalar_lea.vmem %s259_s22, 16 }
  0x1e   : > { %p3312_p8 = scmp.ne.s32.totalorder %s259_s22, %s3311_s12  ;;  %p3313_p9 = pneg %p3589_p7 }
  0x1f   : > { %s5813_s10 = scalar_select %p3598_p3, 1, 0 }
  0x20   : > { %p3314_p10 = pnand %p3313_p9, %p3312_p8  ;;  %p3319_p0 = scmp.lt.s32.totalorder %s259_s22, %s259_s22 }
  0x21   : > { %s269_s26 = sshll.u32 %s5812_s7, 4  ;;  %p3320_p4 = scmp.lt.s32.totalorder %s3311_s12, %s3311_s12  ;;  %s270_s26 = int_to_ptr.vmem [resolvable:$true] %s269_s26 }
  0x22   : > { %p3315_p1 = pneg %p3314_p10 }
  0x23   : > { %p3321_p12 = por %p3320_p4, %p3319_p0 }
  0x25   : > { %p3322_p11 = pnand %p3321_p12, %p3315_p1 }
  0x27   : > { %3325 = shalt.err (!%p3322_p11)
}
  0x28   : > { %s3447_s13 = smov [#allocation6]   ;;  %s280_s15 = sand.u32 1, %s3441_s29  }
  0x29   : > { %3223 = dma.vmem_to_smem (!%p3589_p7), %s259_s22, 16, %s3447_s13, [#allocation5]  }
  0x2a   : > { %s3326_s20 = scalar_lea.vmem %s270_s26, 16  ;;  %p3334_p8 = scmp.lt.s32.totalorder %s270_s26, %s270_s26 }
  0x2b   : > { %p3327_p5 = scmp.ne.s32.totalorder %s270_s26, %s3326_s20  ;;  %p3335_p10 = scmp.lt.s32.totalorder %s3326_s20, %s3326_s20 }
  0x2d   : > { %p3329_p2 = pnand %p3327_p5, %p3313_p9  ;;  %p3336_p13 = por %p3335_p10, %p3334_p8 }
  0x2f   : > { %p3330_p6 = pneg %p3329_p2 }
  0x31   : > { %p3337_p3 = pnand %p3336_p13, %p3330_p6 }
  0x33   : > { %3340 = shalt.err (!%p3337_p3)
}
  0x34   : > { %s3448_s21 = smov [#allocation7]   ;;  %s3053_s22 = sshll.u32 %s280_s15, 6 }
  0x35   : > { %3226 = dma.vmem_to_smem (!%p3589_p7), %s270_s26, 16, %s3448_s21, [#allocation8]  }
  0x36   : > { %s3177_s24 = sshll.u32 %s3445_s30, 10  ;;  %s5814_s0 = sld [smem:[#allocation180_spill]] }
  0x37   : > { %s284_s20 = scalar_lea.vmem [#allocation2], %s3053_s22  ;;  %s3623_s23 = scalar_lea.sflag [#allocation3], %s280_s15 }
  0x38   : > { %s291_s6 = sshll.u32 %s284_s20, 4  ;;  %p5815_p6 = scmp.ne.s32.totalorder %s5813_s10, 0  ;;  %s3621_s6 = int_to_ptr.vmem [resolvable:$true] %s291_s6 }
  0x3a   : > { %p3343_p11 = pneg %p5815_p6 }
  0x3c   : > { %s3619_s13 = scalar_lea.hbm %s5814_s0, %s3177_s24  ;;  %s3346_s24 = scalar_lea.hbm %s5814_s0, 2048 }
  0x3d   : > { %s3341_s7 = scalar_lea.hbm %s3619_s13, 1024  ;;  %p3347_p0 = scmp.lt.u32.totalorder %s3619_s13, %s5814_s0 }
  0x3e   : > { %p3342_p4 = scmp.ne.s32.totalorder %s3619_s13, %s3341_s7  ;;  %p3348_p7 = scmp.lt.u32.totalorder %s3346_s24, %s3341_s7 }
  0x3f   : > { %p3350_p9 = scmp.lt.u32.totalorder %s3341_s7, %s3619_s13 }
  0x40   : > { %p3344_p12 = pnand %p3343_p11, %p3342_p4  ;;  %p3349_p3 = por %p3348_p7, %p3347_p0 }
  0x42   : > { %p3345_p13 = pneg %p3344_p12  ;;  %p3351_p1 = por %p3350_p9, %p3349_p3 }
  0x44   : > { %p3352_p5 = pnand %p3351_p1, %p3345_p13 }
  0x46   : > { %3355 = shalt.err (!%p3352_p5)
}
  0x47   : > { %s3356_s15 = scalar_lea.vmem %s3621_s6, 1024  ;;  %s3449_s22 = smov [#allocation2]  }
  0x48   : > { %p3357_p2 = scmp.ne.s32.totalorder %s3621_s6, %s3356_s15  ;;  %s3361_s20 = sshll.u32 %s3449_s22, 4  ;;  %s3362_s20 = int_to_ptr.vmem [resolvable:$false] %s3361_s20 }
  0x49   : > { %s3363_s26 = scalar_lea.vmem %s3362_s20, 2048  ;;  %p3364_p4 = scmp.lt.s32.totalorder %s3621_s6, %s3362_s20 }
  0x4a   : > { %p3359_p8 = pnand %p3357_p2, %p3343_p11  ;;  %p3365_p12 = scmp.lt.s32.totalorder %s3363_s26, %s3356_s15 }
  0x4c   : > { %p3360_p10 = pneg %p3359_p8  ;;  %p3366_p0 = por %p3365_p12, %p3364_p4 }
  0x4e   : > { %p3367_p7 = pnand %p3366_p0, %p3360_p10 }
  0x50   : > { %3370 = shalt.err (!%p3367_p7)
}
  0x51   : > { %s3450_s7 = smov 256   ;;  %s3451_s21 = smov 16  }
  0x52   : > { %3230 = dma.hbm_to_vmem [thread:$0]  (!%p5815_p6), %s3619_s13, 1024, %s3621_s6, %s3623_s23, %s3450_s7, %s3450_s7, %s3451_s21  }
  0x53   : > { %p5816_p11 = scmp.ne.s32.totalorder %s5809_s19, 0 }
  0x55   : > { %303 = sbr.rel (%p5816_p11) target bundleno = 1509 (0x5e5), region = 52 }
  0x5c   : > { %s3654_s24 = sand.u32 1, %s3437_s28   ;;  %p5817_p13 = scmp.ne.s32.totalorder %s5806_s16, 0 }
  0x5d   : > { %s5639_s25 = sshll.u32 %s3654_s24, 6  ;;  %s306_s12 = scalar_lea.sflag [#allocation3], %s3654_s24 }
  0x5e   : > { %s3660_s15 = scalar_lea.vmem [#allocation2], %s5639_s25 }
  0x5f   : > { %3416 = dma.done.wait (%p5817_p13), %s306_s12, 1024  }
  0x60   : > { %3418 = vsyncadd (%p5817_p13), %s306_s12, 4294966272  ;;  %p5818_p6 = scmp.eq.s32.totalorder %s3537_s9, 0 }
  0x62   : > { %3420 = dma.done.wait (%p5818_p6), [#allocation5], 16   ;;  %p5819_p3 = pmov %p5818_p6 }
  0x64   : > { %3422 = vsyncadd (%p5819_p3), [#allocation5], 4294967280  ;;  %p5820_p9 = pmov %p5819_p3 }
  0x65   : > { %p5821_p1 = pmov %p5819_p3 }
  0x66   : > { %3424 = dma.done.wait (%p5820_p9), [#allocation8], 16  }
  0x67   : > { %3426 = vsyncadd (%p5821_p1), [#allocation8], 4294967280 }
  0x68   : > { %322 = sfence }
  0x69   : > { %v355_v0 = vld [vmem:[%s3660_s15 + $0x20] sm:$0xff]  ;;  %v356_v1 = vld [vmem:[%s3660_s15 + $0x28] sm:$0xff]  ;;  %v357_v5 = vld [vmem:[%s3660_s15 + $0x30] sm:$0xff]  ;;  %v3452_v19 = vmov 0.0|0.0   ;;  %vm3453_vm0 = vmmov 0   ;;  %v3454_v23 = vmov 0.0   ;;  %v392_v24 = vlaneseq }
  0x6a   : > { %v351_v2 = vld [vmem:[%s3660_s15] sm:$0xff]  ;;  %v365_v3 = vadd.f32 %v356_v1, %v355_v0  ;;  %v352_v4 = vld [vmem:[%s3660_s15 + $0x8] sm:$0xff]  ;;  %v358_v6 = vld [vmem:[%s3660_s15 + $0x38] sm:$0xff]  ;;  %v382_v15 = vmax.f32 %v355_v0, %v356_v1  ;;  %3202 = vmatprep.subr.bf16.mxu0 %v3452_v19  ;;  %3194 = vmatprep.mubr.msk.f32.mxu0 %vm3453_vm0, %v3454_v23  ;;  %vm403_vm1 = vcmask 130112   ;;  %vm410_vm2 = vcmask 195712   ;;  %s3067_s21 = sld [smem:[#allocation6 + $0x7]] }
  0x6b   : > { %v359_v7 = vadd.f32 %v352_v4, %v351_v2  ;;  %v353_v8 = vld [vmem:[%s3660_s15 + $0x10] sm:$0xff]  ;;  %v354_v9 = vld [vmem:[%s3660_s15 + $0x18] sm:$0xff]  ;;  %v368_v10 = vadd.f32 %v358_v6, %v357_v5  ;;  %v376_v13 = vmax.f32 %v351_v2, %v352_v4  ;;  %v385_v14 = vmax.f32 %v357_v5, %v358_v6  ;;  %v446_v16 = vld [vmem:[%s5626_s1] sm:$0xff]  ;;  %3197 = vmatprep.subr.mxu1 %v3454_v23  ;;  %s3074_s12 = sld [smem:[#allocation6 + $0x38]]  ;;  %s3068_s6 = sld [smem:[#allocation6 + $0xe]] }
  0x6c   : > { %366 = vadd.xlane.f32.xlu1 %v365_v3  ;;  %v362_v11 = vadd.f32 %v354_v9, %v353_v8  ;;  %v379_v12 = vmax.f32 %v353_v8, %v354_v9  ;;  %v447_v17 = vld [vmem:[%s5626_s1 + $0x8] sm:$0xff]  ;;  %v448_v20 = vld [vmem:[%s5626_s1 + $0x10] sm:$0xff]  ;;  %v449_v21 = vld [vmem:[%s5626_s1 + $0x18] sm:$0xff]  ;;  %3199 = vmatprep.mubr.msk.f32.mxu1 %vm3453_vm0, %v3454_v23  ;;  %v393_v25 = vand.u32 127, %v392_v24  ;;  %v3694_v28 = vshrl.u32 %v392_v24, 7  ;;  %s3075_s16 = sld [smem:[#allocation6 + $0x3f]] }
  0x6d   : > { %360 = vadd.xlane.f32.xlu0 %v359_v7  ;;  %v3203_v18 = vpack.c.bf16 %v447_v17, %v446_v16  ;;  %v3206_v22 = vpack.c.bf16 %v449_v21, %v448_v20  ;;  %vm417_vm3 = vcmask 261312   ;;  %vm444_vm4 = vcmask 1040384   ;;  %v533_v61 = vld [vmem:[%s5628_s3] sm:$0x3]  ;;  %s3069_s19 = sld [smem:[#allocation6 + $0x15]]  ;;  %s3076_s10 = sld [smem:[#allocation6 + $0x46]] }
  0x6e   : > { %v398_v27 = vadd.s32 4294967288, %v393_v25  ;;  %5822 = vst [vmem:[#allocation14_spill] sm:$0xff] %v3694_v28  ;;  %v405_v30 = vadd.s32 4294967280, %v393_v25  ;;  %v396_v33 = vsub.s32 %v393_v25, %v3694_v28  ;;  %v412_v35 = vadd.s32 4294967272, %v393_v25  ;;  %s3070_s13 = sld [smem:[#allocation6 + $0x1c]]  ;;  %s3077_s23 = sld [smem:[#allocation6 + $0x4d]] }
  0x6f   : > { %3204 = vmatpush3.bf16.msra.mxu0 %v3203_v18  ;;  %vm457_vm5 = vcmask 261120   ;;  %vm545_vm6 = vcmask 1041408   ;;  %s3455_s22 = smov 112   ;;  %s3071_s20 = sld [smem:[#allocation6 + $0x23]]  ;;  %vm541_vm7 = vcmask 15360   ;;  %vm736_vm8 = vcmask 916480  }
  0x70   : > { %369 = vadd.xlane.f32.xlu1 %v368_v10  ;;  %3205 = vmatprep.subr.bf16.mxu0 %v3452_v19  ;;  %v401_v32 = vsub.s32 %v398_v27, %v3694_v28  ;;  %v408_v38 = vsub.s32 %v405_v30, %v3694_v28  ;;  %v415_v43 = vsub.s32 %v412_v35, %v3694_v28  ;;  %v3706_v62 = vstv %s3067_s21  ;;  %s3078_s26 = sld [smem:[#allocation6 + $0x54]]  ;;  %s3456_s7 = smov 96  }
  0x71   : > { %363 = vadd.xlane.f32.xlu0 %v362_v11  ;;  %3198 = vmatpush3.msk.msra.mxu1 %vm545_vm6, %v533_v61  ;;  %v724_v63 = vmul.f32 0.0, %v3706_v62  ;;  %v3709_v0 = vstv %s3074_s12  ;;  %v3711_v1 = vstv %s3068_s6  ;;  %s3072_s21 = sld [smem:[#allocation6 + $0x2a]]  ;;  %s3079_s12 = sld [smem:[#allocation6 + $0x5b]]  ;;  %vm779_vm9 = vcmask 785408  }
  0x72   : > { %5823 = vst [vmem:[#allocation15_spill] sm:$0xff] %v3709_v0  ;;  %v746_v2 = vmul.f32 0.0, %v3709_v0  ;;  %v3714_v3 = vstv %s3075_s16  ;;  %v767_v4 = vmul.f32 0.0, %v3711_v1  ;;  %s5644_s6 = smov 80   ;;  %s3088_s16 = sld [smem:[#allocation6 + $0x39]]  ;;  %vm822_vm10 = vcmask 654336  }
  0x73   : > { %3207 = vmatpush3.bf16.msra.mxu0 %v3206_v22  ;;  %5824 = vst [vmem:[#allocation16_spill] sm:$0xff] %v3714_v3  ;;  %v789_v5 = vmul.f32 0.0, %v3714_v3  ;;  %v3720_v6 = vstv %s3069_s19  ;;  %v3722_v7 = vstv %s3076_s10  ;;  %s3081_s19 = sld [smem:[#allocation6 + $0x8]]  ;;  %s5646_s10 = smov 64   ;;  %vm865_vm11 = vcmask 523264  }
  0x74   : > { %380 = vmax.xlane.f32.xlu1 %v379_v12  ;;  %5825 = vst [vmem:[#allocation17_spill] sm:$0xff] %v3722_v7  ;;  %v810_v8 = vmul.f32 0.0, %v3720_v6  ;;  %v832_v9 = vmul.f32 0.0, %v3722_v7  ;;  %v3728_v10 = vstv %s3070_s13  ;;  %v3730_v11 = vstv %s3077_s23  ;;  %s3089_s13 = sld [smem:[#allocation6 + $0x40]]  ;;  %s3082_s23 = sld [smem:[#allocation6 + $0xf]] }
  0x75   : > { %377 = vmax.xlane.f32.xlu0 %v376_v13  ;;  %5826 = vst [vmem:[#allocation18_spill] sm:$0xff] %v3730_v11  ;;  %v855_v12 = vmul.f32 0.0, %v3728_v10  ;;  %v877_v13 = vmul.f32 0.0, %v3730_v11  ;;  %s5640_s25 = smov 32   ;;  %s5857_s0 = smov 64   ;;  %vm908_vm12 = vcmask 392192  }
  0x76   : > { %vm1326_vm13 = vcmask 408576   ;;  %vm1010_vm14 = vcmask 416768   ;;  %vm1642_vm15 = vcmask 400384   ;;  %vm2263_vm0 = vcmask 384000   ;;  %p6222_p2 = scmp.ne.s32.totalorder %s5807_s17, 0 }
  0x77   : > { %v3744_v18 = vstv %s3072_s21  ;;  %v3746_v19 = vstv %s3079_s12  ;;  %s3083_s21 = sld [smem:[#allocation6 + $0x16]] }
  0x78   : > { %386 = vmax.xlane.f32.xlu1 %v385_v14  ;;  %v3736_v14 = vstv %s3071_s20  ;;  %5828 = vst [vmem:[#allocation20_spill] sm:$0xff] %v3746_v19  ;;  %s5642_s20 = smov 48   ;;  %v941_v20 = vmul.f32 0.0, %v3744_v18  ;;  %v962_v21 = vmul.f32 0.0, %v3746_v19  ;;  %v3752_v22 = vstv %s3088_s16  ;;  %s3091_s12 = sld [smem:[#allocation6 + $0x4e]] }
  0x79   : > { %383 = vmax.xlane.f32.xlu0 %v382_v15  ;;  %v3738_v15 = vstv %s3078_s26  ;;  %v898_v16 = vmul.f32 0.0, %v3736_v14  ;;  %5829 = vst [vmem:[#allocation21_spill] sm:$0xff] %v3752_v22  ;;  %s3090_s26 = sld [smem:[#allocation6 + $0x47]]  ;;  %v3754_v23 = vstv %s3081_s19  ;;  %v1065_v24 = vmul.f32 0.0, %v3752_v22  ;;  %s3084_s16 = sld [smem:[#allocation6 + $0x1d]]  ;;  %v3310_v22 = vld [vmem:[%s3660_s15 + $0x38] sm:$0xff] }
  0x7a   : > { %5827 = vst [vmem:[#allocation19_spill] sm:$0xff] %v3738_v15  ;;  %v920_v17 = vmul.f32 0.0, %v3738_v15  ;;  %v1044_v25 = vmul.f32 0.0, %v3754_v23  ;;  %v3762_v27 = vstv %s3082_s23  ;;  %s3092_s19 = sld [smem:[#allocation6 + $0x55]]  ;;  %s3086_s23 = sld [smem:[#allocation6 + $0x2b]] }
  0x7b   : > { %v1086_v30 = vmul.f32 0.0, %v3762_v27 }
  0x7e   : > { %v3776_v35 = vstv %s3091_s12  ;;  %s3097_s12 = sld [smem:[#allocation6 + $0x10]] }
  0x7f   : > { %5832 = vst [vmem:[#allocation24_spill] sm:$0xff] %v3776_v35 }
  0x89   : > { %752 = vrot.lane.b32.xlu1 %v746_v2, %s3455_s22 }
  0x8d   : > { %795 = vrot.lane.b32.xlu1 %v789_v5, %s3456_s7 }
  0x8f   : > { %730 = vrot.lane.b32.xlu0 %v724_v63, %s3455_s22 }
  0x91   : > { %838 = vrot.lane.b32.xlu1 %v832_v9, %s5644_s6 }
  0x93   : > { %773 = vrot.lane.b32.xlu0 %v767_v4, %s3456_s7 }
  0x95   : > { %885 = vrot.lane.b32.xlu1 %v877_v13, %s5646_s10 }
  0x97   : > { %816 = vrot.lane.b32.xlu0 %v810_v8, %s5644_s6 }
  0x99   : > { %928 = vrot.lane.b32.xlu1 %v920_v17, %s5642_s20 }
  0x9b   : > { %863 = vrot.lane.b32.xlu0 %v855_v12, %s5646_s10 }
  0x9d   : > { %970 = vrot.lane.b32.xlu1 %v962_v21, %s5640_s25 }
  0x9f   : > { %906 = vrot.lane.b32.xlu0 %v898_v16, %s5642_s20 }
  0xa1   : > { %1050 = vrot.lane.b32.xlu1 %v1044_v25, %s3455_s22 }
  0xa3   : > { %949 = vrot.lane.b32.xlu0 %v941_v20, %s5640_s25  ;;  %s3085_s25 = sld [smem:[#allocation6 + $0x24]] }
  0xa5   : > { %1092 = vrot.lane.b32.xlu1 %v1086_v30, %s3456_s7 }
  0xa7   : > { %1071 = vrot.lane.b32.xlu0 %v1065_v24, %s3455_s22 }
  0xf9   : > { %v367_v26 = vpop.xlane.xlu1 %366 }
  0xfa   : > { %v361_v29 = vpop.xlane.xlu0 %360  ;;  %v374_v39 = vmul.f32 0.00390625, %v367_v26  ;;  %v3760_v26 = vstv %s3089_s13  ;;  %s3093_s13 = sld [smem:[#allocation6 + $0x5c]] }
  0xfb   : > { %v372_v34 = vmul.f32 0.00390625, %v361_v29  ;;  %5830 = vst [vmem:[#allocation22_spill] sm:$0xff] %v3760_v26  ;;  %v1107_v29 = vmul.f32 0.0, %v3760_v26 }
  0xfc   : > { %v409_v49 = vrot.slane %v374_v39, %v408_v38  ;;  %v3784_v39 = vstv %s3092_s19  ;;  %s3105_s19 = sld [smem:[#allocation6 + $0x48]] }
  0xfd   : > { %v370_v31 = vpop.xlane.xlu1 %369  ;;  %v397_v42 = vrot.slane %v372_v34, %v396_v33  ;;  %1113 = vrot.lane.b32.xlu0 %v1107_v29, %s3456_s7  ;;  %5833 = vst [vmem:[#allocation25_spill] sm:$0xff] %v3784_v39 }
  0xfe   : > { %v364_v36 = vpop.xlane.xlu0 %363  ;;  %v375_v44 = vmul.f32 0.00390625, %v370_v31  ;;  %v3768_v31 = vstv %s3090_s26  ;;  %s3096_s26 = sld [smem:[#allocation6 + $0x9]] }
  0xff   : > { %v373_v37 = vmul.f32 0.00390625, %v364_v36  ;;  %5831 = vst [vmem:[#allocation23_spill] sm:$0xff] %v3768_v31  ;;  %v3778_v36 = vstv %s3084_s16  ;;  %s3104_s16 = sld [smem:[#allocation6 + $0x41]] }
 0x100   : > { %v416_v51 = vrot.slane %v375_v44, %v415_v43  ;;  %v3794_v44 = vstv %s3086_s23  ;;  %s3099_s23 = sld [smem:[#allocation6 + $0x1e]] }
 0x101   : > { %v402_v40 = vrot.slane %v373_v37, %v401_v32  ;;  %v381_v41 = vpop.xlane.xlu1 %380  ;;  %v1193_v37 = vmul.f32 0.0, %v3776_v35 }
 0x102   : > { %v378_v45 = vpop.xlane.xlu0 %377  ;;  %v431_v47 = vrot.slane %v381_v41, %v401_v32  ;;  %v3770_v32 = vstv %s3083_s21  ;;  %s3103_s21 = sld [smem:[#allocation6 + $0x3a]]  ;;  %v1235_v41 = vmul.f32 0.0, %v3784_v39 }
 0x103   : > { %v404_v46 = vsel %vm403_vm1, %v402_v40, %v397_v42  ;;  %v427_v48 = vrot.slane %v378_v45, %v396_v33  ;;  %v1149_v33 = vmul.f32 0.0, %v3768_v31  ;;  %v1128_v34 = vmul.f32 0.0, %v3770_v32 }
 0x104   : > { %v411_v55 = vsel %vm410_vm2, %v409_v49, %v404_v46  ;;  %v3786_v40 = vstv %s3085_s25  ;;  %v1256_v46 = vmul.f32 0.0, %v3794_v44  ;;  %s3098_s25 = sld [smem:[#allocation6 + $0x17]] }
 0x105   : > { %v387_v50 = vpop.xlane.xlu1 %386  ;;  %v432_v56 = vsel %vm403_vm1, %v431_v47, %v427_v48  ;;  %v418_v58 = vsel %vm417_vm3, %v416_v51, %v411_v55  ;;  %1155 = vrot.lane.b32.xlu0 %v1149_v33, %s5644_s6  ;;  %1134 = vrot.lane.b32.xlu1 %v1128_v34, %s5644_s6  ;;  %v1214_v42 = vmul.f32 0.0, %v3786_v40  ;;  %v3800_v47 = vstv %s3096_s26  ;;  %s3100_s26 = sld [smem:[#allocation6 + $0x25]] }
 0x106   : > { %v384_v52 = vpop.xlane.xlu0 %383  ;;  %v441_v53 = vrot.slane %v387_v50, %v415_v43  ;;  %v3792_v43 = vstv %s3093_s13  ;;  %s5836_s13 = smov 32   ;;  %v1360_v49 = vmul.f32 0.0, %v3800_v47  ;;  %v3808_v51 = vstv %s3097_s12  ;;  %s3101_s12 = sld [smem:[#allocation6 + $0x2c]] }
 0x107   : > { %v436_v54 = vrot.slane %v384_v52, %v408_v38  ;;  %v1172_v38 = vmul.f32 0.0, %v3778_v36  ;;  %5834 = vst [vmem:[#allocation26_spill] sm:$0xff] %v3792_v43  ;;  %v1277_v45 = vmul.f32 0.0, %v3792_v43  ;;  %v3810_v52 = vstv %s3104_s16  ;;  %s3108_s16 = sld [smem:[#allocation6 + $0x5d]] }
 0x108   : > { %v3802_v48 = vstv %s3103_s21  ;;  %5837 = vst [vmem:[#allocation28_spill] sm:$0xff] %v3810_v52  ;;  %s3107_s21 = sld [smem:[#allocation6 + $0x56]]  ;;  %vm2579_vm1 = vcmask 375808  }
 0x109   : > { %v437_v57 = vsel %vm410_vm2, %v436_v54, %v432_v56  ;;  %1201 = vrot.lane.b32.xlu0 %v1193_v37, %s5646_s10  ;;  %1180 = vrot.lane.b32.xlu1 %v1172_v38, %s5646_s10  ;;  %5835 = vst [vmem:[#allocation27_spill] sm:$0xff] %v3802_v48  ;;  %v1381_v50 = vmul.f32 0.0, %v3802_v48  ;;  %v1423_v54 = vmul.f32 0.0, %v3810_v52  ;;  %v3818_v56 = vstv %s3105_s19  ;;  %s3111_s19 = sld [smem:[#allocation6 + $0xa]] }
 0x10a   : > { %v442_v59 = vsel %vm417_vm3, %v441_v53, %v437_v57  ;;  %v1402_v53 = vmul.f32 0.0, %v3808_v51  ;;  %v3816_v55 = vstv %s3098_s25  ;;  %5838 = vst [vmem:[#allocation29_spill] sm:$0xff] %v3818_v56  ;;  %s3118_s25 = sld [smem:[#allocation6 + $0x3b]]  ;;  %vm2895_vm2 = vcmask 367616  }
 0x10b   : > { %v445_v60 = vsel %vm444_vm4, %v418_v58, %v442_v59  ;;  %v1444_v57 = vmul.f32 0.0, %v3816_v55  ;;  %v1465_v58 = vmul.f32 0.0, %v3818_v56  ;;  %v3824_v59 = vstv %s3099_s23  ;;  %s3112_s23 = sld [smem:[#allocation6 + $0x11]]  ;;  %v4035_v56 = vpop.permute.xlu1 %752 }
 0x10c   : > { %3195 = vmatmul.mubr.msk.f32.vlgmr.msra.gmra.mrb[0].mxu0 %vm457_vm5, %v445_v60  ;;  %v1488_v61 = vmul.f32 0.0, %v3824_v59  ;;  %v3832_v2 = vstv %s3100_s26  ;;  %v3840_v9 = vstv %s3101_s12  ;;  %s5842_s26 = smov 48   ;;  %s3122_s12 = sld [smem:[#allocation6 + $0x57]]  ;;  %5872 = vst [vmem:[#allocation60_spill] sm:$0xff] %v4035_v56 }
 0x10d   : > { %1243 = vrot.lane.b32.xlu0 %v1235_v41, %s5642_s20  ;;  %1222 = vrot.lane.b32.xlu1 %v1214_v42, %s5642_s20  ;;  %s3106_s20 = sld [smem:[#allocation6 + $0x4f]]  ;;  %v1530_v5 = vmul.f32 0.0, %v3832_v2  ;;  %v3842_v12 = vstv %s3108_s16  ;;  %v1572_v13 = vmul.f32 0.0, %v3840_v9  ;;  %s3115_s16 = sld [smem:[#allocation6 + $0x26]] }
 0x10e   : > { %v3834_v4 = vstv %s3107_s21  ;;  %5841 = vst [vmem:[#allocation32_spill] sm:$0xff] %v3842_v12  ;;  %v1593_v16 = vmul.f32 0.0, %v3842_v12  ;;  %s3121_s21 = sld [smem:[#allocation6 + $0x50]] }
 0x10f   : > { %5840 = vst [vmem:[#allocation31_spill] sm:$0xff] %v3834_v4  ;;  %v1551_v8 = vmul.f32 0.0, %v3834_v4  ;;  %v3850_v20 = vstv %s3111_s19  ;;  %s3116_s19 = sld [smem:[#allocation6 + $0x2d]] }
 0x110   : > { %v3848_v17 = vstv %s3118_s25  ;;  %v1676_v24 = vmul.f32 0.0, %v3850_v20  ;;  %s3123_s25 = sld [smem:[#allocation6 + $0x5e]] }
 0x111   : > { %1285 = vrot.lane.b32.xlu0 %v1277_v45, %s5836_s13  ;;  %1264 = vrot.lane.b32.xlu1 %v1256_v46, %s5836_s13  ;;  %5843 = vst [vmem:[#allocation33_spill] sm:$0xff] %v3848_v17  ;;  %v1697_v21 = vmul.f32 0.0, %v3848_v17  ;;  %v3858_v29 = vstv %s3112_s23  ;;  %s3133_s23 = sld [smem:[#allocation6 + $0x3c]] }
 0x112   : > { %v1718_v33 = vmul.f32 0.0, %v3858_v29  ;;  %v3872_v42 = vstv %s3122_s12  ;;  %s3128_s12 = sld [smem:[#allocation6 + $0x19]] }
 0x113   : > { %v3826_v60 = vstv %s3106_s20  ;;  %s3119_s20 = sld [smem:[#allocation6 + $0x42]]  ;;  %5846 = vst [vmem:[#allocation36_spill] sm:$0xff] %v3872_v42  ;;  %v3874_v45 = vstv %s3115_s16  ;;  %v1857_v46 = vmul.f32 0.0, %v3872_v42  ;;  %s3141_s16 = sld [smem:[#allocation6 + $0xc]] }
 0x114   : > { %5839 = vst [vmem:[#allocation30_spill] sm:$0xff] %v3826_v60  ;;  %v1509_v63 = vmul.f32 0.0, %v3826_v60  ;;  %v3864_v34 = vstv %s3121_s21  ;;  %s3134_s21 = sld [smem:[#allocation6 + $0x43]]  ;;  %v4031_v60 = vpop.permute.xlu0 %730 }
 0x115   : > { %1366 = vrot.lane.b32.xlu0 %v1360_v49, %s3455_s22  ;;  %1387 = vrot.lane.b32.xlu1 %v1381_v50, %s3455_s22  ;;  %5845 = vst [vmem:[#allocation35_spill] sm:$0xff] %v3864_v34  ;;  %v1815_v38 = vmul.f32 0.0, %v3864_v34  ;;  %v1836_v49 = vmul.f32 0.0, %v3874_v45  ;;  %5871 = vst [vmem:[#allocation59_spill] sm:$0xff] %v4031_v60 }
 0x116   : > { %v3880_v50 = vstv %s3123_s25  ;;  %s3148_s25 = sld [smem:[#allocation6 + $0x3d]] }
 0x117   : > { %5847 = vst [vmem:[#allocation37_spill] sm:$0xff] %v3880_v50 }
 0x119   : > { %1408 = vrot.lane.b32.xlu0 %v1402_v53, %s3456_s7  ;;  %1429 = vrot.lane.b32.xlu1 %v1423_v54, %s3456_s7  ;;  %v3856_v25 = vstv %s3119_s20  ;;  %s3126_s20 = sld [smem:[#allocation6 + $0xb]]  ;;  %v3882_v53 = vstv %s3116_s19  ;;  %v1899_v54 = vmul.f32 0.0, %v3880_v50  ;;  %s3156_s19 = sld [smem:[#allocation6 + $0xd]] }
 0x11a   : > { %5844 = vst [vmem:[#allocation34_spill] sm:$0xff] %v3856_v25  ;;  %v1739_v30 = vmul.f32 0.0, %v3856_v25 }
 0x11d   : > { %1450 = vrot.lane.b32.xlu0 %v1444_v57, %s5644_s6  ;;  %1471 = vrot.lane.b32.xlu1 %v1465_v58, %s5644_s6  ;;  %s3114_s6 = sld [smem:[#allocation6 + $0x1f]]  ;;  %v1878_v57 = vmul.f32 0.0, %v3882_v53 }
 0x11f   : > { %v3888_v58 = vstv %s3126_s20  ;;  %s3142_s20 = sld [smem:[#allocation6 + $0x13]] }
 0x121   : > { %1496 = vrot.lane.b32.xlu0 %v1488_v61, %s5646_s10  ;;  %1517 = vrot.lane.b32.xlu1 %v1509_v63, %s5646_s10  ;;  %v3890_v61 = vstv %s3133_s23  ;;  %v1981_v63 = vmul.f32 0.0, %v3888_v58  ;;  %s3163_s23 = sld [smem:[#allocation6 + $0x3e]] }
 0x122   : > { %5848 = vst [vmem:[#allocation38_spill] sm:$0xff] %v3890_v61 }
 0x123   : > { %v3866_v37 = vstv %s3114_s6  ;;  %s3127_s6 = sld [smem:[#allocation6 + $0x12]] }
 0x124   : > { %v1794_v41 = vmul.f32 0.0, %v3866_v37 }
 0x125   : > { %1538 = vrot.lane.b32.xlu0 %v1530_v5, %s5842_s26  ;;  %1559 = vrot.lane.b32.xlu1 %v1551_v8, %s5842_s26  ;;  %v2002_v5 = vmul.f32 0.0, %v3890_v61 }
 0x129   : > { %1580 = vrot.lane.b32.xlu0 %v1572_v13, %s5836_s13  ;;  %1601 = vrot.lane.b32.xlu1 %v1593_v16, %s5836_s13  ;;  %v3896_v8 = vstv %s3127_s6  ;;  %v3898_v13 = vstv %s3134_s21  ;;  %s3149_s6 = sld [smem:[#allocation6 + $0x44]] }
 0x12a   : > { %5849 = vst [vmem:[#allocation39_spill] sm:$0xff] %v3898_v13  ;;  %v2023_v16 = vmul.f32 0.0, %v3896_v8  ;;  %s3157_s21 = sld [smem:[#allocation6 + $0x14]] }
 0x12d   : > { %1703 = vrot.lane.b32.xlu0 %v1697_v21, %s3455_s22  ;;  %1682 = vrot.lane.b32.xlu1 %v1676_v24, %s3455_s22  ;;  %v2044_v21 = vmul.f32 0.0, %v3898_v13  ;;  %v3904_v24 = vstv %s3128_s12  ;;  %s5851_s12 = smov 80  }
 0x131   : > { %1745 = vrot.lane.b32.xlu0 %v1739_v30, %s3456_s7  ;;  %1724 = vrot.lane.b32.xlu1 %v1718_v33, %s3456_s7  ;;  %v3906_v30 = vstv %s3141_s16  ;;  %v2067_v33 = vmul.f32 0.0, %v3904_v24  ;;  %s3164_s16 = sld [smem:[#allocation6 + $0x45]] }
 0x135   : > { %1823 = vrot.lane.b32.xlu0 %v1815_v38, %s5646_s10  ;;  %1802 = vrot.lane.b32.xlu1 %v1794_v41, %s5646_s10  ;;  %v2297_v38 = vmul.f32 0.0, %v3906_v30  ;;  %v3912_v41 = vstv %s3148_s25  ;;  %s3135_s10 = sld [smem:[#allocation6 + $0x4a]] }
 0x136   : > { %5850 = vst [vmem:[#allocation40_spill] sm:$0xff] %v3912_v41  ;;  %s3143_s25 = sld [smem:[#allocation6 + $0x1a]] }
 0x139   : > { %1865 = vrot.lane.b32.xlu0 %v1857_v46, %s5842_s26  ;;  %1844 = vrot.lane.b32.xlu1 %v1836_v49, %s5842_s26  ;;  %v3914_v46 = vstv %s3156_s19  ;;  %v2318_v49 = vmul.f32 0.0, %v3912_v41  ;;  %s3129_s19 = sld [smem:[#allocation6 + $0x20]]  ;;  %v3936_v41 = vstv %s3164_s16  ;;  %s3165_s16 = sld [smem:[#allocation6 + $0x4c]] }
 0x13a   : > { %5854 = vst [vmem:[#allocation43_spill] sm:$0xff] %v3936_v41 }
 0x13c   : > { %v3947_v50 = vstv %s3143_s25  ;;  %s3130_s25 = sld [smem:[#allocation6 + $0x27]] }
 0x13d   : > { %1907 = vrot.lane.b32.xlu0 %v1899_v54, %s5836_s13  ;;  %1886 = vrot.lane.b32.xlu1 %v1878_v57, %s5836_s13  ;;  %v2613_v54 = vmul.f32 0.0, %v3914_v46  ;;  %v3920_v57 = vstv %s3142_s20  ;;  %s3150_s20 = sld [smem:[#allocation6 + $0x4b]]  ;;  %v2383_v25 = vmul.f32 0.0, %v3947_v50 }
 0x13f   : > { %v3949_v42 = vstv %s3129_s19  ;;  %s3151_s19 = sld [smem:[#allocation6 + $0x52]] }
 0x141   : > { %1987 = vrot.lane.b32.xlu0 %v1981_v63, %s3455_s22  ;;  %2008 = vrot.lane.b32.xlu1 %v2002_v5, %s3455_s22  ;;  %v3922_v63 = vstv %s3163_s23  ;;  %v2339_v5 = vmul.f32 0.0, %v3920_v57  ;;  %s3137_s23 = sld [smem:[#allocation6 + $0x58]] }
 0x142   : > { %5852 = vst [vmem:[#allocation41_spill] sm:$0xff] %v3922_v63 }
 0x145   : > { %2029 = vrot.lane.b32.xlu0 %v2023_v16, %s3456_s7  ;;  %2050 = vrot.lane.b32.xlu1 %v2044_v21, %s3456_s7  ;;  %v2634_v16 = vmul.f32 0.0, %v3922_v63  ;;  %v3928_v21 = vstv %s3149_s6  ;;  %v3941_v63 = vstv %s3135_s10  ;;  %s3158_s6 = sld [smem:[#allocation6 + $0x1b]]  ;;  %s3144_s10 = sld [smem:[#allocation6 + $0x21]] }
 0x146   : > { %5853 = vst [vmem:[#allocation42_spill] sm:$0xff] %v3928_v21  ;;  %5855 = vst [vmem:[#allocation44_spill] sm:$0xff] %v3941_v63 }
 0x149   : > { %2075 = vrot.lane.b32.xlu0 %v2067_v33, %s5851_s12  ;;  %2303 = vrot.lane.b32.xlu1 %v2297_v38, %s3455_s22  ;;  %v3930_v33 = vstv %s3157_s21  ;;  %v2360_v38 = vmul.f32 0.0, %v3928_v21  ;;  %s3136_s21 = sld [smem:[#allocation6 + $0x51]] }
 0x14d   : > { %2324 = vrot.lane.b32.xlu0 %v2318_v49, %s3455_s22  ;;  %2619 = vrot.lane.b32.xlu1 %v2613_v54, %s3455_s22  ;;  %v2655_v49 = vmul.f32 0.0, %v3930_v33  ;;  %v3061_v54 = vld [vmem:[%s5627_s2] ss:$0 sm:$0xff] }
 0x151   : > { %2345 = vrot.lane.b32.xlu0 %v2339_v5, %s3456_s7  ;;  %2640 = vrot.lane.b32.xlu1 %v2634_v16, %s3455_s22  ;;  %v2676_v5 = vmul.f32 0.0, %v3936_v41  ;;  %v2088_v16 = vmul.f32 0.0, %v3941_v63 }
 0x155   : > { %2366 = vrot.lane.b32.xlu0 %v2360_v38, %s3456_s7  ;;  %2661 = vrot.lane.b32.xlu1 %v2655_v49, %s3456_s7  ;;  %v3957_v49 = vstv %s3158_s6  ;;  %s3145_s6 = sld [smem:[#allocation6 + $0x28]] }
 0x159   : > { %2682 = vrot.lane.b32.xlu0 %v2676_v5, %s3456_s7  ;;  %2096 = vrot.lane.b32.xlu1 %v2088_v16, %s5851_s12  ;;  %v3963_v5 = vstv %s3136_s21  ;;  %v3971_v16 = vstv %s3165_s16  ;;  %s3166_s21 = sld [smem:[#allocation6 + $0x53]]  ;;  %s3152_s16 = sld [smem:[#allocation6 + $0x59]] }
 0x15a   : > { %5858 = vst [vmem:[#allocation46_spill] sm:$0xff] %v3963_v5  ;;  %5859 = vst [vmem:[#allocation47_spill] sm:$0xff] %v3971_v16 }
 0x15d   : > { %2391 = vrot.lane.b32.xlu0 %v2383_v25, %s5851_s12  ;;  %v3969_v25 = vstv %s3144_s10  ;;  %s3131_s10 = sld [smem:[#allocation6 + $0x2e]] }
 0x15f   : > { %v3995_v41 = vstv %s3166_s21  ;;  %v4003_v63 = vstv %s3152_s16  ;;  %s3161_s21 = sld [smem:[#allocation6 + $0x30]]  ;;  %s3125_s16 = sld [smem:[#allocation6 + $0x4]] }
 0x160   : > { %5862 = vst [vmem:[#allocation50_spill] sm:$0xff] %v3995_v41  ;;  %5864 = vst [vmem:[#allocation52_spill] sm:$0xff] %v4003_v63 }
 0x1df   : > { %v527_v13 = vpop.f32.mrb[0].mxu0 }
 0x1e0   : > { %v528_v21 = vadd.f32 %v3061_v54, %v527_v13  ;;  %v3196_v61 = vpop.f32.mrb[1].mxu0  ;;  %v3955_v13 = vstv %s3150_s20  ;;  %s3159_s20 = sld [smem:[#allocation6 + $0x22]] }
 0x1e1   : > { %v2109_v61 = vmul.f32 0.0, %v3949_v42  ;;  %5856 = vst [vmem:[#allocation45_spill] sm:$0xff] %v3955_v13  ;;  %v2404_v54 = vmul.f32 0.0, %v3955_v13  ;;  %v3987_v13 = vstv %s3137_s23  ;;  %s3167_s23 = sld [smem:[#allocation6 + $0x5a]] }
 0x1e2   : > { %v531_v34 = vmax.f32 %v528_v21, 0.0  ;;  %v2699_v21 = vmul.f32 0.0, %v3957_v49  ;;  %5861 = vst [vmem:[#allocation49_spill] sm:$0xff] %v3987_v13 }
 0x1e3   : > { %2117 = vrot.lane.b32.xlu1 %v2109_v61, %s5857_s0  ;;  %2412 = vrot.lane.b32.xlu0 %v2404_v54, %s5851_s12  ;;  %v2720_v61 = vmul.f32 0.0, %v3971_v16  ;;  %v3977_v54 = vstv %s3130_s25  ;;  %s3160_s25 = sld [smem:[#allocation6 + $0x29]] }
 0x1e4   : > { %v532_v38 = vmin.f32 %v531_v34, 6.0  ;;  %v2130_v34 = vmul.f32 0.0, %v3963_v5 }
 0x1e6   : > { %3200 = vmatmul.mubr.msk.f32.vlgmr.msra.gmra.mrb[0].mxu1 %vm541_vm7, %v532_v38  ;;  %v2425_v38 = vmul.f32 0.0, %v3969_v25  ;;  %v3985_v16 = vstv %s3159_s20  ;;  %s3146_s20 = sld [smem:[#allocation6 + $0x2f]] }
 0x1e7   : > { %2707 = vrot.lane.b32.xlu1 %v2699_v21, %s5851_s12  ;;  %2138 = vrot.lane.b32.xlu0 %v2130_v34, %s5857_s0  ;;  %v3979_v21 = vstv %s3151_s19  ;;  %v2151_v34 = vmul.f32 0.0, %v3977_v54  ;;  %s3138_s19 = sld [smem:[#allocation6 + $0x5f]]  ;;  %v4019_v12 = vstv %s3167_s23  ;;  %s3095_s23 = sld [smem:[#allocation6 + $0x2]] }
 0x1e8   : > { %5860 = vst [vmem:[#allocation48_spill] sm:$0xff] %v3979_v21  ;;  %v2446_v5 = vmul.f32 0.0, %v3979_v21  ;;  %v3993_v21 = vstv %s3145_s6  ;;  %s3153_s6 = sld [smem:[#allocation6 + $0x60]]  ;;  %5868 = vst [vmem:[#allocation56_spill] sm:$0xff] %v4019_v12 }
 0x1eb   : > { %2433 = vrot.lane.b32.xlu1 %v2425_v38, %s5857_s0  ;;  %2728 = vrot.lane.b32.xlu0 %v2720_v61, %s5851_s12  ;;  %v2741_v38 = vmul.f32 0.0, %v3985_v16  ;;  %v2172_v61 = vmul.f32 0.0, %v3987_v13  ;;  %v4001_v13 = vstv %s3131_s10  ;;  %s3117_s10 = sld [smem:[#allocation6 + $0x34]] }
 0x1ec   : > { %5863 = vst [vmem:[#allocation51_spill] sm:$0xff] %v4001_v13 }
 0x1ed   : > { %v4011_v17 = vstv %s3138_s19  ;;  %s3080_s19 = sld [smem:[#allocation6 + $0x1]] }
 0x1ee   : > { %5866 = vst [vmem:[#allocation54_spill] sm:$0xff] %v4011_v17  ;;  %v4025_v4 = vstv %s3153_s6  ;;  %s3102_s6 = sld [smem:[#allocation6 + $0x33]] }
 0x1ef   : > { %2159 = vrot.lane.b32.xlu1 %v2151_v34, %s5842_s26  ;;  %2454 = vrot.lane.b32.xlu0 %v2446_v5, %s5857_s0  ;;  %v2467_v5 = vmul.f32 0.0, %v3993_v21  ;;  %v2762_v34 = vmul.f32 0.0, %v3995_v41  ;;  %v4009_v41 = vstv %s3160_s25  ;;  %5869 = vst [vmem:[#allocation57_spill] sm:$0xff] %v4025_v4  ;;  %s3073_s25 = sld [smem:[#allocation6 + $0x31]] }
 0x1f0   : > { %5865 = vst [vmem:[#allocation53_spill] sm:$0xff] %v4009_v41 }
 0x1f3   : > { %2749 = vrot.lane.b32.xlu1 %v2741_v38, %s5857_s0  ;;  %2180 = vrot.lane.b32.xlu0 %v2172_v61, %s5842_s26  ;;  %v2193_v38 = vmul.f32 0.0, %v4001_v13  ;;  %v2488_v61 = vmul.f32 0.0, %v4003_v63  ;;  %v4017_v63 = vstv %s3146_s20  ;;  %s3087_s20 = sld [smem:[#allocation6 + $0x32]] }
 0x1f4   : > { %5867 = vst [vmem:[#allocation55_spill] sm:$0xff] %v4017_v63 }
 0x1f7   : > { %2475 = vrot.lane.b32.xlu1 %v2467_v5, %s5842_s26  ;;  %2770 = vrot.lane.b32.xlu0 %v2762_v34, %s5857_s0  ;;  %v2783_v5 = vmul.f32 0.0, %v4009_v41  ;;  %v2214_v34 = vmul.f32 0.0, %v4011_v17  ;;  %v4027_v17 = vstv %s3161_s21  ;;  %s3110_s21 = sld [smem:[#allocation6 + $0x3]] }
 0x1f8   : > { %5870 = vst [vmem:[#allocation58_spill] sm:$0xff] %v4027_v17 }
 0x1fb   : > { %2201 = vrot.lane.b32.xlu1 %v2193_v38, %s5836_s13  ;;  %2496 = vrot.lane.b32.xlu0 %v2488_v61, %s5842_s26  ;;  %v2509_v38 = vmul.f32 0.0, %v4017_v63  ;;  %v2804_v61 = vmul.f32 0.0, %v4019_v12  ;;  %v4037_v12 = vpop.permute.xlu0 %773 }
 0x1fc   : > { %5873 = vst [vmem:[#allocation61_spill] sm:$0xff] %v4037_v12 }
 0x1ff   : > { %2791 = vrot.lane.b32.xlu1 %v2783_v5, %s5842_s26  ;;  %2222 = vrot.lane.b32.xlu0 %v2214_v34, %s5836_s13  ;;  %v2530_v5 = vmul.f32 0.0, %v4025_v4  ;;  %v2825_v34 = vmul.f32 0.0, %v4027_v17 }
 0x203   : > { %2517 = vrot.lane.b32.xlu1 %v2509_v38, %s5836_s13  ;;  %2812 = vrot.lane.b32.xlu0 %v2804_v61, %s5842_s26  ;;  %v4039_v38 = vpop.permute.xlu1 %795  ;;  %v4041_v61 = vpop.permute.xlu0 %816 }
 0x204   : > { %5874 = vst [vmem:[#allocation62_spill] sm:$0xff] %v4039_v38  ;;  %5875 = vst [vmem:[#allocation63_spill] sm:$0xff] %v4041_v61 }
 0x207   : > { %2538 = vrot.lane.b32.xlu1 %v2530_v5, %s5836_s13  ;;  %2833 = vrot.lane.b32.xlu0 %v2825_v34, %s5836_s13  ;;  %v4043_v52 = vpop.permute.xlu1 %838  ;;  %v4045_v48 = vpop.permute.xlu0 %863 }
 0x208   : > { %5876 = vst [vmem:[#allocation64_spill] sm:$0xff] %v4043_v52  ;;  %5877 = vst [vmem:[#allocation65_spill] sm:$0xff] %v4045_v48 }
 0x20b   : > { %v4047_v4 = vpop.permute.xlu1 %885  ;;  %v4049_v43 = vpop.permute.xlu0 %906 }
 0x20c   : > { %5878 = vst [vmem:[#allocation66_spill] sm:$0xff] %v4047_v4  ;;  %5879 = vst [vmem:[#allocation67_spill] sm:$0xff] %v4049_v43 }
 0x20f   : > { %v4051_v60 = vpop.permute.xlu1 %928  ;;  %v4053_v5 = vpop.permute.xlu0 %949 }
 0x210   : > { %5880 = vst [vmem:[#allocation68_spill] sm:$0xff] %v4051_v60  ;;  %5881 = vst [vmem:[#allocation69_spill] sm:$0xff] %v4053_v5 }
 0x213   : > { %v4055_v34 = vpop.permute.xlu1 %970  ;;  %v4057_v56 = vpop.permute.xlu0 %1071 }
 0x214   : > { %5882 = vst [vmem:[#allocation70_spill] sm:$0xff] %v4055_v34  ;;  %5883 = vst [vmem:[#allocation71_spill] sm:$0xff] %v4057_v56 }
 0x217   : > { %v4059_v12 = vpop.permute.xlu1 %1050  ;;  %v4061_v38 = vpop.permute.xlu0 %1113 }
 0x218   : > { %5884 = vst [vmem:[#allocation72_spill] sm:$0xff] %v4059_v12  ;;  %5885 = vst [vmem:[#allocation73_spill] sm:$0xff] %v4061_v38 }
 0x21b   : > { %v4063_v61 = vpop.permute.xlu1 %1092  ;;  %v4065_v52 = vpop.permute.xlu0 %1155 }
 0x21c   : > { %5886 = vst [vmem:[#allocation74_spill] sm:$0xff] %v4063_v61  ;;  %5887 = vst [vmem:[#allocation75_spill] sm:$0xff] %v4065_v52 }
 0x21f   : > { %v4067_v48 = vpop.permute.xlu1 %1134  ;;  %v4069_v4 = vpop.permute.xlu0 %1201 }
 0x220   : > { %5888 = vst [vmem:[#allocation76_spill] sm:$0xff] %v4067_v48  ;;  %5889 = vst [vmem:[#allocation77_spill] sm:$0xff] %v4069_v4 }
 0x223   : > { %v4071_v43 = vpop.permute.xlu1 %1180  ;;  %v4073_v60 = vpop.permute.xlu0 %1243 }
 0x224   : > { %5890 = vst [vmem:[#allocation78_spill] sm:$0xff] %v4071_v43  ;;  %5891 = vst [vmem:[#allocation79_spill] sm:$0xff] %v4073_v60 }
 0x227   : > { %v4075_v5 = vpop.permute.xlu1 %1222  ;;  %v4077_v34 = vpop.permute.xlu0 %1285 }
 0x228   : > { %5892 = vst [vmem:[#allocation80_spill] sm:$0xff] %v4075_v5  ;;  %5893 = vst [vmem:[#allocation81_spill] sm:$0xff] %v4077_v34  ;;  %v3063_v34 = vld [vmem:[%s5629_s4] ss:$0 sm:$0xff] }
 0x22b   : > { %v4079_v56 = vpop.permute.xlu1 %1264  ;;  %v4081_v12 = vpop.permute.xlu0 %1366 }
 0x22c   : > { %5894 = vst [vmem:[#allocation82_spill] sm:$0xff] %v4079_v56  ;;  %5895 = vst [vmem:[#allocation83_spill] sm:$0xff] %v4081_v12 }
 0x22f   : > { %v4083_v38 = vpop.permute.xlu1 %1387  ;;  %v4085_v61 = vpop.permute.xlu0 %1408 }
 0x230   : > { %5896 = vst [vmem:[#allocation84_spill] sm:$0xff] %v4083_v38  ;;  %5897 = vst [vmem:[#allocation85_spill] sm:$0xff] %v4085_v61 }
 0x233   : > { %v4087_v52 = vpop.permute.xlu1 %1429  ;;  %v4089_v48 = vpop.permute.xlu0 %1450 }
 0x234   : > { %5898 = vst [vmem:[#allocation86_spill] sm:$0xff] %v4087_v52  ;;  %5899 = vst [vmem:[#allocation87_spill] sm:$0xff] %v4089_v48 }
 0x237   : > { %v4091_v4 = vpop.permute.xlu1 %1471  ;;  %v4093_v43 = vpop.permute.xlu0 %1496 }
 0x238   : > { %5900 = vst [vmem:[#allocation88_spill] sm:$0xff] %v4091_v4  ;;  %5901 = vst [vmem:[#allocation89_spill] sm:$0xff] %v4093_v43 }
 0x23b   : > { %v4098_v60 = vpop.permute.xlu1 %1517  ;;  %v4100_v56 = vpop.permute.xlu0 %1538 }
 0x23c   : > { %5902 = vst [vmem:[#allocation90_spill] sm:$0xff] %v4098_v60  ;;  %5903 = vst [vmem:[#allocation91_spill] sm:$0xff] %v4100_v56 }
 0x23f   : > { %v4102_v52 = vpop.permute.xlu1 %1559  ;;  %v4104_v48 = vpop.permute.xlu0 %1580 }
 0x240   : > { %5904 = vst [vmem:[#allocation92_spill] sm:$0xff] %v4102_v52  ;;  %5905 = vst [vmem:[#allocation93_spill] sm:$0xff] %v4104_v48 }
 0x243   : > { %v4106_v43 = vpop.permute.xlu1 %1601  ;;  %v4108_v35 = vpop.permute.xlu0 %1703 }
 0x244   : > { %5906 = vst [vmem:[#allocation94_spill] sm:$0xff] %v4106_v43  ;;  %5907 = vst [vmem:[#allocation95_spill] sm:$0xff] %v4108_v35 }
 0x247   : > { %v4110_v31 = vpop.permute.xlu1 %1682  ;;  %v4112_v60 = vpop.permute.xlu0 %1745 }
 0x248   : > { %5908 = vst [vmem:[#allocation96_spill] sm:$0xff] %v4110_v31  ;;  %5909 = vst [vmem:[#allocation97_spill] sm:$0xff] %v4112_v60 }
 0x2b9   : > { %v615_v12 = vpop.f32.mrb[0].mxu1 }
 0x2ba   : > { %v616_v38 = vadd.f32 %v3063_v34, %v615_v12  ;;  %v3201_v5 = vpop.f32.mrb[1].mxu1  ;;  %v4114_v12 = vpop.permute.xlu1 %1724 }
 0x2bb   : > { %5910 = vst [vmem:[#allocation98_spill] sm:$0xff] %v4114_v12 }
 0x2bc   : > { %v620_v61 = vrot.slane %v616_v38, 1 }
 0x2be   : > { %v622_v39 = vadd.f32 %v620_v61, %v616_v38  ;;  %v4116_v38 = vpop.permute.xlu0 %1823  ;;  %v5714_v61 = vsub.s32 0, %v3694_v28  ;;  %v4119_v5 = vpop.permute.xlu1 %1802 }
 0x2bf   : > { %5911 = vst [vmem:[#allocation99_spill] sm:$0xff] %v4116_v38  ;;  %5912 = vst [vmem:[#allocation100_spill] sm:$0xff] %v4119_v5 }
 0x2c0   : > { %v3066_v4 = vmul.f32 -1.442695, %v622_v39 }
 0x2c2   : > { %3295 = vpow2.f32 %v3066_v4  ;;  %v4121_v39 = vpop.permute.xlu0 %1865  ;;  %v4125_v60 = vpop.permute.xlu1 %1844 }
 0x2c3   : > { %5913 = vst [vmem:[#allocation101_spill] sm:$0xff] %v4121_v39  ;;  %5914 = vst [vmem:[#allocation102_spill] sm:$0xff] %v4125_v60 }
 0x2cc   : > { %v3296_v56 = vpop.eup %3295 }
 0x2cd   : > { %v626_v26 = vadd.f32 1.0, %v3296_v56  ;;  %v4127_v56 = vpop.permute.xlu0 %1907 }
 0x2ce   : > { %5915 = vst [vmem:[#allocation103_spill] sm:$0xff] %v4127_v56 }
 0x2cf   : > { %3297 = vrcp.f32 %v626_v26  ;;  %v4129_v26 = vpop.permute.xlu1 %1886 }
 0x2d0   : > { %5916 = vst [vmem:[#allocation104_spill] sm:$0xff] %v4129_v26 }
 0x2d1   : > { %v4131_v38 = vpop.permute.xlu0 %1987 }
 0x2d2   : > { %5917 = vst [vmem:[#allocation105_spill] sm:$0xff] %v4131_v38 }
 0x2d3   : > { %v4133_v12 = vpop.permute.xlu1 %2008 }
 0x2d4   : > { %5918 = vst [vmem:[#allocation106_spill] sm:$0xff] %v4133_v12 }
 0x2d5   : > { %v4135_v5 = vpop.permute.xlu0 %2029 }
 0x2d6   : > { %5919 = vst [vmem:[#allocation107_spill] sm:$0xff] %v4135_v5 }
 0x2d7   : > { %v4137_v39 = vpop.permute.xlu1 %2050 }
 0x2d8   : > { %5920 = vst [vmem:[#allocation108_spill] sm:$0xff] %v4137_v39 }
 0x2d9   : > { %v3298_v4 = vpop.eup %3297  ;;  %v4139_v35 = vpop.permute.xlu0 %2075 }
 0x2da   : > { %v632_v34 = vrot.slane %v3298_v4, %v5714_v61  ;;  %5921 = vst [vmem:[#allocation109_spill] sm:$0xff] %v4139_v35 }
 0x2db   : > { %v4141_v4 = vpop.permute.xlu1 %2303 }
 0x2dc   : > { %638 = vbcast.lane.b32.xlu1 %v632_v34, 264  ;;  %634 = vbcast.lane.b32.xlu0 %v632_v34, 256  ;;  %5922 = vst [vmem:[#allocation110_spill] sm:$0xff] %v4141_v4 }
 0x2dd   : > { %v4143_v61 = vpop.permute.xlu0 %2324 }
 0x2de   : > { %5923 = vst [vmem:[#allocation111_spill] sm:$0xff] %v4143_v61 }
 0x2df   : > { %v4145_v60 = vpop.permute.xlu1 %2619 }
 0x2e0   : > { %642 = vbcast.lane.b32.xlu1 %v632_v34, 272  ;;  %5924 = vst [vmem:[#allocation112_spill] sm:$0xff] %v4145_v60 }
 0x2e1   : > { %v4147_v56 = vpop.permute.xlu0 %2345 }
 0x2e2   : > { %5925 = vst [vmem:[#allocation113_spill] sm:$0xff] %v4147_v56 }
 0x2e3   : > { %v4149_v26 = vpop.permute.xlu1 %2640 }
 0x2e4   : > { %646 = vbcast.lane.b32.xlu1 %v632_v34, 280  ;;  %5926 = vst [vmem:[#allocation114_spill] sm:$0xff] %v4149_v26 }
 0x2e5   : > { %v4151_v38 = vpop.permute.xlu0 %2366 }
 0x2e6   : > { %5927 = vst [vmem:[#allocation115_spill] sm:$0xff] %v4151_v38 }
 0x2e7   : > { %v4153_v34 = vpop.permute.xlu1 %2661 }
 0x2e8   : > { %5928 = vst [vmem:[#allocation116_spill] sm:$0xff] %v4153_v34 }
 0x2e9   : > { %v4155_v12 = vpop.permute.xlu0 %2682 }
 0x2ea   : > { %5929 = vst [vmem:[#allocation117_spill] sm:$0xff] %v4155_v12 }
 0x2eb   : > { %v4157_v5 = vpop.permute.xlu1 %2096 }
 0x2ec   : > { %5930 = vst [vmem:[#allocation118_spill] sm:$0xff] %v4157_v5 }
 0x2ed   : > { %v4159_v39 = vpop.permute.xlu0 %2391 }
 0x2ee   : > { %5931 = vst [vmem:[#allocation119_spill] sm:$0xff] %v4159_v39 }
 0x2ef   : > { %v4161_v35 = vpop.permute.xlu1 %2117 }
 0x2f0   : > { %5932 = vst [vmem:[#allocation120_spill] sm:$0xff] %v4161_v35 }
 0x2f1   : > { %v4163_v4 = vpop.permute.xlu0 %2412 }
 0x2f2   : > { %5933 = vst [vmem:[#allocation121_spill] sm:$0xff] %v4163_v4 }
 0x2f3   : > { %v4165_v61 = vpop.permute.xlu1 %2707 }
 0x2f4   : > { %5934 = vst [vmem:[#allocation122_spill] sm:$0xff] %v4165_v61 }
 0x2f5   : > { %v4167_v60 = vpop.permute.xlu0 %2138 }
 0x2f6   : > { %5935 = vst [vmem:[#allocation123_spill] sm:$0xff] %v4167_v60 }
 0x2f7   : > { %v4169_v56 = vpop.permute.xlu1 %2433 }
 0x2f8   : > { %5936 = vst [vmem:[#allocation124_spill] sm:$0xff] %v4169_v56 }
 0x2f9   : > { %v4171_v26 = vpop.permute.xlu0 %2728 }
 0x2fa   : > { %5937 = vst [vmem:[#allocation125_spill] sm:$0xff] %v4171_v26 }
 0x2fb   : > { %v4173_v38 = vpop.permute.xlu1 %2159 }
 0x2fc   : > { %5938 = vst [vmem:[#allocation126_spill] sm:$0xff] %v4173_v38 }
 0x2fd   : > { %v4175_v12 = vpop.permute.xlu0 %2454 }
 0x2fe   : > { %5939 = vst [vmem:[#allocation127_spill] sm:$0xff] %v4175_v12 }
 0x2ff   : > { %v4177_v5 = vpop.permute.xlu1 %2749 }
 0x300   : > { %5940 = vst [vmem:[#allocation128_spill] sm:$0xff] %v4177_v5 }
 0x301   : > { %v4179_v39 = vpop.permute.xlu0 %2180 }
 0x302   : > { %5941 = vst [vmem:[#allocation129_spill] sm:$0xff] %v4179_v39 }
 0x303   : > { %v4181_v35 = vpop.permute.xlu1 %2475 }
 0x304   : > { %5942 = vst [vmem:[#allocation130_spill] sm:$0xff] %v4181_v35 }
 0x305   : > { %v4183_v4 = vpop.permute.xlu0 %2770 }
 0x306   : > { %5943 = vst [vmem:[#allocation131_spill] sm:$0xff] %v4183_v4 }
 0x307   : > { %v4185_v60 = vpop.permute.xlu1 %2201 }
 0x308   : > { %5944 = vst [vmem:[#allocation132_spill] sm:$0xff] %v4185_v60  ;;  %v3303_v60 = vld [vmem:[%s3660_s15 + $0x10] sm:$0xff] }
 0x309   : > { %v4187_v56 = vpop.permute.xlu0 %2496 }
 0x30a   : > { %5945 = vst [vmem:[#allocation133_spill] sm:$0xff] %v4187_v56  ;;  %v3304_v56 = vld [vmem:[%s3660_s15 + $0x18] sm:$0xff] }
 0x30b   : > { %v4189_v26 = vpop.permute.xlu1 %2791 }
 0x30c   : > { %5946 = vst [vmem:[#allocation134_spill] sm:$0xff] %v4189_v26 }
 0x30d   : > { %v4191_v38 = vpop.permute.xlu0 %2222 }
 0x30e   : > { %5947 = vst [vmem:[#allocation135_spill] sm:$0xff] %v4191_v38  ;;  %v3305_v38 = vld [vmem:[%s3660_s15] sm:$0xff] }
 0x30f   : > { %v4193_v12 = vpop.permute.xlu1 %2517 }
 0x310   : > { %5948 = vst [vmem:[#allocation136_spill] sm:$0xff] %v4193_v12  ;;  %v3306_v12 = vld [vmem:[%s3660_s15 + $0x8] sm:$0xff] }
 0x311   : > { %v4195_v5 = vpop.permute.xlu0 %2812 }
 0x312   : > { %5949 = vst [vmem:[#allocation137_spill] sm:$0xff] %v4195_v5 }
 0x313   : > { %v4197_v39 = vpop.permute.xlu1 %2538 }
 0x314   : > { %5950 = vst [vmem:[#allocation138_spill] sm:$0xff] %v4197_v39  ;;  %v3307_v39 = vld [vmem:[%s3660_s15 + $0x20] sm:$0xff] }
 0x315   : > { %v4199_v35 = vpop.permute.xlu0 %2833 }
 0x316   : > { %5951 = vst [vmem:[#allocation139_spill] sm:$0xff] %v4199_v35  ;;  %v3308_v35 = vld [vmem:[%s3660_s15 + $0x28] sm:$0xff] }
 0x34e   : > { %v639_v4 = vpop.permute.xlu1 %638  ;;  %v635_v61 = vpop.permute.xlu0 %634 }
 0x34f   : > { %v4202_v34 = vmul.f32 %v3303_v60, %v639_v4  ;;  %v4205_v26 = vmul.f32 %v3304_v56, %v639_v4  ;;  %v4208_v43 = vmul.f32 %v3305_v38, %v635_v61  ;;  %v4211_v5 = vmul.f32 %v3306_v12, %v635_v61  ;;  %v3309_v12 = vld [vmem:[%s3660_s15 + $0x30] sm:$0xff]  ;;  %s695_s15 = sld [smem:[#allocation6]] }
 0x351   : > { %5952 = vst [vmem:[#allocation140_spill] sm:$0xff] %v4202_v34  ;;  %5953 = vst [vmem:[#allocation141_spill] sm:$0xff] %v4205_v26  ;;  %v674_v60 = vadd.f32 %v4202_v34, %v4208_v43  ;;  %v683_v56 = vadd.f32 %v4205_v26, %v4211_v5 }
 0x352   : > { %5954 = vst [vmem:[#allocation142_spill] sm:$0xff] %v4208_v43  ;;  %5955 = vst [vmem:[#allocation143_spill] sm:$0xff] %v4211_v5  ;;  %v643_v31 = vpop.permute.xlu1 %642 }
 0x353   : > { %v4214_v48 = vmul.f32 %v3307_v39, %v643_v31  ;;  %v4217_v52 = vmul.f32 %v3308_v35, %v643_v31 }
 0x355   : > { %5956 = vst [vmem:[#allocation144_spill] sm:$0xff] %v4214_v48  ;;  %5957 = vst [vmem:[#allocation145_spill] sm:$0xff] %v4217_v52  ;;  %v675_v38 = vadd.f32 %v674_v60, %v4214_v48  ;;  %v684_v28 = vadd.f32 %v683_v56, %v4217_v52  ;;  %v656_v31 = vmax.f32 %v4208_v43, %v4214_v48 }
 0x356   : > { %v647_v4 = vpop.permute.xlu1 %646  ;;  %v665_v35 = vmax.f32 %v4211_v5, %v4217_v52 }
 0x357   : > { %v4226_v61 = vmul.f32 %v3309_v12, %v647_v4  ;;  %v4229_v39 = vmul.f32 %v3310_v22, %v647_v4 }
 0x359   : > { %5958 = vst [vmem:[#allocation146_spill] sm:$0xff] %v4226_v61  ;;  %5959 = vst [vmem:[#allocation147_spill] sm:$0xff] %v4229_v39  ;;  %v657_v19 = vmax.f32 %v4202_v34, %v4226_v61  ;;  %v666_v60 = vmax.f32 %v4205_v26, %v4229_v39  ;;  %v676_v56 = vadd.f32 %v675_v38, %v4226_v61 }
 0x35a   : > { %v685_v12 = vadd.f32 %v684_v28, %v4229_v39 }
 0x35b   : > { %v658_v15 = vmax.f32 %v656_v31, %v657_v19  ;;  %v667_v11 = vmax.f32 %v665_v35, %v666_v60  ;;  %v677_v3 = vrot.slane %v676_v56, 4 }
 0x35c   : > { %v686_v22 = vrot.slane %v685_v12, 4 }
 0x35d   : > { %v659_v4 = vrot.slane %v658_v15, 4  ;;  %v668_v7 = vrot.slane %v667_v11, 4  ;;  %v678_v17 = vadd.f32 %v677_v3, %v676_v56 }
 0x35e   : > { %v687_v0 = vadd.f32 %v686_v22, %v685_v12  ;;  %v4291_v22 = vstv %s3080_s19  ;;  %s3147_s19 = sld [smem:[#allocation6 + $0x36]] }
 0x35f   : > { %v660_v48 = vmax.f32 %v658_v15, %v659_v4  ;;  %v669_v43 = vmax.f32 %v667_v11, %v668_v7  ;;  %v679_v38 = vrot.slane %v678_v17, 2 }
 0x360   : > { %v688_v41 = vrot.slane %v687_v0, 2 }
 0x361   : > { %v661_v52 = vrot.slane %v660_v48, 2  ;;  %v670_v5 = vrot.slane %v669_v43, 2  ;;  %v680_v31 = vadd.f32 %v679_v38, %v678_v17  ;;  %v4297_v38 = vstv %s3087_s20  ;;  %s3155_s20 = sld [smem:[#allocation6 + $0x6]] }
 0x362   : > { %v689_v19 = vadd.f32 %v688_v41, %v687_v0  ;;  %v4265_v41 = vstv %s695_s15  ;;  %s3132_s15 = sld [smem:[#allocation6 + $0x35]] }
 0x363   : > { %v662_v34 = vmax.f32 %v660_v48, %v661_v52  ;;  %v671_v63 = vmax.f32 %v669_v43, %v670_v5  ;;  %v681_v11 = vrot.slane %v680_v31, 1 }
 0x364   : > { %v690_v3 = vrot.slane %v689_v19, 1 }
 0x365   : > { %v663_v26 = vrot.slane %v662_v34, 1  ;;  %v672_v13 = vrot.slane %v671_v63, 1 }
 0x366   : > { %v691_v48 = vadd.f32 %v690_v3, %v689_v19 }
 0x367   : > { %v4241_v61 = vmax.f32 %v662_v34, %v663_v26  ;;  %v4243_v28 = vmax.f32 %v671_v63, %v672_v13  ;;  %v4273_v26 = vstv %s3073_s25  ;;  %s3140_s25 = sld [smem:[#allocation6 + $0x5]] }
 0x369   : > { %v726_v15 = vmul.f32 %v3706_v62, %v4243_v28  ;;  %v725_v7 = vmul.f32 %v3706_v62, %v4241_v61  ;;  %v769_v43 = vmul.f32 %v3711_v1, %v4243_v28  ;;  %v768_v0 = vmul.f32 %v3711_v1, %v4241_v61 }
 0x36a   : > { %v682_v62 = vadd.f32 %v681_v11, %v680_v31  ;;  %v812_v52 = vmul.f32 %v3720_v6, %v4243_v28  ;;  %v811_v17 = vmul.f32 %v3720_v6, %v4241_v61  ;;  %v4263_v1 = vmul.f32 0.03125, %v691_v48 }
 0x36b   : > { %734 = vrot.lane.b32.xlu0 %v726_v15, %s3455_s22  ;;  %732 = vrot.lane.b32.xlu1 %v725_v7, %s3455_s22  ;;  %v853_v13 = vmul.f32 %v3728_v10, %v4241_v61  ;;  %v854_v5 = vmul.f32 %v3728_v10, %v4243_v28  ;;  %v712_v34 = vmul.f32 %v4265_v41, %v4243_v28  ;;  %v4313_v11 = vstv %s3095_s23  ;;  %s3162_s23 = sld [smem:[#allocation6 + $0x37]] }
 0x36c   : > { %v4267_v63 = vmul.f32 0.03125, %v682_v62  ;;  %v719_v6 = vmul.f32 %v4273_v26, %v4263_v1  ;;  %v896_v35 = vmul.f32 %v3736_v14, %v4241_v61  ;;  %v897_v10 = vmul.f32 %v3736_v14, %v4243_v28 }
 0x36d   : > { %v711_v56 = vmul.f32 %v4265_v41, %v4241_v61  ;;  %v939_v14 = vmul.f32 %v3744_v18, %v4241_v61  ;;  %v940_v19 = vmul.f32 %v3744_v18, %v4243_v28  ;;  %v1031_v31 = vmul.f32 %v4291_v22, %v4241_v61 }
 0x36e   : > { %v718_v60 = vmul.f32 %v4273_v26, %v4267_v63  ;;  %v4289_v12 = vadd.f32 %v719_v6, %v712_v34  ;;  %v1032_v15 = vmul.f32 %v4291_v22, %v4243_v28  ;;  %v1038_v7 = vmul.f32 %v4297_v38, %v4267_v63 }
 0x36f   : > { %777 = vrot.lane.b32.xlu0 %v769_v43, %s3456_s7  ;;  %775 = vrot.lane.b32.xlu1 %v768_v0, %s3456_s7  ;;  %v1039_v3 = vmul.f32 %v4297_v38, %v4263_v1  ;;  %v4315_v43 = vstv %s3102_s6  ;;  %v1045_v48 = vmul.f32 %v3754_v23, %v4241_v61  ;;  %v1046_v62 = vmul.f32 %v3754_v23, %v4243_v28  ;;  %s3113_s6 = sld [smem:[#allocation6 + $0x18]] }
 0x370   : > { %v4295_v4 = vadd.f32 %v718_v60, %v711_v56  ;;  %v4317_v18 = vadd.f32 %v1038_v7, %v1031_v31  ;;  %v4337_v23 = vstv %s3110_s21  ;;  %v4339_v34 = vstv %s3117_s10  ;;  %s3120_s21 = sld [smem:[#allocation6 + $0x49]]  ;;  %s3467_s10 = smov 45  }
 0x371   : > { %v4319_v0 = vadd.f32 %v1039_v3, %v1032_v15  ;;  %v1663_v56 = vmul.f32 %v4337_v23, %v4241_v61  ;;  %v4357_v31 = vstv %s3125_s16  ;;  %v1129_v15 = vmul.f32 %v3770_v32, %v4241_v61 }
 0x372   : > { %5960 = vst [vmem:[#allocation148_spill] sm:$0xff] %v4357_v31  ;;  %v1130_v7 = vmul.f32 %v3770_v32, %v4243_v28  ;;  %v1968_v32 = vmul.f32 %v4357_v31, %v4241_v61 }
 0x373   : > { %820 = vrot.lane.b32.xlu0 %v812_v52, %s5851_s12  ;;  %818 = vrot.lane.b32.xlu1 %v811_v17, %s5851_s12  ;;  %v1348_v52 = vmul.f32 %v4313_v11, %v4243_v28  ;;  %v1355_v17 = vmul.f32 %v4315_v43, %v4263_v1 }
 0x375   : > { %v4335_v6 = vadd.f32 %v1355_v17, %v1348_v52  ;;  %v4371_v52 = vstv %s3140_s25  ;;  %v1969_v17 = vmul.f32 %v4357_v31, %v4243_v28  ;;  %s6212_s25 = sshll.u32 %s3654_s24, 6 }
 0x376   : > { %5964 = vst [vmem:[#allocation152_spill] sm:$0xff] %v4371_v52 }
 0x377   : > { %859 = vrot.lane.b32.xlu0 %v853_v13, %s5857_s0  ;;  %861 = vrot.lane.b32.xlu1 %v854_v5, %s5857_s0  ;;  %v1347_v13 = vmul.f32 %v4313_v11, %v4241_v61  ;;  %v1354_v5 = vmul.f32 %v4315_v43, %v4267_v63 }
 0x379   : > { %v4345_v60 = vadd.f32 %v1354_v5, %v1347_v13 }
 0x37b   : > { %902 = vrot.lane.b32.xlu0 %v896_v35, %s5842_s26  ;;  %904 = vrot.lane.b32.xlu1 %v897_v10, %s5842_s26  ;;  %v1087_v35 = vmul.f32 %v3762_v27, %v4241_v61  ;;  %v1088_v10 = vmul.f32 %v3762_v27, %v4243_v28  ;;  %v1671_v27 = vmul.f32 %v4339_v34, %v4263_v1 }
 0x37f   : > { %945 = vrot.lane.b32.xlu0 %v939_v14, %s5836_s13  ;;  %947 = vrot.lane.b32.xlu1 %v940_v19, %s5836_s13  ;;  %v1664_v14 = vmul.f32 %v4337_v23, %v4243_v28  ;;  %v1670_v19 = vmul.f32 %v4339_v34, %v4267_v63 }
 0x381   : > { %v4363_v3 = vadd.f32 %v1670_v19, %v1663_v56  ;;  %v4385_v56 = vstv %s3147_s19  ;;  %s350_s19 = scalar_lea.vmem [#allocation9], %s6212_s25 }
 0x382   : > { %5965 = vst [vmem:[#allocation153_spill] sm:$0xff] %v4385_v56 }
 0x383   : > { %1052 = vrot.lane.b32.xlu0 %v1045_v48, %s3455_s22  ;;  %1054 = vrot.lane.b32.xlu1 %v1046_v62, %s3455_s22  ;;  %5961 = vst [vmem:[#allocation149_spill] sm:$0xff] %v4363_v3  ;;  %v4365_v48 = vstv %s3132_s15  ;;  %v4367_v62 = vadd.f32 %v1671_v27, %v1664_v14  ;;  %v4391_v27 = vstv %s3155_s20  ;;  %s3178_s15 = sshll.u32 %s3537_s9, 10  ;;  %s2953_s20 = sshll.u32 %s350_s19, 4  ;;  %s5577_s20 = int_to_ptr.vmem [resolvable:$true] %s2953_s20 }
 0x384   : > { %5962 = vst [vmem:[#allocation150_spill] sm:$0xff] %v4365_v48  ;;  %v1976_v13 = vmul.f32 %v4365_v48, %v4263_v1  ;;  %v1975_v5 = vmul.f32 %v4365_v48, %v4267_v63  ;;  %5968 = vst [vmem:[#allocation156_spill] sm:$0xff] %v4391_v27  ;;  %s5575_s9 = scalar_lea.hbm %s5633_s8, %s3178_s15 }
 0x385   : > { %5963 = vst [vmem:[#allocation151_spill] sm:$0xff] %v4367_v62 }
 0x386   : > { %v4387_v14 = vadd.f32 %v1976_v13, %v1969_v17  ;;  %v4389_v19 = vadd.f32 %v1975_v5, %v1968_v32  ;;  %v2291_v17 = vmul.f32 %v4385_v56, %v4267_v63  ;;  %v2292_v13 = vmul.f32 %v4385_v56, %v4263_v1 }
 0x387   : > { %1094 = vrot.lane.b32.xlu0 %v1087_v35, %s3456_s7  ;;  %1096 = vrot.lane.b32.xlu1 %v1088_v10, %s3456_s7  ;;  %v1171_v35 = vmul.f32 %v3778_v36, %v4243_v28  ;;  %v1170_v10 = vmul.f32 %v3778_v36, %v4241_v61  ;;  %v2285_v36 = vmul.f32 %v4371_v52, %v4243_v28 }
 0x388   : > { %5966 = vst [vmem:[#allocation154_spill] sm:$0xff] %v4387_v14  ;;  %5967 = vst [vmem:[#allocation155_spill] sm:$0xff] %v4389_v19  ;;  %v1213_v32 = vmul.f32 %v3786_v40, %v4243_v28  ;;  %v1212_v5 = vmul.f32 %v3786_v40, %v4241_v61 }
 0x389   : > { %v4415_v19 = vadd.f32 %v2292_v13, %v2285_v36  ;;  %v1254_v36 = vmul.f32 %v3794_v44, %v4241_v61  ;;  %v1361_v13 = vmul.f32 %v3800_v47, %v4241_v61 }
 0x38b   : > { %1136 = vrot.lane.b32.xlu0 %v1129_v15, %s5851_s12  ;;  %1138 = vrot.lane.b32.xlu1 %v1130_v7, %s5851_s12  ;;  %v2284_v15 = vmul.f32 %v4371_v52, %v4241_v61  ;;  %v4397_v7 = vstv %s3162_s23  ;;  %5971 = vst [vmem:[#allocation159_spill] sm:$0xff] %v4415_v19 }
 0x38c   : > { %5969 = vst [vmem:[#allocation157_spill] sm:$0xff] %v4397_v7  ;;  %v2607_v14 = vmul.f32 %v4397_v7, %v4267_v63  ;;  %v2608_v56 = vmul.f32 %v4397_v7, %v4263_v1 }
 0x38d   : > { %v4413_v39 = vadd.f32 %v2291_v17, %v2284_v15  ;;  %v1255_v15 = vmul.f32 %v3794_v44, %v4243_v28  ;;  %v1362_v17 = vmul.f32 %v3800_v47, %v4243_v28  ;;  %v1403_v44 = vmul.f32 %v3808_v51, %v4241_v61 }
 0x38e   : > { %v1445_v47 = vmul.f32 %v3816_v55, %v4241_v61 }
 0x38f   : > { %1178 = vrot.lane.b32.xlu0 %v1171_v35, %s5857_s0  ;;  %1176 = vrot.lane.b32.xlu1 %v1170_v10, %s5857_s0  ;;  %v2600_v35 = vmul.f32 %v4391_v27, %v4241_v61  ;;  %v2601_v10 = vmul.f32 %v4391_v27, %v4243_v28  ;;  %5970 = vst [vmem:[#allocation158_spill] sm:$0xff] %v4413_v39 }
 0x391   : > { %v4423_v40 = vadd.f32 %v2607_v14, %v2600_v35  ;;  %v4425_v52 = vadd.f32 %v2608_v56, %v2601_v10  ;;  %v1404_v56 = vmul.f32 %v3808_v51, %v4243_v28  ;;  %v1446_v14 = vmul.f32 %v3816_v55, %v4243_v28 }
 0x392   : > { %v1487_v51 = vmul.f32 %v3824_v59, %v4243_v28  ;;  %v1529_v55 = vmul.f32 %v3832_v2, %v4243_v28  ;;  %v1570_v35 = vmul.f32 %v3840_v9, %v4241_v61  ;;  %v1677_v10 = vmul.f32 %v3850_v20, %v4241_v61 }
 0x393   : > { %1220 = vrot.lane.b32.xlu0 %v1213_v32, %s5842_s26  ;;  %1218 = vrot.lane.b32.xlu1 %v1212_v5, %s5842_s26  ;;  %5972 = vst [vmem:[#allocation160_spill] sm:$0xff] %v4423_v40  ;;  %5973 = vst [vmem:[#allocation161_spill] sm:$0xff] %v4425_v52  ;;  %v1486_v32 = vmul.f32 %v3824_v59, %v4241_v61  ;;  %v1528_v5 = vmul.f32 %v3832_v2, %v4241_v61 }
 0x394   : > { %v1571_v59 = vmul.f32 %v3840_v9, %v4243_v28  ;;  %v1678_v2 = vmul.f32 %v3850_v20, %v4243_v28  ;;  %v1720_v9 = vmul.f32 %v3858_v29, %v4243_v28  ;;  %v1793_v20 = vmul.f32 %v3866_v37, %v4243_v28 }
 0x397   : > { %1262 = vrot.lane.b32.xlu0 %v1255_v15, %s5836_s13  ;;  %1260 = vrot.lane.b32.xlu1 %v1254_v36, %s5836_s13  ;;  %v1719_v15 = vmul.f32 %v3858_v29, %v4241_v61  ;;  %v1759_v36 = vstv %s3113_s6  ;;  %v1835_v29 = vmul.f32 %v3874_v45, %v4243_v28 }
 0x39b   : > { %1370 = vrot.lane.b32.xlu0 %v1362_v17, %s3455_s22  ;;  %1368 = vrot.lane.b32.xlu1 %v1361_v13, %s3455_s22  ;;  %v1761_v17 = vmul.f32 %v1759_v36, %v4243_v28  ;;  %v1760_v13 = vmul.f32 %v1759_v36, %v4241_v61 }
 0x39f   : > { %1412 = vrot.lane.b32.xlu0 %v1404_v56, %s3456_s7  ;;  %1410 = vrot.lane.b32.xlu1 %v1403_v44, %s3456_s7  ;;  %v1792_v56 = vmul.f32 %v3866_v37, %v4241_v61  ;;  %v1834_v44 = vmul.f32 %v3874_v45, %v4241_v61  ;;  %v1876_v37 = vmul.f32 %v3882_v53, %v4241_v61 }
 0x3a0   : > { %v1982_v45 = vmul.f32 %v3888_v58, %v4241_v61 }
 0x3a3   : > { %1454 = vrot.lane.b32.xlu0 %v1446_v14, %s5851_s12  ;;  %1452 = vrot.lane.b32.xlu1 %v1445_v47, %s5851_s12  ;;  %v1877_v14 = vmul.f32 %v3882_v53, %v4243_v28  ;;  %v1983_v47 = vmul.f32 %v3888_v58, %v4243_v28  ;;  %v2024_v53 = vmul.f32 %v3896_v8, %v4241_v61 }
 0x3a4   : > { %v2066_v58 = vmul.f32 %v3904_v24, %v4243_v28 }
 0x3a7   : > { %1492 = vrot.lane.b32.xlu0 %v1486_v32, %s5857_s0  ;;  %1494 = vrot.lane.b32.xlu1 %v1487_v51, %s5857_s0  ;;  %v2025_v32 = vmul.f32 %v3896_v8, %v4243_v28  ;;  %v2065_v51 = vmul.f32 %v3904_v24, %v4241_v61  ;;  %v2299_v8 = vmul.f32 %v3906_v30, %v4243_v28 }
 0x3a8   : > { %v2615_v24 = vmul.f32 %v3914_v46, %v4243_v28 }
 0x3ab   : > { %1534 = vrot.lane.b32.xlu0 %v1528_v5, %s5842_s26  ;;  %1536 = vrot.lane.b32.xlu1 %v1529_v55, %s5842_s26  ;;  %v2298_v5 = vmul.f32 %v3906_v30, %v4241_v61  ;;  %v2614_v55 = vmul.f32 %v3914_v46, %v4241_v61  ;;  %v2341_v30 = vmul.f32 %v3920_v57, %v4243_v28 }
 0x3af   : > { %1576 = vrot.lane.b32.xlu0 %v1570_v35, %s5836_s13  ;;  %1578 = vrot.lane.b32.xlu1 %v1571_v59, %s5836_s13 }
 0x3b3   : > { %1684 = vrot.lane.b32.xlu0 %v1677_v10, %s3455_s22  ;;  %1686 = vrot.lane.b32.xlu1 %v1678_v2, %s3455_s22  ;;  %v2340_v10 = vmul.f32 %v3920_v57, %v4241_v61 }
 0x3b7   : > { %1726 = vrot.lane.b32.xlu0 %v1719_v15, %s3456_s7  ;;  %1728 = vrot.lane.b32.xlu1 %v1720_v9, %s3456_s7  ;;  %v2656_v15 = vmul.f32 %v3930_v33, %v4241_v61  ;;  %v2657_v9 = vmul.f32 %v3930_v33, %v4243_v28 }
 0x3bb   : > { %1766 = vrot.lane.b32.xlu0 %v1761_v17, %s5851_s12  ;;  %1764 = vrot.lane.b32.xlu1 %v1760_v13, %s5851_s12  ;;  %v2381_v17 = vmul.f32 %v3947_v50, %v4241_v61  ;;  %v2382_v13 = vmul.f32 %v3947_v50, %v4243_v28 }
 0x3bf   : > { %1800 = vrot.lane.b32.xlu0 %v1793_v20, %s5857_s0  ;;  %1798 = vrot.lane.b32.xlu1 %v1792_v56, %s5857_s0  ;;  %v2107_v56 = vmul.f32 %v3949_v42, %v4241_v61 }
 0x3c3   : > { %1842 = vrot.lane.b32.xlu0 %v1835_v29, %s5842_s26  ;;  %1840 = vrot.lane.b32.xlu1 %v1834_v44, %s5842_s26  ;;  %v2108_v29 = vmul.f32 %v3949_v42, %v4243_v28 }
 0x3c7   : > { %1884 = vrot.lane.b32.xlu0 %v1877_v14, %s5836_s13  ;;  %1882 = vrot.lane.b32.xlu1 %v1876_v37, %s5836_s13  ;;  %v2698_v14 = vmul.f32 %v3957_v49, %v4243_v28  ;;  %v2697_v37 = vmul.f32 %v3957_v49, %v4241_v61 }
 0x3cb   : > { %1991 = vrot.lane.b32.xlu0 %v1983_v47, %s3455_s22  ;;  %1989 = vrot.lane.b32.xlu1 %v1982_v45, %s3455_s22  ;;  %v2424_v45 = vmul.f32 %v3969_v25, %v4243_v28 }
 0x3cf   : > { %2033 = vrot.lane.b32.xlu0 %v2025_v32, %s3456_s7  ;;  %2031 = vrot.lane.b32.xlu1 %v2024_v53, %s3456_s7  ;;  %v2423_v32 = vmul.f32 %v3969_v25, %v4241_v61 }
 0x3d3   : > { %2071 = vrot.lane.b32.xlu0 %v2065_v51, %s5851_s12  ;;  %2073 = vrot.lane.b32.xlu1 %v2066_v58, %s5851_s12  ;;  %v2150_v51 = vmul.f32 %v3977_v54, %v4243_v28  ;;  %v2149_v58 = vmul.f32 %v3977_v54, %v4241_v61 }
 0x3d7   : > { %2305 = vrot.lane.b32.xlu0 %v2298_v5, %s3455_s22  ;;  %2307 = vrot.lane.b32.xlu1 %v2299_v8, %s3455_s22  ;;  %v2740_v8 = vmul.f32 %v3985_v16, %v4243_v28 }
 0x3db   : > { %2621 = vrot.lane.b32.xlu0 %v2614_v55, %s3455_s22  ;;  %2623 = vrot.lane.b32.xlu1 %v2615_v24, %s3455_s22  ;;  %v2739_v55 = vmul.f32 %v3985_v16, %v4241_v61 }
 0x3dd   : > { %v4533_v35 = vpop.permute.xlu0 %734  ;;  %v4535_v59 = vpop.permute.xlu1 %732 }
 0x3df   : > { %2349 = vrot.lane.b32.xlu0 %v2341_v30, %s3456_s7  ;;  %2347 = vrot.lane.b32.xlu1 %v2340_v10, %s3456_s7  ;;  %v2466_v30 = vmul.f32 %v3993_v21, %v4243_v28  ;;  %v2465_v10 = vmul.f32 %v3993_v21, %v4241_v61 }
 0x3e1   : > { %v4543_v2 = vpop.permute.xlu0 %777  ;;  %v4545_v46 = vpop.permute.xlu1 %775 }
 0x3e3   : > { %2663 = vrot.lane.b32.xlu0 %v2656_v15, %s3456_s7  ;;  %2665 = vrot.lane.b32.xlu1 %v2657_v9, %s3456_s7  ;;  %v5974_v9 = vld [vmem:[#allocation51_spill] sm:$0xff] }
 0x3e5   : > { %v4553_v36 = vpop.permute.xlu0 %820  ;;  %v4555_v57 = vpop.permute.xlu1 %818 }
 0x3e7   : > { %2387 = vrot.lane.b32.xlu0 %v2381_v17, %s5851_s12  ;;  %2389 = vrot.lane.b32.xlu1 %v2382_v13, %s5851_s12  ;;  %v2192_v17 = vmul.f32 %v5974_v9, %v4243_v28  ;;  %v2191_v13 = vmul.f32 %v5974_v9, %v4241_v61 }
 0x3e9   : > { %v4563_v20 = vpop.permute.xlu0 %859  ;;  %v4565_v33 = vpop.permute.xlu1 %861 }
 0x3eb   : > { %2113 = vrot.lane.b32.xlu0 %v2107_v56, %s5857_s0  ;;  %2115 = vrot.lane.b32.xlu1 %v2108_v29, %s5857_s0  ;;  %v5975_v29 = vld [vmem:[#allocation53_spill] sm:$0xff] }
 0x3ed   : > { %v4573_v44 = vpop.permute.xlu0 %902  ;;  %v4575_v50 = vpop.permute.xlu1 %904 }
 0x3ef   : > { %2705 = vrot.lane.b32.xlu0 %v2698_v14, %s5851_s12  ;;  %2703 = vrot.lane.b32.xlu1 %v2697_v37, %s5851_s12  ;;  %v2782_v14 = vmul.f32 %v5975_v29, %v4243_v28  ;;  %v2781_v37 = vmul.f32 %v5975_v29, %v4241_v61 }
 0x3f1   : > { %v4583_v47 = vpop.permute.xlu0 %945  ;;  %v4585_v42 = vpop.permute.xlu1 %947 }
 0x3f3   : > { %2431 = vrot.lane.b32.xlu0 %v2424_v45, %s5857_s0  ;;  %2429 = vrot.lane.b32.xlu1 %v2423_v32, %s5857_s0 }
 0x3f5   : > { %v4593_v53 = vpop.permute.xlu0 %1052  ;;  %v4595_v49 = vpop.permute.xlu1 %1054 }
 0x3f7   : > { %2157 = vrot.lane.b32.xlu0 %v2150_v51, %s5842_s26  ;;  %2155 = vrot.lane.b32.xlu1 %v2149_v58, %s5842_s26  ;;  %v5976_v51 = vld [vmem:[#allocation55_spill] sm:$0xff] }
 0x3f8   : > { %v2508_v58 = vmul.f32 %v5976_v51, %v4243_v28 }
 0x3f9   : > { %v4603_v5 = vpop.permute.xlu0 %1094  ;;  %v4605_v25 = vpop.permute.xlu1 %1096 }
 0x3fb   : > { %2747 = vrot.lane.b32.xlu0 %v2740_v8, %s5857_s0  ;;  %2745 = vrot.lane.b32.xlu1 %v2739_v55, %s5857_s0  ;;  %v2507_v8 = vmul.f32 %v5976_v51, %v4241_v61 }
 0x3fd   : > { %v4613_v24 = vpop.permute.xlu0 %1136  ;;  %v4615_v54 = vpop.permute.xlu1 %1138 }
 0x3ff   : > { %2473 = vrot.lane.b32.xlu0 %v2466_v30, %s5842_s26  ;;  %2471 = vrot.lane.b32.xlu1 %v2465_v10, %s5842_s26  ;;  %v5977_v10 = vld [vmem:[#allocation58_spill] sm:$0xff] }
 0x400   : > { %v2824_v9 = vmul.f32 %v5977_v10, %v4243_v28 }
 0x401   : > { %v4623_v15 = vpop.permute.xlu0 %1178  ;;  %v4625_v16 = vpop.permute.xlu1 %1176 }
 0x403   : > { %2199 = vrot.lane.b32.xlu0 %v2192_v17, %s5836_s13  ;;  %2197 = vrot.lane.b32.xlu1 %v2191_v13, %s5836_s13  ;;  %v2823_v17 = vmul.f32 %v5977_v10, %v4241_v61 }
 0x405   : > { %v4633_v56 = vpop.permute.xlu0 %1220  ;;  %v4635_v21 = vpop.permute.xlu1 %1218 }
 0x407   : > { %2789 = vrot.lane.b32.xlu0 %v2782_v14, %s5842_s26  ;;  %2787 = vrot.lane.b32.xlu1 %v2781_v37, %s5842_s26  ;;  %v5978_v14 = vld [vmem:[#allocation15_spill] sm:$0xff] }
 0x408   : > { %v747_v37 = vmul.f32 %v5978_v14, %v4267_v63  ;;  %v748_v51 = vmul.f32 %v5978_v14, %v4263_v1  ;;  %v5980_v14 = vld [vmem:[#allocation17_spill] sm:$0xff] }
 0x409   : > { %v4643_v45 = vpop.permute.xlu0 %1262  ;;  %v4645_v32 = vpop.permute.xlu1 %1260 }
 0x40b   : > { %2515 = vrot.lane.b32.xlu0 %v2508_v58, %s5836_s13  ;;  %2513 = vrot.lane.b32.xlu1 %v2507_v8, %s5836_s13  ;;  %v5979_v58 = vld [vmem:[#allocation16_spill] sm:$0xff] }
 0x40c   : > { %v790_v8 = vmul.f32 %v5979_v58, %v4267_v63  ;;  %v791_v10 = vmul.f32 %v5979_v58, %v4263_v1 }
 0x40d   : > { %v4653_v55 = vpop.permute.xlu0 %1370  ;;  %v4655_v30 = vpop.permute.xlu1 %1368 }
 0x40f   : > { %2831 = vrot.lane.b32.xlu0 %v2824_v9, %s5836_s13  ;;  %2829 = vrot.lane.b32.xlu1 %v2823_v17, %s5836_s13 }
 0x411   : > { %v4663_v13 = vpop.permute.xlu0 %1412  ;;  %v4665_v29 = vpop.permute.xlu1 %1410 }
 0x413   : > { %754 = vrot.lane.b32.xlu0 %v747_v37, %s3455_s22  ;;  %756 = vrot.lane.b32.xlu1 %v748_v51, %s3455_s22  ;;  %v833_v37 = vmul.f32 %v5980_v14, %v4267_v63  ;;  %v834_v51 = vmul.f32 %v5980_v14, %v4263_v1 }
 0x415   : > { %v4673_v28 = vpop.permute.xlu0 %1454  ;;  %v4675_v61 = vpop.permute.xlu1 %1452 }
 0x417   : > { %797 = vrot.lane.b32.xlu0 %v790_v8, %s3456_s7  ;;  %799 = vrot.lane.b32.xlu1 %v791_v10, %s3456_s7  ;;  %v5981_v8 = vld [vmem:[#allocation18_spill] sm:$0xff] }
 0x418   : > { %v876_v10 = vmul.f32 %v5981_v8, %v4263_v1  ;;  %v875_v52 = vmul.f32 %v5981_v8, %v4267_v63 }
 0x419   : > { %v4683_v9 = vpop.permute.xlu0 %1492  ;;  %v4685_v17 = vpop.permute.xlu1 %1494 }
 0x41b   : > { %840 = vrot.lane.b32.xlu0 %v833_v37, %s5851_s12  ;;  %842 = vrot.lane.b32.xlu1 %v834_v51, %s5851_s12  ;;  %v5983_v37 = vld [vmem:[#allocation19_spill] sm:$0xff] }
 0x41c   : > { %v919_v51 = vmul.f32 %v5983_v37, %v4263_v1  ;;  %v918_v19 = vmul.f32 %v5983_v37, %v4267_v63 }
 0x41d   : > { %v4693_v40 = vpop.permute.xlu0 %1534  ;;  %v4695_v58 = vpop.permute.xlu1 %1536 }
 0x41f   : > { %883 = vrot.lane.b32.xlu0 %v876_v10, %s5857_s0  ;;  %881 = vrot.lane.b32.xlu1 %v875_v52, %s5857_s0  ;;  %v5986_v52 = vld [vmem:[#allocation20_spill] sm:$0xff] }
 0x420   : > { %v961_v10 = vmul.f32 %v5986_v52, %v4263_v1  ;;  %v960_v27 = vmul.f32 %v5986_v52, %v4267_v63 }
 0x421   : > { %v4703_v39 = vpop.permute.xlu0 %1576  ;;  %v4705_v14 = vpop.permute.xlu1 %1578 }
 0x422   : > { %5982 = vst [vmem:[#allocation51_spill] sm:$0xff] %v4703_v39 }
 0x423   : > { %926 = vrot.lane.b32.xlu0 %v919_v51, %s5842_s26  ;;  %924 = vrot.lane.b32.xlu1 %v918_v19, %s5842_s26  ;;  %v5989_v19 = vld [vmem:[#allocation21_spill] sm:$0xff] }
 0x424   : > { %v1067_v51 = vmul.f32 %v5989_v19, %v4263_v1  ;;  %v1066_v31 = vmul.f32 %v5989_v19, %v4267_v63 }
 0x425   : > { %v4713_v7 = vpop.permute.xlu0 %1684  ;;  %v4715_v8 = vpop.permute.xlu1 %1686 }
 0x426   : > { %5984 = vst [vmem:[#allocation53_spill] sm:$0xff] %v4713_v7  ;;  %5985 = vst [vmem:[#allocation55_spill] sm:$0xff] %v4715_v8 }
 0x427   : > { %968 = vrot.lane.b32.xlu0 %v961_v10, %s5836_s13  ;;  %966 = vrot.lane.b32.xlu1 %v960_v27, %s5836_s13  ;;  %v5992_v27 = vld [vmem:[#allocation22_spill] sm:$0xff] }
 0x428   : > { %v1109_v10 = vmul.f32 %v5992_v27, %v4263_v1 }
 0x429   : > { %v4723_v48 = vpop.permute.xlu0 %1726  ;;  %v4725_v37 = vpop.permute.xlu1 %1728 }
 0x42a   : > { %5987 = vst [vmem:[#allocation58_spill] sm:$0xff] %v4723_v48  ;;  %5988 = vst [vmem:[#allocation15_spill] sm:$0xff] %v4725_v37  ;;  %v1108_v37 = vmul.f32 %v5992_v27, %v4267_v63 }
 0x42b   : > { %1075 = vrot.lane.b32.xlu0 %v1067_v51, %s3455_s22  ;;  %1073 = vrot.lane.b32.xlu1 %v1066_v31, %s3455_s22  ;;  %v5995_v31 = vld [vmem:[#allocation23_spill] sm:$0xff] }
 0x42c   : > { %v1151_v51 = vmul.f32 %v5995_v31, %v4263_v1 }
 0x42d   : > { %v4733_v3 = vpop.permute.xlu0 %1766  ;;  %v4735_v52 = vpop.permute.xlu1 %1764 }
 0x42e   : > { %5990 = vst [vmem:[#allocation16_spill] sm:$0xff] %v4733_v3  ;;  %5991 = vst [vmem:[#allocation17_spill] sm:$0xff] %v4735_v52  ;;  %v1150_v52 = vmul.f32 %v5995_v31, %v4267_v63 }
 0x42f   : > { %1117 = vrot.lane.b32.xlu0 %v1109_v10, %s3456_s7  ;;  %1115 = vrot.lane.b32.xlu1 %v1108_v37, %s3456_s7  ;;  %v5998_v37 = vld [vmem:[#allocation24_spill] sm:$0xff] }
 0x430   : > { %v1191_v10 = vmul.f32 %v5998_v37, %v4267_v63 }
 0x431   : > { %v4743_v48 = vpop.permute.xlu0 %1800  ;;  %v4745_v19 = vpop.permute.xlu1 %1798 }
 0x432   : > { %5993 = vst [vmem:[#allocation18_spill] sm:$0xff] %v4743_v48  ;;  %5994 = vst [vmem:[#allocation19_spill] sm:$0xff] %v4745_v19  ;;  %v1192_v19 = vmul.f32 %v5998_v37, %v4263_v1 }
 0x433   : > { %1159 = vrot.lane.b32.xlu0 %v1151_v51, %s5851_s12  ;;  %1157 = vrot.lane.b32.xlu1 %v1150_v52, %s5851_s12  ;;  %v6001_v52 = vld [vmem:[#allocation25_spill] sm:$0xff] }
 0x434   : > { %v1233_v51 = vmul.f32 %v6001_v52, %v4267_v63 }
 0x435   : > { %v4753_v3 = vpop.permute.xlu0 %1842  ;;  %v4755_v27 = vpop.permute.xlu1 %1840 }
 0x436   : > { %5996 = vst [vmem:[#allocation20_spill] sm:$0xff] %v4753_v3  ;;  %5997 = vst [vmem:[#allocation21_spill] sm:$0xff] %v4755_v27  ;;  %v1234_v27 = vmul.f32 %v6001_v52, %v4263_v1 }
 0x437   : > { %1197 = vrot.lane.b32.xlu0 %v1191_v10, %s5857_s0  ;;  %1199 = vrot.lane.b32.xlu1 %v1192_v19, %s5857_s0  ;;  %v6004_v19 = vld [vmem:[#allocation26_spill] sm:$0xff] }
 0x438   : > { %v1275_v10 = vmul.f32 %v6004_v19, %v4267_v63 }
 0x439   : > { %v4763_v48 = vpop.permute.xlu0 %1884  ;;  %v4765_v31 = vpop.permute.xlu1 %1882 }
 0x43a   : > { %5999 = vst [vmem:[#allocation22_spill] sm:$0xff] %v4763_v48  ;;  %6000 = vst [vmem:[#allocation23_spill] sm:$0xff] %v4765_v31  ;;  %v1276_v31 = vmul.f32 %v6004_v19, %v4263_v1 }
 0x43b   : > { %1239 = vrot.lane.b32.xlu0 %v1233_v51, %s5842_s26  ;;  %1241 = vrot.lane.b32.xlu1 %v1234_v27, %s5842_s26  ;;  %v6007_v27 = vld [vmem:[#allocation27_spill] sm:$0xff] }
 0x43c   : > { %v1382_v51 = vmul.f32 %v6007_v27, %v4267_v63 }
 0x43d   : > { %v4773_v3 = vpop.permute.xlu0 %1991  ;;  %v4775_v37 = vpop.permute.xlu1 %1989 }
 0x43e   : > { %6002 = vst [vmem:[#allocation24_spill] sm:$0xff] %v4773_v3  ;;  %6003 = vst [vmem:[#allocation25_spill] sm:$0xff] %v4775_v37  ;;  %v1383_v3 = vmul.f32 %v6007_v27, %v4263_v1 }
 0x43f   : > { %1281 = vrot.lane.b32.xlu0 %v1275_v10, %s5836_s13  ;;  %1283 = vrot.lane.b32.xlu1 %v1276_v31, %s5836_s13  ;;  %v6010_v31 = vld [vmem:[#allocation28_spill] sm:$0xff] }
 0x440   : > { %v1424_v10 = vmul.f32 %v6010_v31, %v4267_v63 }
 0x441   : > { %v4783_v48 = vpop.permute.xlu0 %2033  ;;  %v4785_v52 = vpop.permute.xlu1 %2031 }
 0x442   : > { %6005 = vst [vmem:[#allocation26_spill] sm:$0xff] %v4783_v48  ;;  %6006 = vst [vmem:[#allocation162_spill] sm:$0xff] %v4785_v52  ;;  %v1425_v48 = vmul.f32 %v6010_v31, %v4263_v1 }
 0x443   : > { %1389 = vrot.lane.b32.xlu0 %v1382_v51, %s3455_s22  ;;  %1391 = vrot.lane.b32.xlu1 %v1383_v3, %s3455_s22  ;;  %v6013_v3 = vld [vmem:[#allocation29_spill] sm:$0xff] }
 0x444   : > { %v1466_v51 = vmul.f32 %v6013_v3, %v4267_v63 }
 0x445   : > { %v4793_v37 = vpop.permute.xlu0 %2071  ;;  %v4795_v19 = vpop.permute.xlu1 %2073 }
 0x446   : > { %6008 = vst [vmem:[#allocation27_spill] sm:$0xff] %v4793_v37  ;;  %6009 = vst [vmem:[#allocation163_spill] sm:$0xff] %v4795_v19  ;;  %v1467_v37 = vmul.f32 %v6013_v3, %v4263_v1 }
 0x447   : > { %1431 = vrot.lane.b32.xlu0 %v1424_v10, %s3456_s7  ;;  %1433 = vrot.lane.b32.xlu1 %v1425_v48, %s3456_s7  ;;  %v6016_v48 = vld [vmem:[#allocation30_spill] sm:$0xff] }
 0x448   : > { %v1508_v10 = vmul.f32 %v6016_v48, %v4263_v1 }
 0x449   : > { %v4803_v52 = vpop.permute.xlu0 %2305  ;;  %v4805_v27 = vpop.permute.xlu1 %2307 }
 0x44a   : > { %6011 = vst [vmem:[#allocation28_spill] sm:$0xff] %v4803_v52  ;;  %6012 = vst [vmem:[#allocation164_spill] sm:$0xff] %v4805_v27  ;;  %v1507_v27 = vmul.f32 %v6016_v48, %v4267_v63 }
 0x44b   : > { %1473 = vrot.lane.b32.xlu0 %v1466_v51, %s5851_s12  ;;  %1475 = vrot.lane.b32.xlu1 %v1467_v37, %s5851_s12  ;;  %v6019_v37 = vld [vmem:[#allocation31_spill] sm:$0xff] }
 0x44c   : > { %v1550_v51 = vmul.f32 %v6019_v37, %v4263_v1 }
 0x44d   : > { %v4813_v19 = vpop.permute.xlu0 %2621  ;;  %v4815_v31 = vpop.permute.xlu1 %2623 }
 0x44e   : > { %6014 = vst [vmem:[#allocation29_spill] sm:$0xff] %v4813_v19  ;;  %6015 = vst [vmem:[#allocation165_spill] sm:$0xff] %v4815_v31  ;;  %v1549_v31 = vmul.f32 %v6019_v37, %v4267_v63 }
 0x44f   : > { %1515 = vrot.lane.b32.xlu0 %v1508_v10, %s5857_s0  ;;  %1513 = vrot.lane.b32.xlu1 %v1507_v27, %s5857_s0  ;;  %v6022_v27 = vld [vmem:[#allocation32_spill] sm:$0xff] }
 0x450   : > { %v1592_v10 = vmul.f32 %v6022_v27, %v4263_v1 }
 0x451   : > { %v4823_v52 = vpop.permute.xlu0 %2349  ;;  %v4825_v3 = vpop.permute.xlu1 %2347 }
 0x452   : > { %6017 = vst [vmem:[#allocation30_spill] sm:$0xff] %v4823_v52  ;;  %6018 = vst [vmem:[#allocation166_spill] sm:$0xff] %v4825_v3  ;;  %v1591_v52 = vmul.f32 %v6022_v27, %v4267_v63 }
 0x453   : > { %1557 = vrot.lane.b32.xlu0 %v1550_v51, %s5842_s26  ;;  %1555 = vrot.lane.b32.xlu1 %v1549_v31, %s5842_s26  ;;  %v6025_v31 = vld [vmem:[#allocation33_spill] sm:$0xff] }
 0x455   : > { %v4833_v19 = vpop.permute.xlu0 %2663  ;;  %v4835_v48 = vpop.permute.xlu1 %2665 }
 0x456   : > { %6020 = vst [vmem:[#allocation31_spill] sm:$0xff] %v4833_v19  ;;  %6021 = vst [vmem:[#allocation167_spill] sm:$0xff] %v4835_v48  ;;  %v1699_v19 = vmul.f32 %v6025_v31, %v4263_v1  ;;  %v1698_v48 = vmul.f32 %v6025_v31, %v4267_v63 }
 0x457   : > { %1599 = vrot.lane.b32.xlu0 %v1592_v10, %s5836_s13  ;;  %1597 = vrot.lane.b32.xlu1 %v1591_v52, %s5836_s13  ;;  %v6028_v52 = vld [vmem:[#allocation34_spill] sm:$0xff] }
 0x458   : > { %v1741_v10 = vmul.f32 %v6028_v52, %v4263_v1 }
 0x459   : > { %v4843_v37 = vpop.permute.xlu0 %2387  ;;  %v4845_v51 = vpop.permute.xlu1 %2389 }
 0x45a   : > { %6023 = vst [vmem:[#allocation32_spill] sm:$0xff] %v4843_v37  ;;  %6024 = vst [vmem:[#allocation168_spill] sm:$0xff] %v4845_v51  ;;  %v1740_v37 = vmul.f32 %v6028_v52, %v4267_v63  ;;  %v1775_v51 = vstv %s3120_s21  ;;  %s2940_s21 = scalar_lea.sflag [#allocation4], %s3654_s24 }
 0x45b   : > { %1707 = vrot.lane.b32.xlu0 %v1699_v19, %s3455_s22  ;;  %1705 = vrot.lane.b32.xlu1 %v1698_v48, %s3455_s22  ;;  %v1777_v48 = vmul.f32 %v1775_v51, %v4263_v1 }
 0x45d   : > { %v4853_v27 = vpop.permute.xlu0 %2113  ;;  %v4855_v3 = vpop.permute.xlu1 %2115 }
 0x45e   : > { %6026 = vst [vmem:[#allocation33_spill] sm:$0xff] %v4853_v27  ;;  %6027 = vst [vmem:[#allocation169_spill] sm:$0xff] %v4855_v3  ;;  %v1776_v27 = vmul.f32 %v1775_v51, %v4267_v63 }
 0x45f   : > { %1749 = vrot.lane.b32.xlu0 %v1741_v10, %s3456_s7  ;;  %1747 = vrot.lane.b32.xlu1 %v1740_v37, %s3456_s7  ;;  %v6033_v10 = vld [vmem:[#allocation35_spill] sm:$0xff] }
 0x460   : > { %v1813_v62 = vmul.f32 %v6033_v10, %v4267_v63  ;;  %v1814_v37 = vmul.f32 %v6033_v10, %v4263_v1 }
 0x461   : > { %v4863_v31 = vpop.permute.xlu0 %2705  ;;  %v4865_v19 = vpop.permute.xlu1 %2703 }
 0x462   : > { %6029 = vst [vmem:[#allocation34_spill] sm:$0xff] %v4863_v31  ;;  %6030 = vst [vmem:[#allocation170_spill] sm:$0xff] %v4865_v19 }
 0x463   : > { %1782 = vrot.lane.b32.xlu0 %v1777_v48, %s5851_s12  ;;  %1780 = vrot.lane.b32.xlu1 %v1776_v27, %s5851_s12  ;;  %v6036_v27 = vld [vmem:[#allocation36_spill] sm:$0xff] }
 0x464   : > { %v1855_v48 = vmul.f32 %v6036_v27, %v4267_v63 }
 0x465   : > { %v4871_v3 = vpop.permute.xlu0 %2431  ;;  %v4873_v52 = vpop.permute.xlu1 %2429 }
 0x466   : > { %6031 = vst [vmem:[#allocation171_spill] sm:$0xff] %v4871_v3  ;;  %6032 = vst [vmem:[#allocation172_spill] sm:$0xff] %v4873_v52  ;;  %v1856_v52 = vmul.f32 %v6036_v27, %v4263_v1 }
 0x467   : > { %1819 = vrot.lane.b32.xlu0 %v1813_v62, %s5857_s0  ;;  %1821 = vrot.lane.b32.xlu1 %v1814_v37, %s5857_s0  ;;  %v6039_v62 = vld [vmem:[#allocation37_spill] sm:$0xff] }
 0x468   : > { %v1897_v37 = vmul.f32 %v6039_v62, %v4267_v63 }
 0x469   : > { %v4881_v19 = vpop.permute.xlu0 %2157  ;;  %v4883_v51 = vpop.permute.xlu1 %2155 }
 0x46a   : > { %6034 = vst [vmem:[#allocation35_spill] sm:$0xff] %v4881_v19  ;;  %6035 = vst [vmem:[#allocation173_spill] sm:$0xff] %v4883_v51  ;;  %v1898_v51 = vmul.f32 %v6039_v62, %v4263_v1 }
 0x46b   : > { %1861 = vrot.lane.b32.xlu0 %v1855_v48, %s5842_s26  ;;  %1863 = vrot.lane.b32.xlu1 %v1856_v52, %s5842_s26  ;;  %v6042_v52 = vld [vmem:[#allocation38_spill] sm:$0xff] }
 0x46c   : > { %v2003_v48 = vmul.f32 %v6042_v52, %v4267_v63 }
 0x46d   : > { %v4891_v3 = vpop.permute.xlu0 %2747  ;;  %v4893_v10 = vpop.permute.xlu1 %2745 }
 0x46e   : > { %6037 = vst [vmem:[#allocation36_spill] sm:$0xff] %v4891_v3  ;;  %6038 = vst [vmem:[#allocation174_spill] sm:$0xff] %v4893_v10  ;;  %v2004_v10 = vmul.f32 %v6042_v52, %v4263_v1 }
 0x46f   : > { %1903 = vrot.lane.b32.xlu0 %v1897_v37, %s5836_s13  ;;  %1905 = vrot.lane.b32.xlu1 %v1898_v51, %s5836_s13  ;;  %v6045_v51 = vld [vmem:[#allocation39_spill] sm:$0xff] }
 0x470   : > { %v2045_v37 = vmul.f32 %v6045_v51, %v4267_v63 }
 0x471   : > { %v4901_v19 = vpop.permute.xlu0 %2473  ;;  %v4903_v27 = vpop.permute.xlu1 %2471 }
 0x472   : > { %6040 = vst [vmem:[#allocation37_spill] sm:$0xff] %v4901_v19  ;;  %6041 = vst [vmem:[#allocation175_spill] sm:$0xff] %v4903_v27  ;;  %v2046_v27 = vmul.f32 %v6045_v51, %v4263_v1  ;;  %v710_v51 = vmul.f32 0.0, %v4265_v41 }
 0x473   : > { %2010 = vrot.lane.b32.xlu0 %v2003_v48, %s3455_s22  ;;  %2012 = vrot.lane.b32.xlu1 %v2004_v10, %s3455_s22  ;;  %v6048_v10 = vld [vmem:[#allocation40_spill] sm:$0xff] }
 0x474   : > { %v2320_v48 = vmul.f32 %v6048_v10, %v4263_v1 }
 0x475   : > { %v4911_v3 = vpop.permute.xlu0 %2199  ;;  %v4913_v62 = vpop.permute.xlu1 %2197 }
 0x476   : > { %6043 = vst [vmem:[#allocation38_spill] sm:$0xff] %v4911_v3  ;;  %6044 = vst [vmem:[#allocation176_spill] sm:$0xff] %v4913_v62  ;;  %v2319_v62 = vmul.f32 %v6048_v10, %v4267_v63 }
 0x477   : > { %2052 = vrot.lane.b32.xlu0 %v2045_v37, %s3456_s7  ;;  %2054 = vrot.lane.b32.xlu1 %v2046_v27, %s3456_s7  ;;  %v717_v37 = vmul.f32 0.0, %v4273_v26  ;;  %v6054_v26 = vld [vmem:[#allocation42_spill] sm:$0xff] }
 0x479   : > { %v4921_v19 = vpop.permute.xlu0 %2789  ;;  %v4923_v52 = vpop.permute.xlu1 %2787 }
 0x47a   : > { %6046 = vst [vmem:[#allocation39_spill] sm:$0xff] %v4921_v19  ;;  %6047 = vst [vmem:[#allocation177_spill] sm:$0xff] %v4923_v52  ;;  %v6051_v52 = vld [vmem:[#allocation41_spill] sm:$0xff] }
 0x47b   : > { %2328 = vrot.lane.b32.xlu0 %v2320_v48, %s3455_s22  ;;  %2326 = vrot.lane.b32.xlu1 %v2319_v62, %s3455_s22  ;;  %v2635_v19 = vmul.f32 %v6051_v52, %v4267_v63  ;;  %v2636_v31 = vmul.f32 %v6051_v52, %v4263_v1  ;;  %v720_v62 = vadd.f32 %v717_v37, %v710_v51 }
 0x47c   : > { %v2362_v48 = vmul.f32 %v6054_v26, %v4263_v1 }
 0x47d   : > { %v4933_v3 = vpop.permute.xlu0 %2515  ;;  %v4935_v27 = vpop.permute.xlu1 %2513 }
 0x47e   : > { %6049 = vst [vmem:[#allocation40_spill] sm:$0xff] %v4933_v3  ;;  %6050 = vst [vmem:[#allocation178_spill] sm:$0xff] %v4935_v27  ;;  %v2361_v27 = vmul.f32 %v6054_v26, %v4267_v63  ;;  %v6055_v3 = vld [vmem:[#allocation59_spill] sm:$0xff] }
 0x47f   : > { %2642 = vrot.lane.b32.xlu0 %v2635_v19, %s3455_s22  ;;  %2644 = vrot.lane.b32.xlu1 %v2636_v31, %s3455_s22  ;;  %v737_v52 = vsel %vm736_vm8, %v6055_v3, %v4535_v59  ;;  %v738_v19 = vsel %vm736_vm8, %v4535_v59, %v4533_v35  ;;  %v744_v31 = vadd.f32 %v4533_v35, %v4289_v12  ;;  %v6057_v59 = vld [vmem:[#allocation60_spill] sm:$0xff]  ;;  %s5113_s22 = sld [smem:[#allocation6 + $0x61]] }
 0x480   : > { %v742_v51 = vadd.f32 %v737_v52, %v720_v62  ;;  %v743_v37 = vadd.f32 %v738_v19, %v4295_v4  ;;  %v6058_v4 = vld [vmem:[#allocation61_spill] sm:$0xff]  ;;  %v781_v62 = vsel %vm779_vm9, %v4545_v46, %v4543_v2 }
 0x481   : > { %v4943_v10 = vpop.permute.xlu0 %2831  ;;  %v4945_v41 = vpop.permute.xlu1 %2829  ;;  %v780_v35 = vsel %vm779_vm9, %v6058_v4, %v4545_v46 }
 0x482   : > { %6052 = vst [vmem:[#allocation41_spill] sm:$0xff] %v4943_v10  ;;  %6053 = vst [vmem:[#allocation179_spill] sm:$0xff] %v4945_v41  ;;  %v6056_v10 = vld [vmem:[#allocation44_spill] sm:$0xff] }
 0x483   : > { %2370 = vrot.lane.b32.xlu0 %v2362_v48, %s3456_s7  ;;  %2368 = vrot.lane.b32.xlu1 %v2361_v27, %s3456_s7  ;;  %v2086_v3 = vmul.f32 %v6056_v10, %v4267_v63  ;;  %v2087_v8 = vmul.f32 %v6056_v10, %v4263_v1 }
 0x485   : > { %v755_v26 = vpop.permute.xlu0 %754  ;;  %v757_v41 = vpop.permute.xlu1 %756 }
 0x486   : > { %v758_v48 = vsel %vm736_vm8, %v6057_v59, %v755_v26  ;;  %v759_v27 = vsel %vm736_vm8, %v755_v26, %v757_v41  ;;  %v765_v7 = vadd.f32 %v757_v41, %v744_v31  ;;  %v6060_v26 = vld [vmem:[#allocation62_spill] sm:$0xff] }
 0x487   : > { %v763_v39 = vadd.f32 %v758_v48, %v742_v51  ;;  %v764_v12 = vadd.f32 %v759_v27, %v743_v37  ;;  %2092 = vrot.lane.b32.xlu0 %v2086_v3, %s5851_s12  ;;  %2094 = vrot.lane.b32.xlu1 %v2087_v8, %s5851_s12  ;;  %v6059_v51 = vld [vmem:[#allocation43_spill] sm:$0xff] }
 0x488   : > { %v787_v10 = vadd.f32 %v4543_v2, %v765_v7  ;;  %v2678_v37 = vmul.f32 %v6059_v51, %v4263_v1  ;;  %v2677_v8 = vmul.f32 %v6059_v51, %v4267_v63  ;;  %v824_v2 = vsel %vm822_vm10, %v4555_v57, %v4553_v36 }
 0x489   : > { %v798_v52 = vpop.permute.xlu0 %797  ;;  %v785_v19 = vadd.f32 %v780_v35, %v763_v39  ;;  %v800_v41 = vpop.permute.xlu1 %799  ;;  %v786_v31 = vadd.f32 %v781_v62, %v764_v12  ;;  %v6061_v39 = vld [vmem:[#allocation63_spill] sm:$0xff] }
 0x48a   : > { %v801_v3 = vsel %vm779_vm9, %v6060_v26, %v798_v52  ;;  %v802_v59 = vsel %vm779_vm9, %v798_v52, %v800_v41  ;;  %v808_v48 = vadd.f32 %v800_v41, %v787_v10  ;;  %v823_v7 = vsel %vm822_vm10, %v6061_v39, %v4555_v57  ;;  %v6062_v52 = vld [vmem:[#allocation45_spill] sm:$0xff] }
 0x48b   : > { %v806_v46 = vadd.f32 %v801_v3, %v785_v19  ;;  %v807_v27 = vadd.f32 %v802_v59, %v786_v31  ;;  %2686 = vrot.lane.b32.xlu0 %v2678_v37, %s3456_s7  ;;  %2684 = vrot.lane.b32.xlu1 %v2677_v8, %s3456_s7  ;;  %v2403_v19 = vmul.f32 %v6062_v52, %v4263_v1  ;;  %v3461_v31 = vmov 1966171168   ;;  %v6063_v37 = vld [vmem:[#allocation64_spill] sm:$0xff]  ;;  %v6064_v3 = vld [vmem:[#allocation65_spill] sm:$0xff]  ;;  %s3462_s7 = smov 51  }
 0x48c   : > { %v830_v12 = vadd.f32 %v4553_v36, %v808_v48  ;;  %v2402_v41 = vmul.f32 %v6062_v52, %v4267_v63  ;;  %v986_v51 = vunpack.c.l.s4 %v3461_v31  ;;  %v867_v36 = vsel %vm865_vm11, %v4565_v33, %v6064_v3  ;;  %v6066_v52 = vld [vmem:[#allocation66_spill] sm:$0xff]  ;;  %v6068_v3 = vld [vmem:[#allocation47_spill] sm:$0xff] }
 0x48d   : > { %v841_v4 = vpop.permute.xlu0 %840  ;;  %v828_v35 = vadd.f32 %v823_v7, %v806_v46  ;;  %v843_v62 = vpop.permute.xlu1 %842  ;;  %v829_v10 = vadd.f32 %v824_v2, %v807_v27  ;;  %v866_v46 = vsel %vm865_vm11, %v4563_v20, %v4565_v33  ;;  %v1030_v33 = vmul.f32 0.0, %v4291_v22 }
 0x48e   : > { %v844_v8 = vsel %vm822_vm10, %v6063_v37, %v841_v4  ;;  %v845_v57 = vsel %vm822_vm10, %v841_v4, %v843_v62  ;;  %v851_v26 = vadd.f32 %v843_v62, %v830_v12  ;;  %v6065_v4 = vld [vmem:[#allocation46_spill] sm:$0xff]  ;;  %v2718_v22 = vmul.f32 %v6068_v3, %v4267_v63 }
 0x48f   : > { %v849_v59 = vadd.f32 %v844_v8, %v828_v35  ;;  %v850_v48 = vadd.f32 %v845_v57, %v829_v10  ;;  %2410 = vrot.lane.b32.xlu0 %v2403_v19, %s5851_s12  ;;  %2408 = vrot.lane.b32.xlu1 %v2402_v41, %s5851_s12  ;;  %v2128_v62 = vmul.f32 %v6065_v4, %v4267_v63  ;;  %v987_v10 = vunpack.c.0.s8 %v986_v51  ;;  %v6067_v57 = vld [vmem:[#allocation67_spill] sm:$0xff] }
 0x490   : > { %v873_v27 = vadd.f32 %v867_v36, %v851_v26  ;;  %v2129_v35 = vmul.f32 %v6065_v4, %v4263_v1  ;;  %v910_v51 = vsel %vm908_vm12, %v4575_v50, %v6067_v57  ;;  %v1037_v26 = vmul.f32 0.0, %v4297_v38 }
 0x491   : > { %v884_v39 = vpop.permute.xlu0 %883  ;;  %v871_v7 = vadd.f32 %v4563_v20, %v849_v59  ;;  %v882_v2 = vpop.permute.xlu1 %881  ;;  %v872_v12 = vadd.f32 %v866_v46, %v850_v48  ;;  %v909_v20 = vsel %vm908_vm12, %v4573_v44, %v4575_v50 }
 0x492   : > { %v888_v19 = vsel %vm865_vm11, %v884_v39, %v6066_v52  ;;  %v887_v41 = vsel %vm865_vm11, %v882_v2, %v884_v39  ;;  %v2719_v39 = vmul.f32 %v6068_v3, %v4263_v1  ;;  %v6071_v52 = vld [vmem:[#allocation69_spill] sm:$0xff] }
 0x493   : > { %v894_v31 = vadd.f32 %v888_v19, %v873_v27  ;;  %v892_v37 = vadd.f32 %v882_v2, %v871_v7  ;;  %v893_v8 = vadd.f32 %v887_v41, %v872_v12  ;;  %2134 = vrot.lane.b32.xlu0 %v2128_v62, %s5857_s0  ;;  %2136 = vrot.lane.b32.xlu1 %v2129_v35, %s5857_s0  ;;  %v6069_v7 = vld [vmem:[#allocation14_spill] sm:$0xff]  ;;  %v6070_v12 = vld [vmem:[#allocation68_spill] sm:$0xff] }
 0x494   : > { %v5033_v2 = vsub.s32 %v987_v10, %v6069_v7  ;;  %v952_v10 = vsel %vm457_vm5, %v4585_v42, %v6071_v52  ;;  %v1040_v19 = vadd.f32 %v1037_v26, %v1030_v33  ;;  %v6072_v41 = vld [vmem:[#allocation48_spill] sm:$0xff]  ;;  %v6074_v33 = vld [vmem:[#allocation70_spill] sm:$0xff] }
 0x495   : > { %v927_v36 = vpop.permute.xlu0 %926  ;;  %v916_v59 = vadd.f32 %v910_v51, %v894_v31  ;;  %v914_v48 = vadd.f32 %v4573_v44, %v892_v37  ;;  %v925_v46 = vpop.permute.xlu1 %924  ;;  %v915_v27 = vadd.f32 %v909_v20, %v893_v8  ;;  %v951_v44 = vsel %vm457_vm5, %v4583_v47, %v4585_v42 }
 0x496   : > { %v931_v50 = vsel %vm908_vm12, %v927_v36, %v6070_v12  ;;  %v930_v38 = vsel %vm908_vm12, %v925_v46, %v927_v36  ;;  %v2444_v31 = vmul.f32 %v6072_v41, %v4267_v63  ;;  %v2445_v3 = vmul.f32 %v6072_v41, %v4263_v1 }
 0x497   : > { %v937_v4 = vadd.f32 %v931_v50, %v916_v59  ;;  %v935_v62 = vadd.f32 %v925_v46, %v914_v48  ;;  %v936_v35 = vadd.f32 %v930_v38, %v915_v27  ;;  %2724 = vrot.lane.b32.xlu0 %v2718_v22, %s5851_s12  ;;  %2726 = vrot.lane.b32.xlu1 %v2719_v39, %s5851_s12  ;;  %v6073_v22 = vld [vmem:[#allocation72_spill] sm:$0xff]  ;;  %v6075_v39 = vld [vmem:[#allocation49_spill] sm:$0xff]  ;;  %s3464_s12 = smov 49  }
 0x498   : > { %v1056_v36 = vsel %vm736_vm8, %v6073_v22, %v4593_v53  ;;  %v1057_v42 = vsel %vm736_vm8, %v4593_v53, %v4595_v49  ;;  %v1063_v27 = vadd.f32 %v4595_v49, %v4319_v0  ;;  %v2170_v12 = vmul.f32 %v6075_v39, %v4267_v63 }
 0x499   : > { %v969_v37 = vpop.permute.xlu0 %968  ;;  %v958_v8 = vadd.f32 %v952_v10, %v937_v4  ;;  %v956_v20 = vadd.f32 %v4583_v47, %v935_v62  ;;  %v967_v57 = vpop.permute.xlu1 %966  ;;  %v957_v51 = vadd.f32 %v951_v44, %v936_v35  ;;  %v1061_v50 = vadd.f32 %v1056_v36, %v1040_v19  ;;  %v6076_v10 = vld [vmem:[#allocation71_spill] sm:$0xff] }
 0x49a   : > { %v973_v26 = vsel %vm457_vm5, %v969_v37, %v6074_v33  ;;  %v972_v59 = vsel %vm457_vm5, %v967_v57, %v969_v37  ;;  %v1062_v53 = vadd.f32 %v1057_v42, %v4317_v18  ;;  %v2171_v35 = vmul.f32 %v6075_v39, %v4263_v1  ;;  %v6077_v18 = vld [vmem:[#allocation74_spill] sm:$0xff] }
 0x49b   : > { %v979_v48 = vadd.f32 %v973_v26, %v958_v8  ;;  %v977_v47 = vadd.f32 %v967_v57, %v956_v20  ;;  %v978_v46 = vadd.f32 %v972_v59, %v957_v51  ;;  %2450 = vrot.lane.b32.xlu0 %v2444_v31, %s5857_s0  ;;  %2452 = vrot.lane.b32.xlu1 %v2445_v3, %s5857_s0  ;;  %v6078_v57 = vld [vmem:[#allocation50_spill] sm:$0xff] }
 0x49c   : > { %v1098_v37 = vsel %vm779_vm9, %v6077_v18, %v4603_v5  ;;  %v1099_v8 = vsel %vm779_vm9, %v4603_v5, %v4605_v25  ;;  %v2760_v51 = vmul.f32 %v6078_v57, %v4267_v63  ;;  %v2761_v26 = vmul.f32 %v6078_v57, %v4263_v1 }
 0x49d   : > { %v984_v38 = vcombine.low %v977_v47, %v978_v46  ;;  %v1076_v4 = vpop.permute.xlu0 %1075  ;;  %v1074_v62 = vpop.permute.xlu1 %1073  ;;  %v998_v44 = vrot.slane %v979_v48, %v5033_v2  ;;  %v6079_v48 = vld [vmem:[#allocation73_spill] sm:$0xff]  ;;  %v1182_v18 = vsel %vm865_vm11, %v4625_v16, %v4623_v15 }
 0x49e   : > { %v1084_v52 = vadd.f32 %v1076_v4, %v1063_v27  ;;  %v1077_v41 = vsel %vm736_vm8, %v6076_v10, %v1074_v62  ;;  %v1078_v0 = vsel %vm736_vm8, %v1074_v62, %v1076_v4  ;;  %v6080_v27 = vld [vmem:[#allocation76_spill] sm:$0xff] }
 0x49f   : > { %v991_v49 = vrot.slane %v984_v38, %v5033_v2  ;;  %v1082_v31 = vadd.f32 %v1077_v41, %v1061_v50  ;;  %v1083_v19 = vadd.f32 %v1078_v0, %v1062_v53  ;;  %2176 = vrot.lane.b32.xlu0 %v2170_v12, %s5842_s26  ;;  %2178 = vrot.lane.b32.xlu1 %v2171_v35, %s5842_s26  ;;  %v6081_v35 = vld [vmem:[#allocation52_spill] sm:$0xff]  ;;  %v6082_v41 = vld [vmem:[#allocation75_spill] sm:$0xff] }
 0x4a0   : > { %v1105_v20 = vadd.f32 %v4605_v25, %v1084_v52  ;;  %v1140_v39 = vsel %vm822_vm10, %v6080_v27, %v4613_v24  ;;  %v1141_v12 = vsel %vm822_vm10, %v4613_v24, %v4615_v54  ;;  %v2487_v52 = vmul.f32 %v6081_v35, %v4263_v1 }
 0x4a1   : > { %v5085_v3 = vcombine.low %v991_v49, %v998_v44  ;;  %v1118_v22 = vpop.permute.xlu0 %1117  ;;  %v1103_v36 = vadd.f32 %v1098_v37, %v1082_v31  ;;  %v1104_v42 = vadd.f32 %v1099_v8, %v1083_v19  ;;  %v1116_v33 = vpop.permute.xlu1 %1115  ;;  %v2486_v44 = vmul.f32 %v6081_v35, %v4267_v63  ;;  %v6083_v31 = vld [vmem:[#allocation78_spill] sm:$0xff] }
 0x4a2   : > { %v1126_v59 = vadd.f32 %v1118_v22, %v1105_v20  ;;  %v1119_v47 = vsel %vm779_vm9, %v6079_v48, %v1116_v33  ;;  %v1120_v5 = vsel %vm779_vm9, %v1116_v33, %v1118_v22  ;;  %v1183_v24 = vsel %vm865_vm11, %v4623_v15, %v6083_v31  ;;  %v6084_v22 = vld [vmem:[#allocation54_spill] sm:$0xff] }
 0x4a3   : > { %v1124_v46 = vadd.f32 %v1119_v47, %v1103_v36  ;;  %v1125_v25 = vadd.f32 %v1120_v5, %v1104_v42  ;;  %2766 = vrot.lane.b32.xlu0 %v2760_v51, %s5857_s0  ;;  %2768 = vrot.lane.b32.xlu1 %v2761_v26, %s5857_s0  ;;  %v2212_v36 = vmul.f32 %v6084_v22, %v4267_v63  ;;  %v6085_v26 = vld [vmem:[#allocation77_spill] sm:$0xff]  ;;  %v1346_v48 = vmul.f32 0.0, %v4313_v11  ;;  %v6087_v11 = vld [vmem:[#allocation56_spill] sm:$0xff]  ;;  %s3466_s0 = smov 46  }
 0x4a4   : > { %v1147_v50 = vadd.f32 %v4615_v54, %v1126_v59  ;;  %v2213_v42 = vmul.f32 %v6084_v22, %v4263_v1  ;;  %v1353_v27 = vmul.f32 0.0, %v4315_v43 }
 0x4a5   : > { %v1160_v53 = vpop.permute.xlu0 %1159  ;;  %v1145_v38 = vadd.f32 %v1140_v39, %v1124_v46  ;;  %v1146_v4 = vadd.f32 %v1141_v12, %v1125_v25  ;;  %v1158_v62 = vpop.permute.xlu1 %1157  ;;  %v1224_v25 = vsel %vm908_vm12, %v4635_v21, %v4633_v56  ;;  %v2802_v39 = vmul.f32 %v6087_v11, %v4267_v63 }
 0x4a6   : > { %v1168_v10 = vadd.f32 %v1160_v53, %v1147_v50  ;;  %v1161_v0 = vsel %vm822_vm10, %v6082_v41, %v1158_v62  ;;  %v1162_v49 = vsel %vm822_vm10, %v1158_v62, %v1160_v53  ;;  %v2803_v62 = vmul.f32 %v6087_v11, %v4263_v1  ;;  %v6093_v11 = vld [vmem:[#allocation84_spill] sm:$0xff] }
 0x4a7   : > { %v1166_v54 = vadd.f32 %v1161_v0, %v1145_v38  ;;  %v1167_v19 = vadd.f32 %v1162_v49, %v1146_v4  ;;  %2492 = vrot.lane.b32.xlu0 %v2486_v44, %s5842_s26  ;;  %2494 = vrot.lane.b32.xlu1 %v2487_v52, %s5842_s26  ;;  %v6088_v44 = vld [vmem:[#allocation79_spill] sm:$0xff]  ;;  %v2843_v41 = vstv %s5113_s22  ;;  %v1266_v49 = vsel %vm457_vm5, %v4645_v32, %v4643_v45  ;;  %s3371_s22 = scalar_lea.vmem %s5577_s20, 1024 }
 0x4a8   : > { %v1189_v37 = vadd.f32 %v1183_v24, %v1168_v10  ;;  %v1356_v31 = vadd.f32 %v1353_v27, %v1346_v48  ;;  %v6090_v24 = vld [vmem:[#allocation57_spill] sm:$0xff]  ;;  %v1379_v48 = vadd.f32 %v4653_v55, %v4335_v6  ;;  %p3372_p5 = scmp.ne.s32.totalorder %s5577_s20, %s3371_s22 }
 0x4a9   : > { %v1198_v8 = vpop.permute.xlu0 %1197  ;;  %v1187_v20 = vadd.f32 %v4625_v16, %v1166_v54  ;;  %v1188_v57 = vadd.f32 %v1182_v18, %v1167_v19  ;;  %v1200_v51 = vpop.permute.xlu1 %1199  ;;  %v6086_v16 = vld [vmem:[#allocation80_spill] sm:$0xff]  ;;  %v2528_v54 = vmul.f32 %v6090_v24, %v4267_v63 }
 0x4aa   : > { %v1203_v33 = vsel %vm865_vm11, %v1198_v8, %v1200_v51  ;;  %v1204_v59 = vsel %vm865_vm11, %v1200_v51, %v6085_v26  ;;  %v1225_v46 = vsel %vm908_vm12, %v4633_v56, %v6086_v16  ;;  %v6091_v51 = vld [vmem:[#allocation83_spill] sm:$0xff]  ;;  %p3373_p8 = pnand %p3372_p5, %p6222_p2 }
 0x4ab   : > { %v1208_v15 = vadd.f32 %v1198_v8, %v1187_v20  ;;  %v1209_v47 = vadd.f32 %v1203_v33, %v1188_v57  ;;  %v1210_v5 = vadd.f32 %v1204_v59, %v1189_v37  ;;  %2218 = vrot.lane.b32.xlu0 %v2212_v36, %s5836_s13  ;;  %2220 = vrot.lane.b32.xlu1 %v2213_v42, %s5836_s13  ;;  %v6092_v42 = vld [vmem:[#allocation81_spill] sm:$0xff] }
 0x4ac   : > { %v2529_v57 = vmul.f32 %v6090_v24, %v4263_v1  ;;  %v1372_v22 = vsel %vm736_vm8, %v6091_v51, %v4655_v30  ;;  %p3374_p10 = pneg %p3373_p8 }
 0x4ad   : > { %v1240_v12 = vpop.permute.xlu0 %1239  ;;  %v1229_v50 = vadd.f32 %v4635_v21, %v1208_v15  ;;  %v1230_v53 = vadd.f32 %v1224_v25, %v1209_v47  ;;  %v1231_v38 = vadd.f32 %v1225_v46, %v1210_v5  ;;  %v1242_v4 = vpop.permute.xlu1 %1241  ;;  %v6089_v21 = vld [vmem:[#allocation82_spill] sm:$0xff]  ;;  %v2845_v15 = vmul.f32 %v2843_v41, %v4263_v1 }
 0x4ae   : > { %v1245_v35 = vsel %vm908_vm12, %v1240_v12, %v1242_v4  ;;  %v1246_v56 = vsel %vm908_vm12, %v1242_v4, %v6088_v44  ;;  %v1267_v0 = vsel %vm457_vm5, %v4643_v45, %v6089_v21  ;;  %v1373_v45 = vsel %vm736_vm8, %v4655_v30, %v4653_v55 }
 0x4af   : > { %v1250_v52 = vadd.f32 %v1240_v12, %v1229_v50  ;;  %v1251_v10 = vadd.f32 %v1245_v35, %v1230_v53  ;;  %v1252_v43 = vadd.f32 %v1246_v56, %v1231_v38  ;;  %2808 = vrot.lane.b32.xlu0 %v2802_v39, %s5842_s26  ;;  %2810 = vrot.lane.b32.xlu1 %v2803_v62, %s5842_s26  ;;  %v6094_v53 = vld [vmem:[#allocation85_spill] sm:$0xff] }
 0x4b0   : > { %v1377_v47 = vadd.f32 %v1372_v22, %v1356_v31  ;;  %v1378_v30 = vadd.f32 %v1373_v45, %v4345_v60  ;;  %v2844_v25 = vmul.f32 %v2843_v41, %v4267_v63  ;;  %v2846_v60 = vmul.f32 0.0, %v2843_v41  ;;  %v6098_v45 = vld [vmem:[#allocation89_spill] sm:$0xff] }
 0x4b1   : > { %v1282_v19 = vpop.permute.xlu0 %1281  ;;  %v1271_v18 = vadd.f32 %v4645_v32, %v1250_v52  ;;  %v1272_v37 = vadd.f32 %v1266_v49, %v1251_v10  ;;  %v1273_v8 = vadd.f32 %v1267_v0, %v1252_v43  ;;  %v1284_v20 = vpop.permute.xlu1 %1283  ;;  %v1414_v63 = vsel %vm779_vm9, %v6094_v53, %v4665_v29  ;;  %v6095_v43 = vld [vmem:[#allocation86_spill] sm:$0xff] }
 0x4b2   : > { %v1287_v36 = vsel %vm457_vm5, %v1282_v19, %v1284_v20  ;;  %v1288_v33 = vsel %vm457_vm5, %v1284_v20, %v6092_v42  ;;  %v1415_v38 = vsel %vm779_vm9, %v4665_v29, %v4663_v13  ;;  %v1006_v10 = vrot.slane %v5085_v3, %v5033_v2  ;;  %v6097_v20 = vld [vmem:[#allocation88_spill] sm:$0xff] }
 0x4b3   : > { %v1292_v32 = vadd.f32 %v1282_v19, %v1271_v18  ;;  %v1293_v26 = vadd.f32 %v1287_v36, %v1272_v37  ;;  %v1294_v59 = vadd.f32 %v1288_v33, %v1273_v8  ;;  %2534 = vrot.lane.b32.xlu0 %v2528_v54, %s5836_s13  ;;  %2536 = vrot.lane.b32.xlu1 %v2529_v57, %s5836_s13 }
 0x4b4   : > { %v1457_v3 = vsel %vm822_vm10, %v4675_v61, %v4673_v28  ;;  %v1499_v36 = vsel %vm865_vm11, %v4685_v17, %v6098_v45  ;;  %v6110_v45 = vld [vmem:[#allocation95_spill] sm:$0xff] }
 0x4b5   : > { %v1300_v5 = vcombine.low %v1292_v32, %v1293_v26  ;;  %v1390_v16 = vpop.permute.xlu0 %1389  ;;  %v1392_v46 = vpop.permute.xlu1 %1391  ;;  %v1314_v27 = vrot.slane %v1294_v59, %v5033_v2 }
 0x4b6   : > { %v1393_v39 = vsel %vm736_vm8, %v6093_v11, %v1390_v16  ;;  %v1394_v12 = vsel %vm736_vm8, %v1390_v16, %v1392_v46  ;;  %v1400_v50 = vadd.f32 %v1392_v46, %v1379_v48  ;;  %v1669_v11 = vmul.f32 0.0, %v4339_v34 }
 0x4b7   : > { %v1307_v6 = vrot.slane %v1300_v5, %v5033_v2  ;;  %v1398_v55 = vadd.f32 %v1393_v39, %v1377_v47  ;;  %v1399_v1 = vadd.f32 %v1394_v12, %v1378_v30  ;;  %2852 = vrot.lane.b32.xlu0 %v2845_v15, %s5836_s13  ;;  %2850 = vrot.lane.b32.xlu1 %v2844_v25, %s5836_s13  ;;  %v6099_v15 = vld [vmem:[#allocation90_spill] sm:$0xff] }
 0x4b8   : > { %v1421_v4 = vadd.f32 %v4663_v13, %v1400_v50  ;;  %v6096_v13 = vld [vmem:[#allocation87_spill] sm:$0xff]  ;;  %v1540_v25 = vsel %vm908_vm12, %v4693_v40, %v4695_v58 }
 0x4b9   : > { %v1315_v62 = vcombine.low %v1307_v6, %v1314_v27  ;;  %v1432_v35 = vpop.permute.xlu0 %1431  ;;  %v1419_v44 = vadd.f32 %v1414_v63, %v1398_v55  ;;  %v1420_v56 = vadd.f32 %v1415_v38, %v1399_v1  ;;  %v1434_v52 = vpop.permute.xlu1 %1433  ;;  %v1456_v29 = vsel %vm822_vm10, %v6096_v13, %v4675_v61  ;;  %v6100_v27 = vld [vmem:[#allocation91_spill] sm:$0xff]  ;;  %v6101_v1 = vld [vmem:[#allocation92_spill] sm:$0xff] }
 0x4ba   : > { %v1435_v41 = vsel %vm779_vm9, %v6095_v43, %v1432_v35  ;;  %v1436_v21 = vsel %vm779_vm9, %v1432_v35, %v1434_v52  ;;  %v1442_v0 = vadd.f32 %v1434_v52, %v1421_v4  ;;  %v6104_v43 = vld [vmem:[#allocation53_spill] sm:$0xff] }
 0x4bb   : > { %v1440_v49 = vadd.f32 %v1435_v41, %v1419_v44  ;;  %v1441_v31 = vadd.f32 %v1436_v21, %v1420_v56  ;;  %2854 = vrot.lane.b32.xlu1 %v2846_v60, %s5836_s13  ;;  %1007 = vrot.lane.b32.xlu0 %v1006_v10, %s3462_s7  ;;  %v1322_v8 = vrot.slane %v1315_v62, %v5033_v2  ;;  %s3463_s13 = smov 50   ;;  %v6103_v62 = vld [vmem:[#allocation93_spill] sm:$0xff]  ;;  %v6105_v41 = vld [vmem:[#allocation96_spill] sm:$0xff]  ;;  %s3468_s7 = smov [#allocation9]  }
 0x4bc   : > { %v1463_v24 = vadd.f32 %v4673_v28, %v1442_v0  ;;  %v1498_v28 = vsel %vm865_vm11, %v4683_v9, %v4685_v17  ;;  %v1541_v17 = vsel %vm908_vm12, %v4695_v58, %v6100_v27  ;;  %v6102_v58 = vld [vmem:[#allocation51_spill] sm:$0xff]  ;;  %v1583_v34 = vsel %vm457_vm5, %v4705_v14, %v6103_v62 }
 0x4bd   : > { %v1474_v54 = vpop.permute.xlu0 %1473  ;;  %v1461_v19 = vadd.f32 %v1456_v29, %v1440_v49  ;;  %v1462_v18 = vadd.f32 %v1457_v3, %v1441_v31  ;;  %v1476_v37 = vpop.permute.xlu1 %1475  ;;  %v1688_v21 = vsel %vm736_vm8, %v6105_v41, %v6104_v43  ;;  %v6106_v0 = vld [vmem:[#allocation55_spill] sm:$0xff]  ;;  %v6107_v31 = vld [vmem:[#allocation94_spill] sm:$0xff] }
 0x4be   : > { %v1477_v57 = vsel %vm822_vm10, %v6097_v20, %v1474_v54  ;;  %v1478_v51 = vsel %vm822_vm10, %v1474_v54, %v1476_v37  ;;  %v1484_v22 = vadd.f32 %v1476_v37, %v1463_v24  ;;  %v1689_v49 = vsel %vm736_vm8, %v6104_v43, %v6106_v0  ;;  %v6108_v54 = vld [vmem:[#allocation151_spill] sm:$0xff]  ;;  %v6109_v37 = vld [vmem:[#allocation149_spill] sm:$0xff] }
 0x4bf   : > { %v1482_v42 = vadd.f32 %v1477_v57, %v1461_v19  ;;  %v1483_v61 = vadd.f32 %v1478_v51, %v1462_v18  ;;  %1323 = vrot.lane.b32.xlu1 %v1322_v8, %s3463_s13  ;;  %v1695_v19 = vadd.f32 %v6106_v0, %v6108_v54  ;;  %v1694_v8 = vadd.f32 %v1689_v49, %v6109_v37  ;;  %v6121_v54 = vld [vmem:[#allocation102_spill] sm:$0xff]  ;;  %v6123_v37 = vld [vmem:[#allocation21_spill] sm:$0xff]  ;;  %s3375_s13 = sshll.u32 %s3468_s7, 4  ;;  %s3376_s13 = int_to_ptr.vmem [resolvable:$false] %s3375_s13 }
 0x4c0   : > { %v1505_v33 = vadd.f32 %v1499_v36, %v1484_v22  ;;  %p3378_p4 = scmp.lt.s32.totalorder %s5577_s20, %s3376_s13 }
 0x4c1   : > { %v1516_v32 = vpop.permute.xlu0 %1515  ;;  %v1503_v26 = vadd.f32 %v4683_v9, %v1482_v42  ;;  %v1504_v59 = vadd.f32 %v1498_v28, %v1483_v61  ;;  %v1514_v48 = vpop.permute.xlu1 %1513  ;;  %v1662_v9 = vmul.f32 0.0, %v4337_v23  ;;  %v1582_v23 = vsel %vm457_vm5, %v6102_v58, %v4705_v14 }
 0x4c2   : > { %v1520_v47 = vsel %vm865_vm11, %v1516_v32, %v6099_v15  ;;  %v1519_v30 = vsel %vm865_vm11, %v1514_v48, %v1516_v32  ;;  %v6113_v15 = vld [vmem:[#allocation15_spill] sm:$0xff] }
 0x4c3   : > { %v1526_v5 = vadd.f32 %v1520_v47, %v1505_v33  ;;  %v1524_v16 = vadd.f32 %v1514_v48, %v1503_v26  ;;  %v1525_v46 = vadd.f32 %v1519_v30, %v1504_v59  ;;  %v1672_v35 = vadd.f32 %v1669_v11, %v1662_v9  ;;  %v6111_v26 = vld [vmem:[#allocation58_spill] sm:$0xff]  ;;  %v6114_v9 = vld [vmem:[#allocation97_spill] sm:$0xff] }
 0x4c4   : > { %v6112_v59 = vld [vmem:[#allocation98_spill] sm:$0xff]  ;;  %v1731_v47 = vsel %vm779_vm9, %v6111_v26, %v6113_v15 }
 0x4c5   : > { %v1558_v39 = vpop.permute.xlu0 %1557  ;;  %v1547_v12 = vadd.f32 %v1541_v17, %v1526_v5  ;;  %v1545_v50 = vadd.f32 %v4693_v40, %v1524_v16  ;;  %v1546_v6 = vadd.f32 %v1540_v25, %v1525_v46  ;;  %v1556_v55 = vpop.permute.xlu1 %1555  ;;  %v1693_v18 = vadd.f32 %v1688_v21, %v1672_v35  ;;  %v6118_v35 = vld [vmem:[#allocation18_spill] sm:$0xff] }
 0x4c6   : > { %v1562_v60 = vsel %vm908_vm12, %v1558_v39, %v6101_v1  ;;  %v1561_v53 = vsel %vm908_vm12, %v1556_v55, %v1558_v39  ;;  %v1730_v48 = vsel %vm779_vm9, %v6112_v59, %v6111_v26  ;;  %v6116_v1 = vld [vmem:[#allocation17_spill] sm:$0xff]  ;;  %v6125_v26 = vld [vmem:[#allocation104_spill] sm:$0xff]  ;;  %v6126_v59 = vld [vmem:[#allocation22_spill] sm:$0xff] }
 0x4c7   : > { %v1568_v63 = vadd.f32 %v1562_v60, %v1547_v12  ;;  %v1566_v38 = vadd.f32 %v1556_v55, %v1545_v50  ;;  %v1567_v4 = vadd.f32 %v1561_v53, %v1546_v6  ;;  %v6115_v55 = vld [vmem:[#allocation16_spill] sm:$0xff] }
 0x4c8   : > { %v1768_v60 = vsel %vm822_vm10, %v6116_v1, %v6115_v55 }
 0x4c9   : > { %v1600_v40 = vpop.permute.xlu0 %1599  ;;  %v1589_v44 = vadd.f32 %v1583_v34, %v1568_v63  ;;  %v1587_v56 = vadd.f32 %v6102_v58, %v1566_v38  ;;  %v1588_v52 = vadd.f32 %v1582_v23, %v1567_v4  ;;  %v1598_v10 = vpop.permute.xlu1 %1597  ;;  %v6117_v34 = vld [vmem:[#allocation100_spill] sm:$0xff] }
 0x4ca   : > { %v1604_v13 = vsel %vm457_vm5, %v1600_v40, %v6107_v31  ;;  %v1603_v14 = vsel %vm457_vm5, %v1598_v10, %v1600_v40  ;;  %v1805_v40 = vsel %vm865_vm11, %v6118_v35, %v6117_v34 }
 0x4cb   : > { %v1610_v29 = vadd.f32 %v1604_v13, %v1589_v44  ;;  %v1608_v3 = vadd.f32 %v1598_v10, %v1587_v56  ;;  %v1609_v24 = vadd.f32 %v1603_v14, %v1588_v52  ;;  %v6119_v52 = vld [vmem:[#allocation19_spill] sm:$0xff] }
 0x4cc   : > { %v1804_v10 = vsel %vm865_vm11, %v6119_v52, %v6118_v35  ;;  %v6120_v13 = vld [vmem:[#allocation99_spill] sm:$0xff]  ;;  %v6130_v35 = vld [vmem:[#allocation150_spill] sm:$0xff] }
 0x4cd   : > { %v1616_v20 = vcombine.low %v1608_v3, %v1609_v24  ;;  %v1708_v57 = vpop.permute.xlu0 %1707  ;;  %v1706_v51 = vpop.permute.xlu1 %1705  ;;  %v1630_v61 = vrot.slane %v1610_v29, %v5033_v2 }
 0x4ce   : > { %v1716_v22 = vadd.f32 %v1708_v57, %v1695_v19  ;;  %v1709_v36 = vsel %vm736_vm8, %v6110_v45, %v1706_v51  ;;  %v1710_v42 = vsel %vm736_vm8, %v1706_v51, %v1708_v57  ;;  %v6122_v19 = vld [vmem:[#allocation20_spill] sm:$0xff] }
 0x4cf   : > { %v1623_v28 = vrot.slane %v1616_v20, %v5033_v2  ;;  %v1714_v33 = vadd.f32 %v1709_v36, %v1693_v18  ;;  %v1715_v32 = vadd.f32 %v1710_v42, %v1694_v8  ;;  %v1847_v18 = vsel %vm908_vm12, %v6122_v19, %v6121_v54  ;;  %v6124_v42 = vld [vmem:[#allocation101_spill] sm:$0xff] }
 0x4d0   : > { %v1737_v30 = vadd.f32 %v6113_v15, %v1716_v22  ;;  %v1846_v8 = vsel %vm908_vm12, %v6123_v37, %v6122_v19  ;;  %v6127_v15 = vld [vmem:[#allocation23_spill] sm:$0xff]  ;;  %v6137_v19 = vld [vmem:[#allocation157_spill] sm:$0xff] }
 0x4d1   : > { %v1631_v5 = vcombine.low %v1623_v28, %v1630_v61  ;;  %v1750_v16 = vpop.permute.xlu0 %1749  ;;  %v1735_v46 = vadd.f32 %v1730_v48, %v1714_v33  ;;  %v1736_v25 = vadd.f32 %v1731_v47, %v1715_v32  ;;  %v1748_v27 = vpop.permute.xlu1 %1747  ;;  %v1889_v48 = vsel %vm457_vm5, %v6126_v59, %v6125_v26 }
 0x4d2   : > { %v1758_v17 = vadd.f32 %v1750_v16, %v1737_v30  ;;  %v1751_v11 = vsel %vm779_vm9, %v6114_v9, %v1748_v27  ;;  %v1752_v39 = vsel %vm779_vm9, %v1748_v27, %v1750_v16  ;;  %v1888_v47 = vsel %vm457_vm5, %v6127_v15, %v6126_v59 }
 0x4d3   : > { %v1756_v12 = vadd.f32 %v1751_v11, %v1735_v46  ;;  %v1757_v50 = vadd.f32 %v1752_v39, %v1736_v25  ;;  %v1638_v6 = vrot.slane %v1631_v5, %v5033_v2 }
 0x4d4   : > { %v1774_v53 = vadd.f32 %v6115_v55, %v1758_v17  ;;  %v6128_v17 = vld [vmem:[#allocation103_spill] sm:$0xff] }
 0x4d5   : > { %v1783_v63 = vpop.permute.xlu0 %1782  ;;  %v1772_v38 = vadd.f32 %v6116_v1, %v1756_v12  ;;  %v1773_v4 = vadd.f32 %v1768_v60, %v1757_v50  ;;  %v1781_v58 = vpop.permute.xlu1 %1780  ;;  %1639 = vrot.lane.b32.xlu0 %v1638_v6, %s3464_s12  ;;  %s3377_s12 = scalar_lea.vmem %s3376_s13, 2048 }
 0x4d6   : > { %v1790_v23 = vadd.f32 %v1783_v63, %v1774_v53  ;;  %v1784_v62 = vsel %vm822_vm10, %v1781_v58, %v1783_v63  ;;  %p3379_p12 = scmp.lt.s32.totalorder %s3377_s12, %s3371_s22 }
 0x4d7   : > { %v1788_v44 = vadd.f32 %v1781_v58, %v1772_v38  ;;  %v1789_v56 = vadd.f32 %v1784_v62, %v1773_v4  ;;  %v6129_v62 = vld [vmem:[#allocation148_spill] sm:$0xff] }
 0x4d8   : > { %v1811_v43 = vadd.f32 %v1805_v40, %v1790_v23  ;;  %v1967_v34 = vmul.f32 0.0, %v6129_v62  ;;  %v1974_v40 = vmul.f32 0.0, %v6130_v35  ;;  %v6153_v62 = vld [vmem:[#allocation159_spill] sm:$0xff]  ;;  %v6154_v35 = vld [vmem:[#allocation158_spill] sm:$0xff]  ;;  %p3380_p0 = por %p3379_p12, %p3378_p4 }
 0x4d9   : > { %v1820_v41 = vpop.permute.xlu0 %1819  ;;  %v1809_v21 = vadd.f32 %v6119_v52, %v1788_v44  ;;  %v1810_v0 = vadd.f32 %v1804_v10, %v1789_v56  ;;  %v1822_v49 = vpop.permute.xlu1 %1821  ;;  %v6131_v10 = vld [vmem:[#allocation25_spill] sm:$0xff] }
 0x4da   : > { %v1825_v31 = vsel %vm865_vm11, %v1820_v41, %v1822_v49  ;;  %v1826_v14 = vsel %vm865_vm11, %v1822_v49, %v6120_v13  ;;  %v1977_v52 = vadd.f32 %v1974_v40, %v1967_v34  ;;  %v6134_v49 = vld [vmem:[#allocation153_spill] sm:$0xff]  ;;  %p3381_p7 = pnand %p3380_p0, %p3374_p10 }
 0x4db   : > { %v1830_v29 = vadd.f32 %v1820_v41, %v1809_v21  ;;  %v1831_v3 = vadd.f32 %v1825_v31, %v1810_v0  ;;  %v1832_v24 = vadd.f32 %v1826_v14, %v1811_v43  ;;  %v6132_v43 = vld [vmem:[#allocation105_spill] sm:$0xff]  ;;  %v6133_v21 = vld [vmem:[#allocation152_spill] sm:$0xff]  ;;  %v2290_v31 = vmul.f32 0.0, %v6134_v49 }
 0x4dc   : > { %v1993_v41 = vsel %vm736_vm8, %v6132_v43, %v6131_v10  ;;  %v2283_v0 = vmul.f32 0.0, %v6133_v21 }
 0x4dd   : > { %v1862_v20 = vpop.permute.xlu0 %1861  ;;  %v1851_v57 = vadd.f32 %v6123_v37, %v1830_v29  ;;  %v1852_v51 = vadd.f32 %v1846_v8, %v1831_v3  ;;  %v1853_v22 = vadd.f32 %v1847_v18, %v1832_v24  ;;  %v1864_v45 = vpop.permute.xlu1 %1863  ;;  %v6135_v29 = vld [vmem:[#allocation24_spill] sm:$0xff]  ;;  %v2606_v18 = vmul.f32 0.0, %v6137_v19  ;;  %v6138_v37 = vld [vmem:[#allocation106_spill] sm:$0xff] }
 0x4de   : > { %v1867_v36 = vsel %vm908_vm12, %v1862_v20, %v1864_v45  ;;  %v1868_v61 = vsel %vm908_vm12, %v1864_v45, %v6124_v42  ;;  %v1994_v3 = vsel %vm736_vm8, %v6131_v10, %v6135_v29  ;;  %v6136_v24 = vld [vmem:[#allocation156_spill] sm:$0xff] }
 0x4df   : > { %v1872_v28 = vadd.f32 %v1862_v20, %v1851_v57  ;;  %v1873_v33 = vadd.f32 %v1867_v36, %v1852_v51  ;;  %v1874_v32 = vadd.f32 %v1868_v61, %v1853_v22  ;;  %v2599_v54 = vmul.f32 0.0, %v6136_v24  ;;  %v6139_v20 = vld [vmem:[#allocation154_spill] sm:$0xff]  ;;  %v6140_v36 = vld [vmem:[#allocation155_spill] sm:$0xff]  ;;  %v6141_v61 = vld [vmem:[#allocation28_spill] sm:$0xff] }
 0x4e0   : > { %v2000_v57 = vadd.f32 %v6135_v29, %v6139_v20  ;;  %v1998_v51 = vadd.f32 %v1993_v41, %v1977_v52  ;;  %v2293_v22 = vadd.f32 %v2290_v31, %v2283_v0  ;;  %v1999_v42 = vadd.f32 %v1994_v3, %v6140_v36  ;;  %v6155_v52 = vld [vmem:[#allocation161_spill] sm:$0xff]  ;;  %v6156_v31 = vld [vmem:[#allocation160_spill] sm:$0xff]  ;;  %v6157_v3 = vld [vmem:[#allocation166_spill] sm:$0xff] }
 0x4e1   : > { %v1904_v30 = vpop.permute.xlu0 %1903  ;;  %v1893_v5 = vadd.f32 %v6127_v15, %v1872_v28  ;;  %v1894_v16 = vadd.f32 %v1888_v47, %v1873_v33  ;;  %v1895_v46 = vadd.f32 %v1889_v48, %v1874_v32  ;;  %v1906_v25 = vpop.permute.xlu1 %1905  ;;  %v6142_v28 = vld [vmem:[#allocation110_spill] sm:$0xff]  ;;  %v6144_v47 = vld [vmem:[#allocation107_spill] sm:$0xff]  ;;  %v6158_v24 = vld [vmem:[#allocation113_spill] sm:$0xff] }
 0x4e2   : > { %v1909_v27 = vsel %vm457_vm5, %v1904_v30, %v1906_v25  ;;  %v1910_v9 = vsel %vm457_vm5, %v1906_v25, %v6128_v17  ;;  %v2309_v33 = vsel %vm736_vm8, %v6142_v28, %v6141_v61  ;;  %v6143_v15 = vld [vmem:[#allocation162_spill] sm:$0xff]  ;;  %v6147_v17 = vld [vmem:[#allocation29_spill] sm:$0xff]  ;;  %v6159_v19 = vld [vmem:[#allocation108_spill] sm:$0xff] }
 0x4e3   : > { %v1914_v11 = vadd.f32 %v1904_v30, %v1893_v5  ;;  %v1915_v39 = vadd.f32 %v1909_v27, %v1894_v16  ;;  %v1916_v12 = vadd.f32 %v1910_v9, %v1895_v46  ;;  %v2035_v30 = vsel %vm779_vm9, %v6144_v47, %v6143_v15  ;;  %v6145_v5 = vld [vmem:[#allocation164_spill] sm:$0xff]  ;;  %v6146_v25 = vld [vmem:[#allocation26_spill] sm:$0xff]  ;;  %v6161_v20 = vld [vmem:[#allocation31_spill] sm:$0xff] }
 0x4e4   : > { %v2310_v16 = vsel %vm736_vm8, %v6141_v61, %v6145_v5  ;;  %v2609_v46 = vadd.f32 %v2606_v18, %v2599_v54  ;;  %v2036_v27 = vsel %vm779_vm9, %v6143_v15, %v6146_v25  ;;  %v6148_v9 = vld [vmem:[#allocation112_spill] sm:$0xff]  ;;  %v2316_v34 = vadd.f32 %v6145_v5, %v6153_v62  ;;  %v6163_v36 = vld [vmem:[#allocation167_spill] sm:$0xff]  ;;  %v6168_v5 = vld [vmem:[#allocation169_spill] sm:$0xff] }
 0x4e5   : > { %v1922_v50 = vcombine.low %v1914_v11, %v1915_v39  ;;  %v2011_v6 = vpop.permute.xlu0 %2010  ;;  %v2013_v55 = vpop.permute.xlu1 %2012  ;;  %v1936_v60 = vrot.slane %v1916_v12, %v5033_v2  ;;  %v2625_v11 = vsel %vm736_vm8, %v6148_v9, %v6147_v17  ;;  %v6149_v39 = vld [vmem:[#allocation165_spill] sm:$0xff]  ;;  %v2315_v40 = vadd.f32 %v2310_v16, %v6154_v35  ;;  %v6164_v61 = vld [vmem:[#allocation168_spill] sm:$0xff]  ;;  %v6167_v47 = vld [vmem:[#allocation119_spill] sm:$0xff] }
 0x4e6   : > { %v2014_v8 = vsel %vm736_vm8, %v6138_v37, %v2011_v6  ;;  %v2015_v45 = vsel %vm736_vm8, %v2011_v6, %v2013_v55  ;;  %v2021_v26 = vadd.f32 %v2013_v55, %v2000_v57  ;;  %v2626_v12 = vsel %vm736_vm8, %v6147_v17, %v6149_v39  ;;  %v6150_v6 = vld [vmem:[#allocation163_spill] sm:$0xff]  ;;  %v6160_v37 = vld [vmem:[#allocation30_spill] sm:$0xff]  ;;  %v6162_v57 = vld [vmem:[#allocation116_spill] sm:$0xff] }
 0x4e7   : > { %v1929_v1 = vrot.slane %v1922_v50, %v5033_v2  ;;  %v2019_v32 = vadd.f32 %v2014_v8, %v1998_v51  ;;  %v2020_v50 = vadd.f32 %v2015_v45, %v1999_v42  ;;  %v6151_v55 = vld [vmem:[#allocation27_spill] sm:$0xff]  ;;  %v2632_v10 = vadd.f32 %v6149_v39, %v6155_v52  ;;  %v6165_v28 = vld [vmem:[#allocation32_spill] sm:$0xff]  ;;  %v6169_v16 = vld [vmem:[#allocation33_spill] sm:$0xff] }
 0x4e8   : > { %v2042_v41 = vadd.f32 %v6146_v25, %v2021_v26  ;;  %v2630_v49 = vadd.f32 %v2625_v11, %v2609_v46  ;;  %v2631_v29 = vadd.f32 %v2626_v12, %v6156_v31  ;;  %v2351_v54 = vsel %vm779_vm9, %v6158_v24, %v6157_v3  ;;  %v6166_v26 = vld [vmem:[#allocation111_spill] sm:$0xff]  ;;  %v6170_v11 = vld [vmem:[#allocation120_spill] sm:$0xff] }
 0x4e9   : > { %v1937_v53 = vcombine.low %v1929_v1, %v1936_v60  ;;  %v2053_v63 = vpop.permute.xlu0 %2052  ;;  %v2055_v38 = vpop.permute.xlu1 %2054  ;;  %v2077_v1 = vsel %vm822_vm10, %v6151_v55, %v6150_v6  ;;  %v6152_v60 = vld [vmem:[#allocation109_spill] sm:$0xff]  ;;  %v2040_v43 = vadd.f32 %v2035_v30, %v2019_v32  ;;  %v2352_v8 = vsel %vm779_vm9, %v6157_v3, %v6160_v37 }
 0x4ea   : > { %v2056_v18 = vsel %vm779_vm9, %v6159_v19, %v2053_v63  ;;  %v2667_v51 = vsel %vm779_vm9, %v6162_v57, %v6161_v20  ;;  %v2668_v42 = vsel %vm779_vm9, %v6161_v20, %v6163_v36  ;;  %v2057_v32 = vsel %vm779_vm9, %v2053_v63, %v2055_v38 }
 0x4eb   : > { %v1944_v4 = vrot.slane %v1937_v53, %v5033_v2  ;;  %v2078_v53 = vsel %vm822_vm10, %v6150_v6, %v6152_v60  ;;  %v2394_v30 = vsel %vm822_vm10, %v6164_v61, %v6167_v47  ;;  %v2119_v46 = vsel %vm865_vm11, %v6169_v16, %v6168_v5  ;;  %v6172_v6 = vld [vmem:[#allocation34_spill] sm:$0xff] }
 0x4ec   : > { %v2061_v25 = vadd.f32 %v2056_v18, %v2040_v43  ;;  %v2120_v63 = vsel %vm865_vm11, %v6168_v5, %v6170_v11  ;;  %v6174_v43 = vld [vmem:[#allocation124_spill] sm:$0xff] }
 0x4ed   : > { %v5301_v58 = vpop.permute.xlu0 %2328  ;;  %1945 = vrot.lane.b32.xlu1 %v1944_v4, %s5842_s26  ;;  %v2327_v23 = vpop.permute.xlu1 %2326  ;;  %v2314_v4 = vadd.f32 %v2309_v33, %v2293_v22  ;;  %v2041_v22 = vadd.f32 %v2036_v27, %v2020_v50  ;;  %v2393_v33 = vsel %vm822_vm10, %v6165_v28, %v6164_v61  ;;  %v2063_v27 = vadd.f32 %v2055_v38, %v2042_v41  ;;  %v6171_v50 = vld [vmem:[#allocation122_spill] sm:$0xff]  ;;  %v6175_v41 = vld [vmem:[#allocation171_spill] sm:$0xff]  ;;  %s3465_s26 = smov 47  }
 0x4ee   : > { %v2331_v45 = vsel %vm736_vm8, %v2327_v23, %v5301_v58  ;;  %v2330_v15 = vsel %vm736_vm8, %v6166_v26, %v2327_v23  ;;  %v2337_v39 = vadd.f32 %v5301_v58, %v2316_v34  ;;  %v2710_v60 = vsel %vm822_vm10, %v6172_v6, %v6171_v50  ;;  %v6173_v38 = vld [vmem:[#allocation170_spill] sm:$0xff]  ;;  %v6176_v58 = vld [vmem:[#allocation172_spill] sm:$0xff] }
 0x4ef   : > { %v2336_v23 = vadd.f32 %v2331_v45, %v2315_v40  ;;  %v2709_v62 = vsel %vm822_vm10, %v6173_v38, %v6172_v6  ;;  %v2062_v35 = vadd.f32 %v2057_v32, %v2041_v22  ;;  %v2335_v52 = vadd.f32 %v2330_v15, %v2314_v4  ;;  %v6177_v40 = vld [vmem:[#allocation114_spill] sm:$0xff]  ;;  %v6178_v32 = vld [vmem:[#allocation115_spill] sm:$0xff] }
 0x4f0   : > { %v5411_v31 = vsel %vm865_vm11, %v6175_v41, %v6174_v43  ;;  %v5416_v34 = vsel %vm865_vm11, %v6176_v58, %v6175_v41  ;;  %v2084_v19 = vadd.f32 %v2078_v53, %v2063_v27  ;;  %v2082_v20 = vadd.f32 %v6151_v55, %v2061_v25 }
 0x4f1   : > { %v5306_v44 = vpop.permute.xlu0 %2642  ;;  %v5308_v56 = vpop.permute.xlu1 %2644  ;;  %v2358_v45 = vadd.f32 %v6160_v37, %v2337_v39  ;;  %v2357_v61 = vadd.f32 %v2352_v8, %v2336_v23  ;;  %v2356_v53 = vadd.f32 %v2351_v54, %v2335_v52  ;;  %v6180_v54 = vld [vmem:[#allocation126_spill] sm:$0xff]  ;;  %v6183_v23 = vld [vmem:[#allocation128_spill] sm:$0xff] }
 0x4f2   : > { %v2647_v12 = vsel %vm736_vm8, %v5306_v44, %v5308_v56  ;;  %v2646_v3 = vsel %vm736_vm8, %v6177_v40, %v5306_v44  ;;  %v2653_v24 = vadd.f32 %v5308_v56, %v2632_v10  ;;  %v2083_v10 = vadd.f32 %v2077_v1, %v2062_v35  ;;  %v6181_v1 = vld [vmem:[#allocation35_spill] sm:$0xff]  ;;  %v6186_v40 = vld [vmem:[#allocation117_spill] sm:$0xff] }
 0x4f3   : > { %v2652_v18 = vadd.f32 %v2647_v12, %v2631_v29  ;;  %v2651_v56 = vadd.f32 %v2646_v3, %v2630_v49  ;;  %v6179_v29 = vld [vmem:[#allocation118_spill] sm:$0xff]  ;;  %v2162_v39 = vsel %vm908_vm12, %v6181_v1, %v6180_v54 }
 0x4f4   : > { %v2674_v5 = vadd.f32 %v6163_v36, %v2653_v24  ;;  %v6184_v36 = vld [vmem:[#allocation36_spill] sm:$0xff] }
 0x4f5   : > { %v5315_v13 = vpop.permute.xlu0 %2370  ;;  %v5317_v14 = vpop.permute.xlu1 %2368  ;;  %v2673_v27 = vadd.f32 %v2668_v42, %v2652_v18  ;;  %v2752_v12 = vsel %vm865_vm11, %v6184_v36, %v6183_v23  ;;  %v2672_v41 = vadd.f32 %v2667_v51, %v2651_v56 }
 0x4f6   : > { %v2373_v4 = vsel %vm779_vm9, %v5317_v14, %v5315_v13  ;;  %v2372_v26 = vsel %vm779_vm9, %v6178_v32, %v5317_v14  ;;  %v2379_v55 = vadd.f32 %v5315_v13, %v2358_v45 }
 0x4f7   : > { %v2378_v47 = vadd.f32 %v2373_v4, %v2357_v61  ;;  %v2377_v8 = vadd.f32 %v2372_v26, %v2356_v53 }
 0x4f8   : > { %v2400_v43 = vadd.f32 %v2394_v30, %v2379_v55  ;;  %v6187_v30 = vld [vmem:[#allocation125_spill] sm:$0xff]  ;;  %v6189_v55 = vld [vmem:[#allocation127_spill] sm:$0xff] }
 0x4f9   : > { %v5333_v59 = vpop.permute.xlu0 %2092  ;;  %v2095_v48 = vpop.permute.xlu1 %2094  ;;  %v2399_v24 = vadd.f32 %v2393_v33, %v2378_v47  ;;  %v2398_v18 = vadd.f32 %v6165_v28, %v2377_v8 }
 0x4fa   : > { %v2098_v44 = vsel %vm822_vm10, %v5333_v59, %v2095_v48  ;;  %v2099_v15 = vsel %vm822_vm10, %v2095_v48, %v6179_v29  ;;  %v2103_v14 = vadd.f32 %v5333_v59, %v2082_v20  ;;  %v6182_v48 = vld [vmem:[#allocation173_spill] sm:$0xff] }
 0x4fb   : > { %v2104_v25 = vadd.f32 %v2098_v44, %v2083_v10  ;;  %v2161_v13 = vsel %vm908_vm12, %v6182_v48, %v6181_v1  ;;  %v2105_v50 = vadd.f32 %v2099_v15, %v2084_v19  ;;  %v6185_v59 = vld [vmem:[#allocation121_spill] sm:$0xff] }
 0x4fc   : > { %v2124_v4 = vadd.f32 %v6169_v16, %v2103_v14  ;;  %v6188_v16 = vld [vmem:[#allocation123_spill] sm:$0xff]  ;;  %v6196_v1 = vld [vmem:[#allocation177_spill] sm:$0xff] }
 0x4fd   : > { %v2687_v21 = vpop.permute.xlu0 %2686  ;;  %v5362_v0 = vpop.permute.xlu1 %2684  ;;  %v2125_v19 = vadd.f32 %v2119_v46, %v2104_v25  ;;  %v6193_v14 = vld [vmem:[#allocation175_spill] sm:$0xff] }
 0x4fe   : > { %v2689_v37 = vsel %vm779_vm9, %v5362_v0, %v2687_v21  ;;  %v2695_v6 = vadd.f32 %v2687_v21, %v2674_v5  ;;  %v2688_v3 = vsel %vm779_vm9, %v6186_v40, %v5362_v0  ;;  %v2126_v0 = vadd.f32 %v2120_v63, %v2105_v50 }
 0x4ff   : > { %v2694_v35 = vadd.f32 %v2689_v37, %v2673_v27  ;;  %v2693_v44 = vadd.f32 %v2688_v3, %v2672_v41  ;;  %v6194_v27 = vld [vmem:[#allocation134_spill] sm:$0xff]  ;;  %v6197_v3 = vld [vmem:[#allocation129_spill] sm:$0xff] }
 0x500   : > { %v2716_v26 = vadd.f32 %v2710_v60, %v2695_v6  ;;  %v6190_v60 = vld [vmem:[#allocation174_spill] sm:$0xff] }
 0x501   : > { %v2411_v17 = vpop.permute.xlu0 %2410  ;;  %v5393_v9 = vpop.permute.xlu1 %2408  ;;  %v2715_v33 = vadd.f32 %v2709_v62, %v2694_v35  ;;  %v2751_v63 = vsel %vm865_vm11, %v6190_v60, %v6184_v36  ;;  %v6191_v62 = vld [vmem:[#allocation130_spill] sm:$0xff]  ;;  %v2714_v50 = vadd.f32 %v6173_v38, %v2693_v44 }
 0x502   : > { %v2415_v42 = vsel %vm822_vm10, %v2411_v17, %v6185_v59  ;;  %v2414_v52 = vsel %vm822_vm10, %v5393_v9, %v2411_v17  ;;  %v2419_v28 = vadd.f32 %v5393_v9, %v2398_v18  ;;  %v6192_v9 = vld [vmem:[#allocation37_spill] sm:$0xff] }
 0x503   : > { %v2421_v61 = vadd.f32 %v2415_v42, %v2400_v43  ;;  %v2420_v32 = vadd.f32 %v2414_v52, %v2399_v24  ;;  %v2477_v25 = vsel %vm908_vm12, %v6193_v14, %v6192_v9 }
 0x504   : > { %v2440_v6 = vadd.f32 %v6176_v58, %v2419_v28 }
 0x505   : > { %v2135_v57 = vpop.permute.xlu0 %2134  ;;  %v2137_v22 = vpop.permute.xlu1 %2136  ;;  %v2442_v8 = vadd.f32 %v5411_v31, %v2421_v61 }
 0x506   : > { %v2140_v21 = vsel %vm865_vm11, %v2135_v57, %v2137_v22  ;;  %v2145_v56 = vadd.f32 %v2135_v57, %v2124_v4  ;;  %v2141_v46 = vsel %vm865_vm11, %v2137_v22, %v6188_v16  ;;  %v2478_v57 = vsel %vm908_vm12, %v6192_v9, %v6191_v62  ;;  %v6198_v4 = vld [vmem:[#allocation131_spill] sm:$0xff] }
 0x507   : > { %v2146_v53 = vadd.f32 %v2140_v21, %v2125_v19  ;;  %v2441_v22 = vadd.f32 %v5416_v34, %v2420_v32  ;;  %v2147_v36 = vadd.f32 %v2141_v46, %v2126_v0  ;;  %v6199_v0 = vld [vmem:[#allocation132_spill] sm:$0xff] }
 0x508   : > { %v2166_v31 = vadd.f32 %v6182_v48, %v2145_v56  ;;  %v6203_v46 = vld [vmem:[#allocation136_spill] sm:$0xff] }
 0x509   : > { %v2725_v11 = vpop.permute.xlu0 %2724  ;;  %v2727_v49 = vpop.permute.xlu1 %2726  ;;  %v2167_v59 = vadd.f32 %v2161_v13, %v2146_v53  ;;  %v2168_v19 = vadd.f32 %v2162_v39, %v2147_v36  ;;  %v6204_v53 = vld [vmem:[#allocation40_spill] sm:$0xff] }
 0x50a   : > { %v2730_v17 = vsel %vm822_vm10, %v2725_v11, %v2727_v49  ;;  %v2731_v51 = vsel %vm822_vm10, %v2727_v49, %v6187_v30  ;;  %v6195_v49 = vld [vmem:[#allocation39_spill] sm:$0xff]  ;;  %v2735_v58 = vadd.f32 %v2725_v11, %v2714_v50  ;;  %v6201_v11 = vld [vmem:[#allocation133_spill] sm:$0xff] }
 0x50b   : > { %v2736_v10 = vadd.f32 %v2730_v17, %v2715_v33  ;;  %v2737_v29 = vadd.f32 %v2731_v51, %v2716_v26  ;;  %v2794_v54 = vsel %vm908_vm12, %v6195_v49, %v6194_v27  ;;  %v2793_v23 = vsel %vm908_vm12, %v6196_v1, %v6195_v49  ;;  %v6200_v33 = vld [vmem:[#allocation38_spill] sm:$0xff] }
 0x50c   : > { %v2204_v28 = vsel %vm457_vm5, %v6200_v33, %v6199_v0 }
 0x50d   : > { %v2451_v20 = vpop.permute.xlu0 %2450  ;;  %v2453_v45 = vpop.permute.xlu1 %2452  ;;  %v2757_v52 = vadd.f32 %v2751_v63, %v2736_v10  ;;  %v2758_v43 = vadd.f32 %v2752_v12, %v2737_v29  ;;  %v2520_v10 = vsel %vm457_vm5, %v6204_v53, %v6203_v46 }
 0x50e   : > { %v2456_v15 = vsel %vm865_vm11, %v2451_v20, %v2453_v45  ;;  %v2457_v47 = vsel %vm865_vm11, %v2453_v45, %v6189_v55  ;;  %v2461_v48 = vadd.f32 %v2451_v20, %v2440_v6  ;;  %v6202_v20 = vld [vmem:[#allocation176_spill] sm:$0xff]  ;;  %v6205_v55 = vld [vmem:[#allocation178_spill] sm:$0xff] }
 0x50f   : > { %v2462_v34 = vadd.f32 %v2456_v15, %v2441_v22  ;;  %v2463_v35 = vadd.f32 %v2457_v47, %v2442_v8  ;;  %v2203_v16 = vsel %vm457_vm5, %v6202_v20, %v6200_v33  ;;  %v2519_v47 = vsel %vm457_vm5, %v6205_v55, %v6204_v53 }
 0x511   : > { %v2177_v5 = vpop.permute.xlu0 %2176  ;;  %v2179_v37 = vpop.permute.xlu1 %2178  ;;  %v2483_v61 = vadd.f32 %v2477_v25, %v2462_v34  ;;  %v2484_v32 = vadd.f32 %v2478_v57, %v2463_v35 }
 0x512   : > { %v2182_v40 = vsel %vm908_vm12, %v2177_v5, %v2179_v37  ;;  %v2183_v24 = vsel %vm908_vm12, %v2179_v37, %v6197_v3  ;;  %v2187_v13 = vadd.f32 %v2177_v5, %v2166_v31  ;;  %v2756_v5 = vadd.f32 %v6190_v60, %v2735_v58 }
 0x513   : > { %v2188_v12 = vadd.f32 %v2182_v40, %v2167_v59  ;;  %v2189_v17 = vadd.f32 %v2183_v24, %v2168_v19  ;;  %v2482_v37 = vadd.f32 %v6193_v14, %v2461_v48  ;;  %v6208_v24 = vld [vmem:[#allocation139_spill] sm:$0xff] }
 0x514   : > { %v2208_v63 = vadd.f32 %v6202_v20, %v2187_v13 }
 0x515   : > { %v2767_v42 = vpop.permute.xlu0 %2766  ;;  %v2769_v41 = vpop.permute.xlu1 %2768  ;;  %v2209_v9 = vadd.f32 %v2203_v16, %v2188_v12  ;;  %v2210_v57 = vadd.f32 %v2204_v28, %v2189_v17  ;;  %v6211_v17 = vld [vmem:[#allocation138_spill] sm:$0xff] }
 0x516   : > { %v2772_v18 = vsel %vm865_vm11, %v2767_v42, %v2769_v41  ;;  %v2773_v38 = vsel %vm865_vm11, %v2769_v41, %v6198_v4  ;;  %v2777_v27 = vadd.f32 %v2767_v42, %v2756_v5 }
 0x517   : > { %v2778_v21 = vadd.f32 %v2772_v18, %v2757_v52  ;;  %v2779_v45 = vadd.f32 %v2773_v38, %v2758_v43  ;;  %v6207_v52 = vld [vmem:[#allocation137_spill] sm:$0xff]  ;;  %v6210_v38 = vld [vmem:[#allocation179_spill] sm:$0xff] }
 0x518   : > { %v2798_v31 = vadd.f32 %v6196_v1, %v2777_v27  ;;  %v6209_v18 = vld [vmem:[#allocation41_spill] sm:$0xff] }
 0x519   : > { %v2493_v30 = vpop.permute.xlu0 %2492  ;;  %v2495_v51 = vpop.permute.xlu1 %2494  ;;  %v2799_v26 = vadd.f32 %v2793_v23, %v2778_v21  ;;  %v2800_v44 = vadd.f32 %v2794_v54, %v2779_v45  ;;  %v6206_v23 = vld [vmem:[#allocation135_spill] sm:$0xff]  ;;  %v2836_v4 = vsel %vm457_vm5, %v6209_v18, %v6208_v24  ;;  %v2835_v58 = vsel %vm457_vm5, %v6210_v38, %v6209_v18 }
 0x51a   : > { %v2498_v56 = vsel %vm908_vm12, %v2493_v30, %v2495_v51  ;;  %v2499_v39 = vsel %vm908_vm12, %v2495_v51, %v6201_v11  ;;  %v2503_v60 = vadd.f32 %v2493_v30, %v2482_v37 }
 0x51b   : > { %v2504_v29 = vadd.f32 %v2498_v56, %v2483_v61  ;;  %v2505_v15 = vadd.f32 %v2499_v39, %v2484_v32 }
 0x51c   : > { %v2524_v19 = vadd.f32 %v6205_v55, %v2503_v60  ;;  %v3109_v60 = vld [vmem:[%s5630_s5 + $0x2] ss:$8 sm:$0x3] }
 0x51d   : > { %v2219_v62 = vpop.permute.xlu0 %2218  ;;  %v2221_v22 = vpop.permute.xlu1 %2220  ;;  %v2525_v8 = vadd.f32 %v2519_v47, %v2504_v29  ;;  %v2526_v25 = vadd.f32 %v2520_v10, %v2505_v15 }
 0x51e   : > { %v2229_v49 = vadd.f32 %v2219_v62, %v2208_v63  ;;  %v2224_v54 = vsel %vm457_vm5, %v2219_v62, %v2221_v22  ;;  %v2225_v36 = vsel %vm457_vm5, %v2221_v22, %v6206_v23  ;;  %v3094_v23 = vld [vmem:[%s5630_s5 + $0x1] ss:$8 sm:$0x3] }
 0x51f   : > { %v2230_v50 = vadd.f32 %v2224_v54, %v2209_v9  ;;  %v2231_v6 = vadd.f32 %v2225_v36, %v2210_v57 }
 0x521   : > { %v2237_v34 = vcombine.low %v2229_v49, %v2230_v50  ;;  %v2809_v14 = vpop.permute.xlu0 %2808  ;;  %v2811_v35 = vpop.permute.xlu1 %2810  ;;  %v2251_v41 = vrot.slane %v2231_v6, %v5033_v2 }
 0x522   : > { %v2814_v59 = vsel %vm908_vm12, %v2809_v14, %v2811_v35  ;;  %v2815_v43 = vsel %vm908_vm12, %v2811_v35, %v6207_v52  ;;  %v2819_v1 = vadd.f32 %v2809_v14, %v2798_v31  ;;  %v3124_v31 = vld [vmem:[%s5630_s5 + $0x3] ss:$8 sm:$0x3] }
 0x523   : > { %v2244_v42 = vrot.slane %v2237_v34, %v5033_v2  ;;  %v2820_v40 = vadd.f32 %v2814_v59, %v2799_v26  ;;  %v2821_v3 = vadd.f32 %v2815_v43, %v2800_v44 }
 0x524   : > { %v2840_v0 = vadd.f32 %v6210_v38, %v2819_v1 }
 0x525   : > { %v2252_v21 = vcombine.low %v2244_v42, %v2251_v41  ;;  %v2535_v45 = vpop.permute.xlu0 %2534  ;;  %v2537_v48 = vpop.permute.xlu1 %2536  ;;  %v2841_v13 = vadd.f32 %v2835_v58, %v2820_v40  ;;  %v2842_v61 = vadd.f32 %v2836_v4, %v2821_v3  ;;  %v3139_v41 = vld [vmem:[%s5630_s5 + $0x4] ss:$8 sm:$0x3]  ;;  %v3154_v4 = vld [vmem:[%s5630_s5 + $0x5] ss:$8 sm:$0x3] }
 0x526   : > { %v2545_v32 = vadd.f32 %v2535_v45, %v2524_v19  ;;  %v2540_v12 = vsel %vm457_vm5, %v2535_v45, %v2537_v48  ;;  %v2541_v30 = vsel %vm457_vm5, %v2537_v48, %v6211_v17  ;;  %v3169_v48 = vld [vmem:[%s5630_s5 + $0x6] ss:$8 sm:$0x3] }
 0x527   : > { %v2546_v51 = vadd.f32 %v2540_v12, %v2525_v8  ;;  %v2547_v26 = vadd.f32 %v2541_v30, %v2526_v25  ;;  %v2259_v44 = vrot.slane %v2252_v21, %v5033_v2 }
 0x529   : > { %v2553_v33 = vcombine.low %v2545_v32, %v2546_v51  ;;  %v2853_v28 = vpop.permute.xlu0 %2852  ;;  %v2851_v56 = vpop.permute.xlu1 %2850  ;;  %2260 = vrot.lane.b32.xlu0 %v2259_v44, %s3465_s26  ;;  %v2567_v16 = vrot.slane %v2547_v26, %v5033_v2  ;;  %s2900_s26 = sld [smem:[#allocation7]] }
 0x52a   : > { %v2856_v11 = vsel %vm457_vm5, %v2851_v56, %v2853_v28  ;;  %v2861_v39 = vadd.f32 %v2851_v56, %v2840_v0 }
 0x52b   : > { %v2560_v20 = vrot.slane %v2553_v33, %v5033_v2  ;;  %v2862_v46 = vadd.f32 %v2856_v11, %v2841_v13  ;;  %v2919_v11 = vsub.s32 1, %v6069_v7 }
 0x52d   : > { %v2568_v53 = vcombine.low %v2560_v20, %v2567_v16  ;;  %v2869_v10 = vcombine.low %v2861_v39, %v2862_v46  ;;  %v2855_v29 = vpop.permute.xlu1 %2854  ;;  %v1008_v9 = vpop.permute.xlu0 %1007  ;;  %v6213_v20 = vsub.s32 0, %v6069_v7 }
 0x52e   : > { %v2857_v15 = vsel %vm457_vm5, %v2853_v28, %v2855_v29  ;;  %v1009_v27 = vrot.slane %v1008_v9, 1  ;;  %v6215_v29 = vld [vmem:[#allocation143_spill] sm:$0xff] }
 0x52f   : > { %v2863_v55 = vadd.f32 %v2857_v15, %v2842_v61  ;;  %v2575_v47 = vrot.slane %v2568_v53, %v5033_v2  ;;  %v2876_v5 = vrot.slane %v2869_v10, %v5033_v2  ;;  %v2901_v30 = vstv %s2900_s26  ;;  %v6214_v53 = vld [vmem:[#allocation142_spill] sm:$0xff] }
 0x530   : > { %v1011_v6 = vsel %vm1010_vm14, %v1008_v9, %v1009_v27 }
 0x531   : > { %v2883_v37 = vrot.slane %v2863_v55, %v5033_v2  ;;  %2576 = vrot.lane.b32.xlu1 %v2575_v47, %s3466_s0  ;;  %v1324_v57 = vpop.permute.xlu1 %1323  ;;  %s3170_s0 = sld [smem:[#allocation7 + $0x1]]  ;;  %v6216_v55 = vld [vmem:[#allocation140_spill] sm:$0xff] }
 0x532   : > { %v1325_v8 = vrot.slane %v1324_v57, 1 }
 0x533   : > { %v2884_v63 = vcombine.low %v2876_v5, %v2883_v37  ;;  %v6217_v5 = vld [vmem:[#allocation141_spill] sm:$0xff] }
 0x534   : > { %v1327_v36 = vsel %vm1326_vm13, %v1324_v57, %v1325_v8  ;;  %v6220_v57 = vld [vmem:[#allocation146_spill] sm:$0xff]  ;;  %v6221_v8 = vld [vmem:[#allocation147_spill] sm:$0xff] }
 0x535   : > { %v2891_v62 = vrot.slane %v2884_v63, %v5033_v2  ;;  %v980_v2 = vld [vmem:[%s5630_s5] ss:$8 sm:$0x3]  ;;  %v1329_v35 = vmul.f32 %v3094_v23, %v1327_v36  ;;  %v6218_v63 = vld [vmem:[#allocation144_spill] sm:$0xff] }
 0x536   : > { %v1013_v52 = vmul.f32 %v1011_v6, %v980_v2 }
 0x537   : > { %2892 = vrot.lane.b32.xlu0 %v2891_v62, %s3467_s10  ;;  %v2904_v26 = vstv %s3170_s0  ;;  %v6219_v62 = vld [vmem:[#allocation145_spill] sm:$0xff] }
 0x538   : > { %v1330_v24 = vadd.f32 %v1329_v35, %v1013_v52 }
 0x547   : > { %v1640_v22 = vpop.permute.xlu0 %1639 }
 0x548   : > { %v1641_v49 = vrot.slane %v1640_v22, 1 }
 0x54a   : > { %v1643_v34 = vsel %vm1642_vm15, %v1640_v22, %v1641_v49 }
 0x54b   : > { %v1645_v43 = vmul.f32 %v3109_v60, %v1643_v34 }
 0x54d   : > { %v1646_v58 = vadd.f32 %v1645_v43, %v1330_v24 }
 0x55f   : > { %v1946_v25 = vpop.permute.xlu1 %1945 }
 0x560   : > { %v1947_v50 = vrot.slane %v1946_v25, 1 }
 0x562   : > { %v1948_v59 = vsel %vm908_vm12, %v1946_v25, %v1947_v50 }
 0x563   : > { %v1950_v18 = vmul.f32 %v3124_v31, %v1948_v59 }
 0x565   : > { %v1951_v19 = vadd.f32 %v1950_v18, %v1646_v58 }
 0x59b   : > { %v2261_v54 = vpop.permute.xlu0 %2260 }
 0x59c   : > { %v2262_v14 = vrot.slane %v2261_v54, 1 }
 0x59e   : > { %v2264_v40 = vsel %vm2263_vm0, %v2261_v54, %v2262_v14 }
 0x59f   : > { %v2266_v1 = vmul.f32 %v3139_v41, %v2264_v40 }
 0x5a1   : > { %v2267_v61 = vadd.f32 %v2266_v1, %v1951_v19 }
 0x5a3   : > { %v2577_v42 = vpop.permute.xlu1 %2576 }
 0x5a4   : > { %v2578_v3 = vrot.slane %v2577_v42, 1 }
 0x5a6   : > { %v2580_v38 = vsel %vm2579_vm1, %v2577_v42, %v2578_v3 }
 0x5a7   : > { %v2582_v21 = vmul.f32 %v3154_v4, %v2580_v38 }
 0x5a9   : > { %v2893_v45 = vpop.permute.xlu0 %2892  ;;  %v2583_v12 = vadd.f32 %v2582_v21, %v2267_v61 }
 0x5aa   : > { %v2894_v13 = vrot.slane %v2893_v45, 1 }
 0x5ac   : > { %v2896_v32 = vsel %vm2895_vm2, %v2893_v45, %v2894_v13 }
 0x5ad   : > { %v2898_v17 = vmul.f32 %v3169_v48, %v2896_v32 }
 0x5af   : > { %v2899_v51 = vadd.f32 %v2898_v17, %v2583_v12 }
 0x5b1   : > { %v2902_v44 = vmul.f32 %v2901_v30, %v2899_v51 }
 0x5b3   : > { %v2905_v0 = vadd.f32 %v2904_v26, %v2902_v44 }
 0x5b5   : > { %v3171_v33 = vmul.f32 -1.442695, %v2905_v0 }
 0x5b7   : > { %3299 = vpow2.f32 %v3171_v33 }
 0x5c1   : > { %v3300_v28 = vpop.eup %3299 }
 0x5c2   : > { %v2909_v56 = vadd.f32 1.0, %v3300_v28 }
 0x5c4   : > { %3301 = vrcp.f32 %v2909_v56 }
 0x5ce   : > { %v3302_v39 = vpop.eup %3301 }
 0x5cf   : > { %v2916_v16 = vrot.slane %v3302_v39, %v6213_v20  ;;  %v2920_v46 = vrot.slane %v3302_v39, %v2919_v11 }
 0x5d1   : > { %v2923_v10 = vmul.f32 %v2916_v16, %v6214_v53  ;;  %v2924_v15 = vmul.f32 %v2920_v46, %v6215_v29  ;;  %v2925_v47 = vmul.f32 %v2916_v16, %v6216_v55  ;;  %v2926_v37 = vmul.f32 %v2920_v46, %v6217_v5 }
 0x5d2   : > { %v2927_v7 = vmul.f32 %v2916_v16, %v6218_v63  ;;  %v2928_v9 = vmul.f32 %v2920_v46, %v6219_v62  ;;  %v2929_v22 = vmul.f32 %v2916_v16, %v6220_v57  ;;  %v2930_v25 = vmul.f32 %v2920_v46, %v6221_v8 }
 0x5d3   : > { %2931 = vst [vmem:[%s350_s19] sm:$0xff] %v2923_v10  ;;  %2932 = vst [vmem:[%s350_s19 + $0x8] sm:$0xff] %v2924_v15 }
 0x5d4   : > { %2933 = vst [vmem:[%s350_s19 + $0x10] sm:$0xff] %v2925_v47  ;;  %2934 = vst [vmem:[%s350_s19 + $0x18] sm:$0xff] %v2926_v37 }
 0x5d5   : > { %2935 = vst [vmem:[%s350_s19 + $0x20] sm:$0xff] %v2927_v7  ;;  %2936 = vst [vmem:[%s350_s19 + $0x28] sm:$0xff] %v2928_v9 }
 0x5d6   : > { %2937 = vst [vmem:[%s350_s19 + $0x30] sm:$0xff] %v2929_v22  ;;  %2938 = vst [vmem:[%s350_s19 + $0x38] sm:$0xff] %v2930_v25 }
 0x5d7   : > { %3384 = shalt.err (!%p3381_p7)
}
 0x5d8   : > { %s3385_s26 = scalar_lea.hbm %s5575_s9, 1024  ;;  %s3389_s16 = scalar_lea.hbm %s5633_s8, 2048 }
 0x5d9   : > { %p3386_p11 = scmp.ne.s32.totalorder %s5575_s9, %s3385_s26  ;;  %p3390_p3 = scmp.lt.u32.totalorder %s5575_s9, %s5633_s8 }
 0x5da   : > { %p3391_p9 = scmp.lt.u32.totalorder %s3389_s16, %s3385_s26  ;;  %p3393_p5 = scmp.lt.u32.totalorder %s3385_s26, %s5575_s9 }
 0x5db   : > { %p3387_p13 = pnand %p3386_p11, %p6222_p2 }
 0x5dc   : > { %p3392_p1 = por %p3391_p9, %p3390_p3 }
 0x5dd   : > { %p3388_p6 = pneg %p3387_p13 }
 0x5de   : > { %p3394_p8 = por %p3393_p5, %p3392_p1 }
 0x5e0   : > { %p3395_p10 = pnand %p3394_p8, %p3388_p6 }
 0x5e2   : > { %3398 = shalt.err (!%p3395_p10)
}
 0x5e3   : > { %s3469_s19 = smov 256   ;;  %s3470_s23 = smov 16  }
 0x5e4   : > { %3218 = dma.vmem_to_hbm [thread:$0]  (%p6222_p2), %s5577_s20, 1024, %s5575_s9, %s2940_s21, %s3469_s19, %s3469_s19, %s3470_s23  }
 0x5e5 PF: > { %s2968_s6 = sand.u32 1, %s3433_s27   ;;  %p6223_p4 = scmp.ne.s32.totalorder %s5808_s18, 0 }
 0x5e6   : > { %p6224_p12 = scmp.ge.s32.totalorder %s3445_s30, 2  ;;  %s2969_s22 = scalar_lea.sflag [#allocation4], %s2968_s6 }
 0x5e8   : > { %p3232_p0 = pnand %p6224_p12, %p6223_p4 }
 0x5ea   : > { %3428 = dma.done.wait (!%p3232_p0), %s2969_s22, 1024  }
 0x5eb   : > { %3430 = vsyncadd (!%p3232_p0), %s2969_s22, 4294966272  ;;  %p23_p7 = scmp.ge.s32.totalorder %s3541_s11, 4   ;;  %s6225_s27 = smov %s3437_s28 }
 0x5ec   : > { %s6226_s28 = smov %s3441_s29  ;;  %s6227_s29 = smov %s3553_s14 }
 0x5ed   : > { %s6228_s30 = smov %s3541_s11  ;;  %25 = sbr.rel (!%p23_p7) target bundleno = 11 (0xb), region = 112 }
 0x5f4   :  { %2974 = vsyncpa [#allocation3], 1 }
 0x5f5   :  { %2976 = vsyncpa [#allocation3 + $0x1], 1 }
 0x5f6   :  { %2977 = vsyncpa [#allocation4], 1 }
 0x5f7   :  { %2979 = vsyncpa [#allocation4 + $0x1], 1 }
 0x5f8   :  { %2980 = vsyncpa [#allocation5], 1 }
 0x5f9   :  { %2982 = vsyncpa [#allocation5 + $0x1], 1 }
 0x5fa   :  { %2983 = vsyncpa [#allocation8], 1 }

</bundles_post_ra>
